<compile_context>
chip_gen: v6e
topology: v6e:2x2x1
jax: 0.10.0
libtpu: 0.0.40
codegen_flags: <defaults>
</compile_context>

<pallas_src>
import jax
import jax.numpy as jnp
import numpy as np
from jax import lax
from jax.experimental import pallas as pl
from jax.experimental.pallas import tpu as pltpu

BN_EPS = 1e-5
LANE = 128


def _round_up(x, m):
    return (x + m - 1) // m * m


def _pick_row_tile(h, target):
    r = max(1, min(h, target))
    while h % r:
        r -= 1
    return r


def basic_block_kernel(x_hbm, w1_ref, b1_ref, w2_ref, b2_ref, out_ref,
                       slab, col, hpad, sem):
    """One (image, row-tile) per grid step.

    x_hbm  : (N, H+4, W+2, Cp) f32, HBM (pl.ANY)  zero-padded input
    w?_ref : (9*Cp, Cp) bf16   conv weights, BN scale folded, rows (ky,kx,cin)
    b?_ref : (1, Cp)    f32    folded eval-mode BatchNorm bias
    out_ref: (R, W, Cp) f32    output row tile
    slab   : VMEM (R+4, W+2, Cp) f32   input slab (2-row halo each side)
    col    : VMEM ((R+2)*W, 9*Cp) bf16 im2col buffer (shared by both convs)
    hpad   : VMEM (R+2, W+2, Cp) bf16  zero-padded conv1 tile (1-row halo)
    """
    R, W, Cp = out_ref.shape
    n = pl.program_id(0)
    t = pl.program_id(1)
    n_tiles = pl.num_programs(1)

    # ---- fetch the (R+4, W+2, Cp) input slab: rows [t*R, t*R+R+4) of xpad ----
    row0 = pl.multiple_of(t * R, R)
    cp = pltpu.make_async_copy(x_hbm.at[n, pl.ds(row0, R + 4)], slab, sem)
    cp.start()
    cp.wait()

    # ---- conv1 (bn1 scale folded into w1) over R+2 rows (1-row halo recompute):
    #      bf16 im2col, then ONE K = 9*Cp MXU matmul with f32 accumulation ----
    for dy in range(3):
        for dx in range(3):
            k = dy * 3 + dx
            col[:, k * Cp:(k + 1) * Cp] = (
                slab[dy:dy + R + 2, dx:dx + W, :]
                .reshape((R + 2) * W, Cp).astype(jnp.bfloat16))
    acc1 = jnp.dot(col[...], w1_ref[...], preferred_element_type=jnp.float32)

    # bn1 bias + ReLU; stored bf16 (it is conv2's bf16 matmul operand anyway).
    h = jnp.maximum(acc1 + b1_ref[...], 0.0).astype(jnp.bfloat16)

    # ---- padded conv1 tile: zero column halo, write interior, and zero the
    #      row halo ONLY at the true image border (elsewhere it is a valid
    #      recomputed conv1 row).  Per-step, so megacore-parallel safe. ----
    zcol = jnp.zeros((R + 2, 1, Cp), jnp.bfloat16)
    hpad[:, 0:1, :] = zcol
    hpad[:, W + 1:W + 2, :] = zcol
    hpad[:, 1:W + 1, :] = h.reshape(R + 2, W, Cp)

    @pl.when(t == 0)
    def _():
        hpad[0:1, :, :] = jnp.zeros((1, W + 2, Cp), jnp.bfloat16)

    @pl.when(t == n_tiles - 1)
    def _():
        hpad[R + 1:R + 2, :, :] = jnp.zeros((1, W + 2, Cp), jnp.bfloat16)

    # ---- conv2 (bn2 scale folded into w2): reuse first R*W rows of `col` ----
    for dy in range(3):
        for dx in range(3):
            k = dy * 3 + dx
            col[0:R * W, k * Cp:(k + 1) * Cp] = (
                hpad[dy:dy + R, dx:dx + W, :].reshape(R * W, Cp))
    acc2 = jnp.dot(col[0:R * W, :], w2_ref[...],
                   preferred_element_type=jnp.float32)

    # ---- bn2 bias + residual (3-D add from the slab interior) + ReLU ----
    o = acc2.reshape(R, W, Cp) + b2_ref[...].reshape(1, 1, Cp)
    o = o + slab[2:R + 2, 1:W + 1, :]
    out_ref[...] = jnp.maximum(o, 0.0)


def _fold_bn(gamma, beta, mean, var, eps=BN_EPS):
    scale = gamma / jnp.sqrt(var + eps)
    bias = beta - mean * scale
    return scale, bias


def basic_block(x_nchw, params, row_tile=None):
    """Forward pass of BasicBlock (eval mode). x_nchw: (N, C, H, W) float32."""
    (w1, g1, be1, m1, v1, w2, g2, be2, m2, v2) = params
    N, C, H, W = x_nchw.shape
    Cp = _round_up(max(C, LANE), LANE)          # lane-dense channel count
    R = _pick_row_tile(H, 16 if row_tile is None else row_tile)
    T = H // R
    Wp = W + 2

    # NCHW -> NHWC; 2-row halo (tile halo recompute), 1-col halo, channel pad.
    # NOTE: in a full network keep activations NHWC/Cp-padded across blocks so
    # this transpose/pad/slice only happens once at the ends, and rethink the
    # Cp=128 padding for stages with C well below 128.
    x = jnp.transpose(x_nchw, (0, 2, 3, 1)).astype(jnp.float32)
    xpad = jnp.pad(x, ((0, 0), (2, 2), (1, 1), (0, Cp - C)))

    s1, b1 = _fold_bn(g1.astype(jnp.float32), be1.astype(jnp.float32),
                      m1.astype(jnp.float32), v1.astype(jnp.float32))
    s2, b2 = _fold_bn(g2.astype(jnp.float32), be2.astype(jnp.float32),
                      m2.astype(jnp.float32), v2.astype(jnp.float32))

    def prep_w(w, scale):
        # OIHW -> (ky,kx,I,O); fold BN scale into output channels; pad to Cp;
        # flatten to one (9*Cp, Cp) bf16 MXU operand (rows ordered ky,kx,cin).
        w = jnp.transpose(w, (2, 3, 1, 0)).astype(jnp.float32)
        w = w * scale.reshape(1, 1, 1, C)
        w = jnp.pad(w, ((0, 0), (0, 0), (0, Cp - C), (0, Cp - C)))
        return w.reshape(9 * Cp, Cp).astype(jnp.bfloat16)

    def prep_b(b):
        # Padded channels: conv out 0, bias 0, residual 0 -> stays 0.
        return jnp.pad(b, (0, Cp - C)).reshape(1, Cp).astype(jnp.float32)

    w1k, w2k = prep_w(w1, s1), prep_w(w2, s2)
    b1p, b2p = prep_b(b1), prep_b(b2)

    out_padded = pl.pallas_call(
        basic_block_kernel,
        out_shape=jax.ShapeDtypeStruct((N, H, W, Cp), jnp.float32),
        grid_spec=pltpu.PrefetchScalarGridSpec(
            num_scalar_prefetch=0,
            grid=(N, T),
            in_specs=[
                pl.BlockSpec(memory_space=pl.ANY),                 # xpad in HBM
                pl.BlockSpec((9 * Cp, Cp), lambda n, t: (0, 0)),   # w1 (bf16)
                pl.BlockSpec((1, Cp), lambda n, t: (0, 0)),        # b1
                pl.BlockSpec((9 * Cp, Cp), lambda n, t: (0, 0)),   # w2 (bf16)
                pl.BlockSpec((1, Cp), lambda n, t: (0, 0)),        # b2
            ],
            out_specs=pl.BlockSpec((None, R, W, Cp),
                                   lambda n, t: (n, t, 0, 0)),
            scratch_shapes=[
                pltpu.VMEM((R + 4, Wp, Cp), jnp.float32),         # input slab
                pltpu.VMEM(((R + 2) * W, 9 * Cp), jnp.bfloat16),  # im2col buf
                pltpu.VMEM((R + 2, Wp, Cp), jnp.bfloat16),        # padded conv1
                pltpu.SemaphoreType.DMA(()),                      # slab DMA sem
            ],
        ),
        compiler_params=pltpu.CompilerParams(
            dimension_semantics=("parallel", "parallel"),
            vmem_limit_bytes=32 * 1024 * 1024,   # actual use ~4 MB; fits v7x
        ),
    )(xpad, w1k, b1p, w2k, b2p)

    out = out_padded[..., :C]                    # drop channel pad
    return jnp.transpose(out, (0, 3, 1, 2))      # back to NCHW


def reference_basic_block(x_nchw, params):
    """Pure-JAX (XLA, f32) reference matching PyTorch eval-mode semantics."""
    (w1, g1, be1, m1, v1, w2, g2, be2, m2, v2) = params
    dn = ('NCHW', 'OIHW', 'NCHW')

    def conv(x, w):
        return lax.conv_general_dilated(x, w, (1, 1), ((1, 1), (1, 1)),
                                        dimension_numbers=dn)

    def bn(x, g, b, m, v):
        g = g.reshape(1, -1, 1, 1); b = b.reshape(1, -1, 1, 1)
        m = m.reshape(1, -1, 1, 1); v = v.reshape(1, -1, 1, 1)
        return (x - m) / jnp.sqrt(v + BN_EPS) * g + b

    out = jnp.maximum(bn(conv(x_nchw, w1), g1, be1, m1, v1), 0.0)
    out = bn(conv(out, w2), g2, be2, m2, v2) + x_nchw
    return jnp.maximum(out, 0.0)


if __name__ == "__main__":
    # inplanes == planes == 8, stride=1, dilation=1; H=16 with row_tile=8 so
    # the multi-tile halo-recompute path (interior + both borders) is exercised.
    N, C, H, W = 2, 8, 16, 16
    key = jax.random.PRNGKey(0)
    ks = jax.random.split(key, 11)

    x = jax.random.normal(ks[0], (N, C, H, W), jnp.float32)

    w1 = 0.1 * jax.random.normal(ks[1], (C, C, 3, 3), jnp.float32)   # OIHW
    w2 = 0.1 * jax.random.normal(ks[2], (C, C, 3, 3), jnp.float32)
    g1 = 1.0 + 0.1 * jax.random.normal(ks[3], (C,), jnp.float32)
    be1 = 0.1 * jax.random.normal(ks[4], (C,), jnp.float32)
    m1 = 0.1 * jax.random.normal(ks[5], (C,), jnp.float32)
    v1 = 1.0 + 0.1 * jnp.abs(jax.random.normal(ks[6], (C,), jnp.float32))
    g2 = 1.0 + 0.1 * jax.random.normal(ks[7], (C,), jnp.float32)
    be2 = 0.1 * jax.random.normal(ks[8], (C,), jnp.float32)
    m2 = 0.1 * jax.random.normal(ks[9], (C,), jnp.float32)
    v2 = 1.0 + 0.1 * jnp.abs(jax.random.normal(ks[10], (C,), jnp.float32))

    params = (w1, g1, be1, m1, v1, w2, g2, be2, m2, v2)

    out = jax.block_until_ready(basic_block(x, params, row_tile=8))
    ref = jax.block_until_ready(reference_basic_block(x, params))
    # bf16 MXU operands -> expect ~1e-3..1e-2 deviation from the f32 reference.
    np.testing.assert_allclose(np.asarray(out), np.asarray(ref),
                               rtol=5e-2, atol=5e-2)
    print("KERNEL_OK")
</pallas_src>

<mosaic_0001>
module attributes {stable_mosaic.version = 11 : i64} {
  func.func @basic_block_kernel(%arg0: i32, %arg1: i32, %arg2: memref<2x20x18x128xf32, #tpu.memory_space<any>>, %arg3: memref<1152x128xbf16, #tpu.memory_space<vmem>>, %arg4: memref<1x128xf32, #tpu.memory_space<vmem>>, %arg5: memref<1152x128xbf16, #tpu.memory_space<vmem>>, %arg6: memref<1x128xf32, #tpu.memory_space<vmem>>, %arg7: memref<1x8x16x128xf32, #tpu.memory_space<vmem>>, %arg8: memref<12x18x128xf32, #tpu.memory_space<vmem>>, %arg9: memref<160x1152xbf16, #tpu.memory_space<vmem>>, %arg10: memref<10x18x128xbf16, #tpu.memory_space<vmem>>, %arg11: memref<!tpu.dma_semaphore, #tpu.memory_space<semaphore_mem>>) attributes {dimension_semantics = [#tpu.dimension_semantics<parallel>, #tpu.dimension_semantics<parallel>], iteration_bounds = array<i64: 2, 2>, scalar_prefetch = 0 : i64, scratch_operands = 4 : i64, tpu.core_type = #tpu.core_type<tc>, window_params = [{}, {pipeline_mode = #tpu.pipeline_mode<synchronous>, transform_indices = @transform_1, window_bounds = array<i64: 1152, 128>}, {pipeline_mode = #tpu.pipeline_mode<synchronous>, transform_indices = @transform_2, window_bounds = array<i64: 1, 128>}, {pipeline_mode = #tpu.pipeline_mode<synchronous>, transform_indices = @transform_3, window_bounds = array<i64: 1152, 128>}, {pipeline_mode = #tpu.pipeline_mode<synchronous>, transform_indices = @transform_4, window_bounds = array<i64: 1, 128>}, {transform_indices = @transform_5, window_bounds = array<i64: 1, 8, 16, 128>}]} {
    %c8_i32 = arith.constant 8 : i32
    %0 = arith.muli %arg1, %c8_i32 : i32
    %1 = tpu.assume_multiple %0, 8 : i32
    %c0_i32 = arith.constant 0 : i32
    %c0_i32_0 = arith.constant 0 : i32
    %2 = tpu.memref_slice %arg2[%arg0, %1, %c0_i32, %c0_i32_0] : memref<2x20x18x128xf32, #tpu.memory_space<any>> -> memref<1x12x18x128xf32, #tpu.memory_space<any>>
    %3 = tpu.memref_squeeze %2 : memref<1x12x18x128xf32, #tpu.memory_space<any>> -> memref<12x18x128xf32, #tpu.memory_space<any>>
    tpu.enqueue_dma source(%3 : memref<12x18x128xf32, #tpu.memory_space<any>>) target(%arg8 : memref<12x18x128xf32, #tpu.memory_space<vmem>>) target_semaphore(%arg11 : memref<!tpu.dma_semaphore, #tpu.memory_space<semaphore_mem>>)
    %c0_i32_1 = arith.constant 0 : i32
    %c0_i32_2 = arith.constant 0 : i32
    %4 = tpu.memref_slice %arg2[%arg0, %1, %c0_i32_1, %c0_i32_2] : memref<2x20x18x128xf32, #tpu.memory_space<any>> -> memref<1x12x18x128xf32, #tpu.memory_space<any>>
    %5 = tpu.memref_squeeze %4 : memref<1x12x18x128xf32, #tpu.memory_space<any>> -> memref<12x18x128xf32, #tpu.memory_space<any>>
    tpu.wait_dma2 semaphore(%arg11 : memref<!tpu.dma_semaphore, #tpu.memory_space<semaphore_mem>>) src(%5 : memref<12x18x128xf32, #tpu.memory_space<any>>) dst(%arg8 : memref<12x18x128xf32, #tpu.memory_space<vmem>>)
    %c0 = arith.constant 0 : index
    %c0_3 = arith.constant 0 : index
    %c0_4 = arith.constant 0 : index
    %6 = vector.load %arg8[%c0, %c0_3, %c0_4] : memref<12x18x128xf32, #tpu.memory_space<vmem>>, vector<10x16x128xf32>
    %7 = vector.shape_cast %6 : vector<10x16x128xf32> to vector<160x128xf32>
    %8 = arith.truncf %7 : vector<160x128xf32> to vector<160x128xbf16>
    %c0_5 = arith.constant 0 : index
    %c0_6 = arith.constant 0 : index
    %9 = vector.load %arg9[%c0_5, %c0_6] : memref<160x1152xbf16, #tpu.memory_space<vmem>>, vector<160x128xbf16>
    tpu.vector_store %arg9[%c0_5, %c0_6], %8 {strides = array<i32>} : memref<160x1152xbf16, #tpu.memory_space<vmem>>, vector<160x128xbf16>,
    %c0_7 = arith.constant 0 : index
    %c1 = arith.constant 1 : index
    %c0_8 = arith.constant 0 : index
    %10 = vector.load %arg8[%c0_7, %c1, %c0_8] : memref<12x18x128xf32, #tpu.memory_space<vmem>>, vector<10x16x128xf32>
    %11 = vector.shape_cast %10 : vector<10x16x128xf32> to vector<160x128xf32>
    %12 = arith.truncf %11 : vector<160x128xf32> to vector<160x128xbf16>
    %c0_9 = arith.constant 0 : index
    %c128 = arith.constant 128 : index
    %13 = vector.load %arg9[%c0_9, %c128] : memref<160x1152xbf16, #tpu.memory_space<vmem>>, vector<160x128xbf16>
    tpu.vector_store %arg9[%c0_9, %c128], %12 {strides = array<i32>} : memref<160x1152xbf16, #tpu.memory_space<vmem>>, vector<160x128xbf16>,
    %c0_10 = arith.constant 0 : index
    %c2 = arith.constant 2 : index
    %c0_11 = arith.constant 0 : index
    %14 = vector.load %arg8[%c0_10, %c2, %c0_11] : memref<12x18x128xf32, #tpu.memory_space<vmem>>, vector<10x16x128xf32>
    %15 = vector.shape_cast %14 : vector<10x16x128xf32> to vector<160x128xf32>
    %16 = arith.truncf %15 : vector<160x128xf32> to vector<160x128xbf16>
    %c0_12 = arith.constant 0 : index
    %c256 = arith.constant 256 : index
    %17 = vector.load %arg9[%c0_12, %c256] : memref<160x1152xbf16, #tpu.memory_space<vmem>>, vector<160x128xbf16>
    tpu.vector_store %arg9[%c0_12, %c256], %16 {strides = array<i32>} : memref<160x1152xbf16, #tpu.memory_space<vmem>>, vector<160x128xbf16>,
    %c1_13 = arith.constant 1 : index
    %c0_14 = arith.constant 0 : index
    %c0_15 = arith.constant 0 : index
    %18 = vector.load %arg8[%c1_13, %c0_14, %c0_15] : memref<12x18x128xf32, #tpu.memory_space<vmem>>, vector<10x16x128xf32>
    %19 = vector.shape_cast %18 : vector<10x16x128xf32> to vector<160x128xf32>
    %20 = arith.truncf %19 : vector<160x128xf32> to vector<160x128xbf16>
    %c0_16 = arith.constant 0 : index
    %c384 = arith.constant 384 : index
    %21 = vector.load %arg9[%c0_16, %c384] : memref<160x1152xbf16, #tpu.memory_space<vmem>>, vector<160x128xbf16>
    tpu.vector_store %arg9[%c0_16, %c384], %20 {strides = array<i32>} : memref<160x1152xbf16, #tpu.memory_space<vmem>>, vector<160x128xbf16>,
    %c1_17 = arith.constant 1 : index
    %c1_18 = arith.constant 1 : index
    %c0_19 = arith.constant 0 : index
    %22 = vector.load %arg8[%c1_17, %c1_18, %c0_19] : memref<12x18x128xf32, #tpu.memory_space<vmem>>, vector<10x16x128xf32>
    %23 = vector.shape_cast %22 : vector<10x16x128xf32> to vector<160x128xf32>
    %24 = arith.truncf %23 : vector<160x128xf32> to vector<160x128xbf16>
    %c0_20 = arith.constant 0 : index
    %c512 = arith.constant 512 : index
    %25 = vector.load %arg9[%c0_20, %c512] : memref<160x1152xbf16, #tpu.memory_space<vmem>>, vector<160x128xbf16>
    tpu.vector_store %arg9[%c0_20, %c512], %24 {strides = array<i32>} : memref<160x1152xbf16, #tpu.memory_space<vmem>>, vector<160x128xbf16>,
    %c1_21 = arith.constant 1 : index
    %c2_22 = arith.constant 2 : index
    %c0_23 = arith.constant 0 : index
    %26 = vector.load %arg8[%c1_21, %c2_22, %c0_23] : memref<12x18x128xf32, #tpu.memory_space<vmem>>, vector<10x16x128xf32>
    %27 = vector.shape_cast %26 : vector<10x16x128xf32> to vector<160x128xf32>
    %28 = arith.truncf %27 : vector<160x128xf32> to vector<160x128xbf16>
    %c0_24 = arith.constant 0 : index
    %c640 = arith.constant 640 : index
    %29 = vector.load %arg9[%c0_24, %c640] : memref<160x1152xbf16, #tpu.memory_space<vmem>>, vector<160x128xbf16>
    tpu.vector_store %arg9[%c0_24, %c640], %28 {strides = array<i32>} : memref<160x1152xbf16, #tpu.memory_space<vmem>>, vector<160x128xbf16>,
    %c2_25 = arith.constant 2 : index
    %c0_26 = arith.constant 0 : index
    %c0_27 = arith.constant 0 : index
    %30 = vector.load %arg8[%c2_25, %c0_26, %c0_27] : memref<12x18x128xf32, #tpu.memory_space<vmem>>, vector<10x16x128xf32>
    %31 = vector.shape_cast %30 : vector<10x16x128xf32> to vector<160x128xf32>
    %32 = arith.truncf %31 : vector<160x128xf32> to vector<160x128xbf16>
    %c0_28 = arith.constant 0 : index
    %c768 = arith.constant 768 : index
    %33 = vector.load %arg9[%c0_28, %c768] : memref<160x1152xbf16, #tpu.memory_space<vmem>>, vector<160x128xbf16>
    tpu.vector_store %arg9[%c0_28, %c768], %32 {strides = array<i32>} : memref<160x1152xbf16, #tpu.memory_space<vmem>>, vector<160x128xbf16>,
    %c2_29 = arith.constant 2 : index
    %c1_30 = arith.constant 1 : index
    %c0_31 = arith.constant 0 : index
    %34 = vector.load %arg8[%c2_29, %c1_30, %c0_31] : memref<12x18x128xf32, #tpu.memory_space<vmem>>, vector<10x16x128xf32>
    %35 = vector.shape_cast %34 : vector<10x16x128xf32> to vector<160x128xf32>
    %36 = arith.truncf %35 : vector<160x128xf32> to vector<160x128xbf16>
    %c0_32 = arith.constant 0 : index
    %c896 = arith.constant 896 : index
    %37 = vector.load %arg9[%c0_32, %c896] : memref<160x1152xbf16, #tpu.memory_space<vmem>>, vector<160x128xbf16>
    tpu.vector_store %arg9[%c0_32, %c896], %36 {strides = array<i32>} : memref<160x1152xbf16, #tpu.memory_space<vmem>>, vector<160x128xbf16>,
    %c2_33 = arith.constant 2 : index
    %c2_34 = arith.constant 2 : index
    %c0_35 = arith.constant 0 : index
    %38 = vector.load %arg8[%c2_33, %c2_34, %c0_35] : memref<12x18x128xf32, #tpu.memory_space<vmem>>, vector<10x16x128xf32>
    %39 = vector.shape_cast %38 : vector<10x16x128xf32> to vector<160x128xf32>
    %40 = arith.truncf %39 : vector<160x128xf32> to vector<160x128xbf16>
    %c0_36 = arith.constant 0 : index
    %c1024 = arith.constant 1024 : index
    %41 = vector.load %arg9[%c0_36, %c1024] : memref<160x1152xbf16, #tpu.memory_space<vmem>>, vector<160x128xbf16>
    tpu.vector_store %arg9[%c0_36, %c1024], %40 {strides = array<i32>} : memref<160x1152xbf16, #tpu.memory_space<vmem>>, vector<160x128xbf16>,
    %c0_37 = arith.constant 0 : index
    %c0_38 = arith.constant 0 : index
    %42 = vector.load %arg9[%c0_37, %c0_38] : memref<160x1152xbf16, #tpu.memory_space<vmem>>, vector<160x1152xbf16>
    %c0_39 = arith.constant 0 : index
    %c0_40 = arith.constant 0 : index
    %43 = vector.load %arg3[%c0_39, %c0_40] : memref<1152x128xbf16, #tpu.memory_space<vmem>>, vector<1152x128xbf16>
    %cst = arith.constant dense<0.000000e+00> : vector<160x128xf32>
    %44 = tpu.matmul %42, %43, %cst {dimension_numbers = #tpu.dot_dimension_numbers<[1], [0], [0], [1], [0, 0, 1, 1], [], []>} : vector<160x1152xbf16>, vector<1152x128xbf16>, vector<160x128xf32> -> vector<160x128xf32>
    %c0_41 = arith.constant 0 : index
    %c0_42 = arith.constant 0 : index
    %45 = vector.load %arg4[%c0_41, %c0_42] : memref<1x128xf32, #tpu.memory_space<vmem>>, vector<1x128xf32>
    %46 = vector.broadcast %45 : vector<1x128xf32> to vector<160x128xf32>
    %47 = arith.addf %44, %46 : vector<160x128xf32>
    %cst_43 = arith.constant 0.000000e+00 : f32
    %48 = vector.broadcast %cst_43 : f32 to vector<160x128xf32>
    %49 = arith.maximumf %47, %48 : vector<160x128xf32>
    %50 = arith.truncf %49 : vector<160x128xf32> to vector<160x128xbf16>
    %cst_44 = arith.constant 0.000000e+00 : bf16
    %51 = vector.broadcast %cst_44 : bf16 to vector<10x1x128xbf16>
    %c0_45 = arith.constant 0 : index
    %c0_46 = arith.constant 0 : index
    %c0_47 = arith.constant 0 : index
    %52 = vector.load %arg10[%c0_45, %c0_46, %c0_47] : memref<10x18x128xbf16, #tpu.memory_space<vmem>>, vector<10x1x128xbf16>
    tpu.vector_store %arg10[%c0_45, %c0_46, %c0_47], %51 {strides = array<i32>} : memref<10x18x128xbf16, #tpu.memory_space<vmem>>, vector<10x1x128xbf16>,
    %c0_48 = arith.constant 0 : index
    %c17 = arith.constant 17 : index
    %c0_49 = arith.constant 0 : index
    %53 = vector.load %arg10[%c0_48, %c17, %c0_49] : memref<10x18x128xbf16, #tpu.memory_space<vmem>>, vector<10x1x128xbf16>
    tpu.vector_store %arg10[%c0_48, %c17, %c0_49], %51 {strides = array<i32>} : memref<10x18x128xbf16, #tpu.memory_space<vmem>>, vector<10x1x128xbf16>,
    %54 = vector.shape_cast %50 : vector<160x128xbf16> to vector<10x16x128xbf16>
    %c0_50 = arith.constant 0 : index
    %c1_51 = arith.constant 1 : index
    %c0_52 = arith.constant 0 : index
    %55 = vector.load %arg10[%c0_50, %c1_51, %c0_52] : memref<10x18x128xbf16, #tpu.memory_space<vmem>>, vector<10x16x128xbf16>
    tpu.vector_store %arg10[%c0_50, %c1_51, %c0_52], %54 {strides = array<i32>} : memref<10x18x128xbf16, #tpu.memory_space<vmem>>, vector<10x16x128xbf16>,
    %c0_i32_53 = arith.constant 0 : i32
    %56 = arith.cmpi eq, %arg1, %c0_i32_53 : i32
    %57 = arith.extui %56 : i1 to i32
    %c0_i32_54 = arith.constant 0 : i32
    %58 = arith.cmpi ne, %57, %c0_i32_54 : i32
    scf.if %58 {
      %cst_116 = arith.constant 0.000000e+00 : bf16
      %104 = vector.broadcast %cst_116 : bf16 to vector<1x18x128xbf16>
      %c0_117 = arith.constant 0 : index
      %c0_118 = arith.constant 0 : index
      %c0_119 = arith.constant 0 : index
      %105 = vector.load %arg10[%c0_117, %c0_118, %c0_119] : memref<10x18x128xbf16, #tpu.memory_space<vmem>>, vector<1x18x128xbf16>
      tpu.vector_store %arg10[%c0_117, %c0_118, %c0_119], %104 {strides = array<i32>} : memref<10x18x128xbf16, #tpu.memory_space<vmem>>, vector<1x18x128xbf16>,
    } else {
    }
    %c1_i32 = arith.constant 1 : i32
    %59 = arith.cmpi eq, %arg1, %c1_i32 : i32
    %60 = arith.extui %59 : i1 to i32
    %c0_i32_55 = arith.constant 0 : i32
    %61 = arith.cmpi ne, %60, %c0_i32_55 : i32
    scf.if %61 {
      %cst_116 = arith.constant 0.000000e+00 : bf16
      %104 = vector.broadcast %cst_116 : bf16 to vector<1x18x128xbf16>
      %c9 = arith.constant 9 : index
      %c0_117 = arith.constant 0 : index
      %c0_118 = arith.constant 0 : index
      %105 = vector.load %arg10[%c9, %c0_117, %c0_118] : memref<10x18x128xbf16, #tpu.memory_space<vmem>>, vector<1x18x128xbf16>
      tpu.vector_store %arg10[%c9, %c0_117, %c0_118], %104 {strides = array<i32>} : memref<10x18x128xbf16, #tpu.memory_space<vmem>>, vector<1x18x128xbf16>,
    } else {
    }
    %c0_56 = arith.constant 0 : index
    %c0_57 = arith.constant 0 : index
    %c0_58 = arith.constant 0 : index
    %62 = vector.load %arg10[%c0_56, %c0_57, %c0_58] : memref<10x18x128xbf16, #tpu.memory_space<vmem>>, vector<8x16x128xbf16>
    %63 = vector.shape_cast %62 : vector<8x16x128xbf16> to vector<128x128xbf16>
    %c0_59 = arith.constant 0 : index
    %c0_60 = arith.constant 0 : index
    %64 = vector.load %arg9[%c0_59, %c0_60] : memref<160x1152xbf16, #tpu.memory_space<vmem>>, vector<128x128xbf16>
    tpu.vector_store %arg9[%c0_59, %c0_60], %63 {strides = array<i32>} : memref<160x1152xbf16, #tpu.memory_space<vmem>>, vector<128x128xbf16>,
    %c0_61 = arith.constant 0 : index
    %c1_62 = arith.constant 1 : index
    %c0_63 = arith.constant 0 : index
    %65 = vector.load %arg10[%c0_61, %c1_62, %c0_63] : memref<10x18x128xbf16, #tpu.memory_space<vmem>>, vector<8x16x128xbf16>
    %66 = vector.shape_cast %65 : vector<8x16x128xbf16> to vector<128x128xbf16>
    %c0_64 = arith.constant 0 : index
    %c128_65 = arith.constant 128 : index
    %67 = vector.load %arg9[%c0_64, %c128_65] : memref<160x1152xbf16, #tpu.memory_space<vmem>>, vector<128x128xbf16>
    tpu.vector_store %arg9[%c0_64, %c128_65], %66 {strides = array<i32>} : memref<160x1152xbf16, #tpu.memory_space<vmem>>, vector<128x128xbf16>,
    %c0_66 = arith.constant 0 : index
    %c2_67 = arith.constant 2 : index
    %c0_68 = arith.constant 0 : index
    %68 = vector.load %arg10[%c0_66, %c2_67, %c0_68] : memref<10x18x128xbf16, #tpu.memory_space<vmem>>, vector<8x16x128xbf16>
    %69 = vector.shape_cast %68 : vector<8x16x128xbf16> to vector<128x128xbf16>
    %c0_69 = arith.constant 0 : index
    %c256_70 = arith.constant 256 : index
    %70 = vector.load %arg9[%c0_69, %c256_70] : memref<160x1152xbf16, #tpu.memory_space<vmem>>, vector<128x128xbf16>
    tpu.vector_store %arg9[%c0_69, %c256_70], %69 {strides = array<i32>} : memref<160x1152xbf16, #tpu.memory_space<vmem>>, vector<128x128xbf16>,
    %c1_71 = arith.constant 1 : index
    %c0_72 = arith.constant 0 : index
    %c0_73 = arith.constant 0 : index
    %71 = vector.load %arg10[%c1_71, %c0_72, %c0_73] : memref<10x18x128xbf16, #tpu.memory_space<vmem>>, vector<8x16x128xbf16>
    %72 = vector.shape_cast %71 : vector<8x16x128xbf16> to vector<128x128xbf16>
    %c0_74 = arith.constant 0 : index
    %c384_75 = arith.constant 384 : index
    %73 = vector.load %arg9[%c0_74, %c384_75] : memref<160x1152xbf16, #tpu.memory_space<vmem>>, vector<128x128xbf16>
    tpu.vector_store %arg9[%c0_74, %c384_75], %72 {strides = array<i32>} : memref<160x1152xbf16, #tpu.memory_space<vmem>>, vector<128x128xbf16>,
    %c1_76 = arith.constant 1 : index
    %c1_77 = arith.constant 1 : index
    %c0_78 = arith.constant 0 : index
    %74 = vector.load %arg10[%c1_76, %c1_77, %c0_78] : memref<10x18x128xbf16, #tpu.memory_space<vmem>>, vector<8x16x128xbf16>
    %75 = vector.shape_cast %74 : vector<8x16x128xbf16> to vector<128x128xbf16>
    %c0_79 = arith.constant 0 : index
    %c512_80 = arith.constant 512 : index
    %76 = vector.load %arg9[%c0_79, %c512_80] : memref<160x1152xbf16, #tpu.memory_space<vmem>>, vector<128x128xbf16>
    tpu.vector_store %arg9[%c0_79, %c512_80], %75 {strides = array<i32>} : memref<160x1152xbf16, #tpu.memory_space<vmem>>, vector<128x128xbf16>,
    %c1_81 = arith.constant 1 : index
    %c2_82 = arith.constant 2 : index
    %c0_83 = arith.constant 0 : index
    %77 = vector.load %arg10[%c1_81, %c2_82, %c0_83] : memref<10x18x128xbf16, #tpu.memory_space<vmem>>, vector<8x16x128xbf16>
    %78 = vector.shape_cast %77 : vector<8x16x128xbf16> to vector<128x128xbf16>
    %c0_84 = arith.constant 0 : index
    %c640_85 = arith.constant 640 : index
    %79 = vector.load %arg9[%c0_84, %c640_85] : memref<160x1152xbf16, #tpu.memory_space<vmem>>, vector<128x128xbf16>
    tpu.vector_store %arg9[%c0_84, %c640_85], %78 {strides = array<i32>} : memref<160x1152xbf16, #tpu.memory_space<vmem>>, vector<128x128xbf16>,
    %c2_86 = arith.constant 2 : index
    %c0_87 = arith.constant 0 : index
    %c0_88 = arith.constant 0 : index
    %80 = vector.load %arg10[%c2_86, %c0_87, %c0_88] : memref<10x18x128xbf16, #tpu.memory_space<vmem>>, vector<8x16x128xbf16>
    %81 = vector.shape_cast %80 : vector<8x16x128xbf16> to vector<128x128xbf16>
    %c0_89 = arith.constant 0 : index
    %c768_90 = arith.constant 768 : index
    %82 = vector.load %arg9[%c0_89, %c768_90] : memref<160x1152xbf16, #tpu.memory_space<vmem>>, vector<128x128xbf16>
    tpu.vector_store %arg9[%c0_89, %c768_90], %81 {strides = array<i32>} : memref<160x1152xbf16, #tpu.memory_space<vmem>>, vector<128x128xbf16>,
    %c2_91 = arith.constant 2 : index
    %c1_92 = arith.constant 1 : index
    %c0_93 = arith.constant 0 : index
    %83 = vector.load %arg10[%c2_91, %c1_92, %c0_93] : memref<10x18x128xbf16, #tpu.memory_space<vmem>>, vector<8x16x128xbf16>
    %84 = vector.shape_cast %83 : vector<8x16x128xbf16> to vector<128x128xbf16>
    %c0_94 = arith.constant 0 : index
    %c896_95 = arith.constant 896 : index
    %85 = vector.load %arg9[%c0_94, %c896_95] : memref<160x1152xbf16, #tpu.memory_space<vmem>>, vector<128x128xbf16>
    tpu.vector_store %arg9[%c0_94, %c896_95], %84 {strides = array<i32>} : memref<160x1152xbf16, #tpu.memory_space<vmem>>, vector<128x128xbf16>,
    %c2_96 = arith.constant 2 : index
    %c2_97 = arith.constant 2 : index
    %c0_98 = arith.constant 0 : index
    %86 = vector.load %arg10[%c2_96, %c2_97, %c0_98] : memref<10x18x128xbf16, #tpu.memory_space<vmem>>, vector<8x16x128xbf16>
    %87 = vector.shape_cast %86 : vector<8x16x128xbf16> to vector<128x128xbf16>
    %c0_99 = arith.constant 0 : index
    %c1024_100 = arith.constant 1024 : index
    %88 = vector.load %arg9[%c0_99, %c1024_100] : memref<160x1152xbf16, #tpu.memory_space<vmem>>, vector<128x128xbf16>
    tpu.vector_store %arg9[%c0_99, %c1024_100], %87 {strides = array<i32>} : memref<160x1152xbf16, #tpu.memory_space<vmem>>, vector<128x128xbf16>,
    %c0_101 = arith.constant 0 : index
    %c0_102 = arith.constant 0 : index
    %89 = vector.load %arg9[%c0_101, %c0_102] : memref<160x1152xbf16, #tpu.memory_space<vmem>>, vector<128x1152xbf16>
    %c0_103 = arith.constant 0 : index
    %c0_104 = arith.constant 0 : index
    %90 = vector.load %arg5[%c0_103, %c0_104] : memref<1152x128xbf16, #tpu.memory_space<vmem>>, vector<1152x128xbf16>
    %cst_105 = arith.constant dense<0.000000e+00> : vector<128x128xf32>
    %91 = tpu.matmul %89, %90, %cst_105 {dimension_numbers = #tpu.dot_dimension_numbers<[1], [0], [0], [1], [0, 0, 1, 1], [], []>} : vector<128x1152xbf16>, vector<1152x128xbf16>, vector<128x128xf32> -> vector<128x128xf32>
    %92 = vector.shape_cast %91 : vector<128x128xf32> to vector<8x16x128xf32>
    %c0_106 = arith.constant 0 : index
    %c0_107 = arith.constant 0 : index
    %93 = vector.load %arg6[%c0_106, %c0_107] : memref<1x128xf32, #tpu.memory_space<vmem>>, vector<1x128xf32>
    %94 = vector.shape_cast %93 : vector<1x128xf32> to vector<1x1x128xf32>
    %95 = vector.broadcast %94 : vector<1x1x128xf32> to vector<8x16x128xf32>
    %96 = arith.addf %92, %95 : vector<8x16x128xf32>
    %c2_108 = arith.constant 2 : index
    %c1_109 = arith.constant 1 : index
    %c0_110 = arith.constant 0 : index
    %97 = vector.load %arg8[%c2_108, %c1_109, %c0_110] : memref<12x18x128xf32, #tpu.memory_space<vmem>>, vector<8x16x128xf32>
    %98 = arith.addf %96, %97 : vector<8x16x128xf32>
    %cst_111 = arith.constant 0.000000e+00 : f32
    %99 = vector.broadcast %cst_111 : f32 to vector<8x16x128xf32>
    %100 = arith.maximumf %98, %99 : vector<8x16x128xf32>
    %c0_112 = arith.constant 0 : index
    %c0_113 = arith.constant 0 : index
    %c0_114 = arith.constant 0 : index
    %c0_115 = arith.constant 0 : index
    %101 = vector.load %arg7[%c0_112, %c0_113, %c0_114, %c0_115] : memref<1x8x16x128xf32, #tpu.memory_space<vmem>>, vector<1x8x16x128xf32>
    %102 = vector.shape_cast %101 : vector<1x8x16x128xf32> to vector<8x16x128xf32>
    %103 = vector.shape_cast %100 : vector<8x16x128xf32> to vector<1x8x16x128xf32>
    tpu.vector_store %arg7[%c0_112, %c0_113, %c0_114, %c0_115], %103 {strides = array<i32>} : memref<1x8x16x128xf32, #tpu.memory_space<vmem>>, vector<1x8x16x128xf32>,
    return
  }
  func.func @transform_1(%arg0: i32, %arg1: i32) -> (i32, i32) {
    %c0_i32 = arith.constant 0 : i32
    %c0_i32_0 = arith.constant 0 : i32
    %c0_i32_1 = arith.constant 0 : i32
    return %c0_i32, %c0_i32_0 : i32, i32
  }
  func.func @transform_2(%arg0: i32, %arg1: i32) -> (i32, i32) {
    %c0_i32 = arith.constant 0 : i32
    %c0_i32_0 = arith.constant 0 : i32
    %c0_i32_1 = arith.constant 0 : i32
    return %c0_i32, %c0_i32_0 : i32, i32
  }
  func.func @transform_3(%arg0: i32, %arg1: i32) -> (i32, i32) {
    %c0_i32 = arith.constant 0 : i32
    %c0_i32_0 = arith.constant 0 : i32
    %c0_i32_1 = arith.constant 0 : i32
    return %c0_i32, %c0_i32_0 : i32, i32
  }
  func.func @transform_4(%arg0: i32, %arg1: i32) -> (i32, i32) {
    %c0_i32 = arith.constant 0 : i32
    %c0_i32_0 = arith.constant 0 : i32
    %c0_i32_1 = arith.constant 0 : i32
    return %c0_i32, %c0_i32_0 : i32, i32
  }
  func.func @transform_5(%arg0: i32, %arg1: i32) -> (i32, i32, i32, i32) {
    %c0_i32 = arith.constant 0 : i32
    %c0_i32_0 = arith.constant 0 : i32
    %c0_i32_1 = arith.constant 0 : i32
    return %arg0, %arg1, %c0_i32, %c0_i32_0 : i32, i32, i32, i32
  }
}

</mosaic_0001>

<bundles_post_ra>
// kernel: tpu_custom_call.1
= control target key start
LH: loop header
LB: loop body
LE: loop exit
PB: predicated region body
PF: predicated region fallthrough
CT: control target
= control target key end

     0   :  { %10 = vsyncpa [#allocation7], 0  ;;  %s9926_s0 = inlined_call_operand.vmem [shape: f32[2,20,18,128], index: 0, kind: input, shape index: {}]   ;;  %s9927_s1 = inlined_call_operand.vmem [shape: bf16[1152,128], index: 1, kind: input, shape index: {}]   ;;  %s9928_s2 = inlined_call_operand.vmem [shape: f32[1,128], index: 2, kind: input, shape index: {}]   ;;  %s9929_s3 = inlined_call_operand.vmem [shape: bf16[1152,128], index: 3, kind: input, shape index: {}]   ;;  %s9930_s4 = inlined_call_operand.vmem [shape: f32[1,128], index: 4, kind: input, shape index: {}]   ;;  %s9931_s5 = inlined_call_operand.hbm [shape: f32[2,16,16,128], index: 5, kind: output, shape index: {}]  }
   0x1   :  { %12 = vsyncpa [#allocation7 + $0x1], 0  ;;  %s8530_s18 = smov 0   ;;  %s8532_s19 = smov 0  }
   0x2   :  { %s8534_s20 = smov 0   ;;  %s8536_s21 = smov 0  }
   0x3   :  { %s8538_s22 = smov 0   ;;  %s8540_s23 = smov 0  }
   0x4   :  { %s8542_s24 = smov 0   ;;  %s8544_s25 = smov 0  }
   0x5 LB: > { %s6529_s26 = sadd.s32 4294967295, %s8493_s25   ;;  %s6530_s27 = sadd.s32 4294967294, %s8493_s25   ;;  %s8493_s25 = sphi %s8544_s25, %s18_s25   ;;  %s8489_s24 = sphi %s8542_s24, %s10042_s24   ;;  %s8485_s23 = sphi %s8540_s23, %s10041_s23   ;;  %s8481_s22 = sphi %s8538_s22, %s10040_s22   ;;  %s8477_s21 = sphi %s8536_s21, %s10039_s21   ;;  %s8473_s20 = sphi %s8534_s20, %s10038_s20   ;;  %s8469_s19 = sphi %s8532_s19, %s10037_s19   ;;  %s8465_s18 = sphi %s8530_s18, %s10036_s18  }
   0x6   : > { %s27_s28 = sadd.s32 1, %s8485_s23  ;;  %s30_s29 = sadd.s32 1, %s8489_s24 }
   0x7   : > { %p28_p0 = scmp.ge.s32.totalorder %s27_s28, 2  ;;  %p133_p1 = scmp.ne.s32.totalorder %s8473_s20, %s8469_s19 }
   0x8   : > { %p134_p2 = scmp.eq.s32.totalorder %s6529_s26, 3  ;;  %p139_p5 = scmp.ne.s32.totalorder %s8469_s19, %s8465_s18 }
   0x9   : > { %s10044_s28 = smov (%p28_p0, %s27_s28), 0  ;;  %s10046_s29 = smov (!%p28_p0, %s30_s29), %s8489_s24 }
   0xa   : > { %s119_s30 = ssub.s32 %s8485_s23, %s10044_s28  ;;  %p8581_p3 = por %p134_p2, %p133_p1 }
   0xb   : > { %p32_p4 = scmp.ge.s32.totalorder %s10046_s29, 2  ;;  %p140_p6 = scmp.eq.s32.totalorder %s6530_s27, 3 }
   0xc   : > { %p6532_p7 = scmp.ge.s32.totalorder %s8493_s25, 1  ;;  %p170_p9 = scmp.lt.s32.totalorder %s8493_s25, 5 }
   0xd   : > { %s10048_s29 = smov (%p32_p4, %s10046_s29), 0  ;;  %p8590_p8 = por %p140_p6, %p139_p5 }
   0xe   : > { %s118_s8 = ssub.s32 %s8489_s24, %s10048_s29  ;;  %s123_s9 = sadd.s32 1, %s8473_s20 }
   0xf   : > { %s120_s10 = sor.u32 %s119_s30, %s118_s8  ;;  %p171_p10 = pnand %p6532_p7, %p170_p9 }
  0x10   : > { %p121_p11 = scmp.eq.s32.totalorder %s120_s10, 0 }
  0x11   : > { %174 = sbr.rel (%p171_p10) target bundleno = 967 (0x3c7), region = 36 }
  0x12   : > { %s8599_s11 = scalar_select %p121_p11, %s8473_s20, %s123_s9  }
  0x16   : > { %s188_s12 = sand.u32 1, %s8469_s19   ;;  %s6535_s13 = smul.u32 192, %s8477_s21 }
  0x17   : > { %s8605_s14 = sshll.u32 %s188_s12, 7  ;;  %s195_s15 = smul.u32 480, %s8481_s22 }
  0x18   : > { %s8650_s30 = scalar_lea.vmem [#allocation6], %s8605_s14 }
  0x19   : > { %s196_s16 = sadd.s32 %s6535_s13, %s195_s15 }
  0x1a   : > { %s8611_s27 = scalar_lea.vmem %s9926_s0, %s196_s16 }
  0x1b   : > { %v258_v0 = vld [vmem:[%s8611_s27] sm:$0xff]  ;;  %v260_v1 = vld [vmem:[%s8611_s27 + $0x8] sm:$0xff]  ;;  %v262_v2 = vld [vmem:[%s8611_s27 + $0x18] sm:$0xff] }
  0x1c   : > { %259 = vst [vmem:[#allocation2] sm:$0xff] %v258_v0  ;;  %261 = vst [vmem:[#allocation2 + $0x8] sm:$0xff] %v260_v1  ;;  %v264_v3 = vld [vmem:[%s8611_s27 + $0x20] sm:$0xff]  ;;  %v266_v4 = vld [vmem:[%s8611_s27 + $0x30] sm:$0xff] }
  0x1d   : > { %263 = vst [vmem:[#allocation2 + $0x18] sm:$0xff] %v262_v2  ;;  %v268_v5 = vld [vmem:[%s8611_s27 + $0x38] sm:$0xff]  ;;  %265 = vst [vmem:[#allocation2 + $0x20] sm:$0xff] %v264_v3  ;;  %v270_v6 = vld [vmem:[%s8611_s27 + $0x48] sm:$0xff] }
  0x1e   : > { %267 = vst [vmem:[#allocation2 + $0x30] sm:$0xff] %v266_v4  ;;  %269 = vst [vmem:[#allocation2 + $0x38] sm:$0xff] %v268_v5  ;;  %v272_v7 = vld [vmem:[%s8611_s27 + $0x50] sm:$0xff]  ;;  %v274_v8 = vld [vmem:[%s8611_s27 + $0x60] sm:$0xff] }
  0x1f   : > { %271 = vst [vmem:[#allocation2 + $0x48] sm:$0xff] %v270_v6  ;;  %273 = vst [vmem:[#allocation2 + $0x50] sm:$0xff] %v272_v7  ;;  %v276_v9 = vld [vmem:[%s8611_s27 + $0x68] sm:$0xff]  ;;  %v278_v10 = vld [vmem:[%s8611_s27 + $0x78] sm:$0xff] }
  0x20   : > { %275 = vst [vmem:[#allocation2 + $0x60] sm:$0xff] %v274_v8  ;;  %v280_v11 = vld [vmem:[%s8611_s27 + $0x80] sm:$0xff]  ;;  %277 = vst [vmem:[#allocation2 + $0x68] sm:$0xff] %v276_v9  ;;  %v282_v12 = vld [vmem:[%s8611_s27 + $0x90] sm:$0xff] }
  0x21   : > { %279 = vst [vmem:[#allocation2 + $0x78] sm:$0xff] %v278_v10  ;;  %281 = vst [vmem:[#allocation2 + $0x80] sm:$0xff] %v280_v11  ;;  %v284_v13 = vld [vmem:[%s8611_s27 + $0x98] sm:$0xff]  ;;  %v286_v14 = vld [vmem:[%s8611_s27 + $0xa8] sm:$0xff] }
  0x22   : > { %283 = vst [vmem:[#allocation2 + $0x90] sm:$0xff] %v282_v12  ;;  %285 = vst [vmem:[#allocation2 + $0x98] sm:$0xff] %v284_v13  ;;  %v288_v15 = vld [vmem:[%s8611_s27 + $0xb0] sm:$0xff]  ;;  %v290_v16 = vld [vmem:[%s8611_s27 + $0xc0] sm:$0xff] }
  0x23   : > { %287 = vst [vmem:[#allocation2 + $0xa8] sm:$0xff] %v286_v14  ;;  %v292_v17 = vld [vmem:[%s8611_s27 + $0xc8] sm:$0xff]  ;;  %289 = vst [vmem:[#allocation2 + $0xb0] sm:$0xff] %v288_v15  ;;  %v294_v18 = vld [vmem:[%s8611_s27 + $0xd8] sm:$0xff] }
  0x24   : > { %291 = vst [vmem:[#allocation2 + $0xc0] sm:$0xff] %v290_v16  ;;  %293 = vst [vmem:[#allocation2 + $0xc8] sm:$0xff] %v292_v17  ;;  %v296_v19 = vld [vmem:[%s8611_s27 + $0xe0] sm:$0xff]  ;;  %v298_v20 = vld [vmem:[%s8611_s27 + $0xf0] sm:$0xff] }
  0x25   : > { %295 = vst [vmem:[#allocation2 + $0xd8] sm:$0xff] %v294_v18  ;;  %297 = vst [vmem:[#allocation2 + $0xe0] sm:$0xff] %v296_v19  ;;  %v300_v21 = vld [vmem:[%s8611_s27 + $0xf8] sm:$0xff]  ;;  %v302_v22 = vld [vmem:[%s8611_s27 + $0x108] sm:$0xff] }
  0x26   : > { %299 = vst [vmem:[#allocation2 + $0xf0] sm:$0xff] %v298_v20  ;;  %v304_v23 = vld [vmem:[%s8611_s27 + $0x110] sm:$0xff]  ;;  %301 = vst [vmem:[#allocation2 + $0xf8] sm:$0xff] %v300_v21  ;;  %v6537_v25 = vld [vmem:[%s8611_s27 + $0x28] sm:$0x3] }
  0x27   : > { %303 = vst [vmem:[#allocation2 + $0x108] sm:$0xff] %v302_v22  ;;  %305 = vst [vmem:[#allocation2 + $0x110] sm:$0xff] %v304_v23  ;;  %v6536_v24 = vld [vmem:[%s8611_s27 + $0x10] sm:$0x3]  ;;  %v6538_v26 = vld [vmem:[%s8611_s27 + $0x40] sm:$0x3] }
  0x28   : > { %317 = vst [vmem:[#allocation2 + $0x10] sm:$0x3] %v6536_v24  ;;  %319 = vst [vmem:[#allocation2 + $0x28] sm:$0x3] %v6537_v25  ;;  %v6539_v27 = vld [vmem:[%s8611_s27 + $0x58] sm:$0x3] }
  0x29   : > { %321 = vst [vmem:[#allocation2 + $0x40] sm:$0x3] %v6538_v26  ;;  %v6540_v28 = vld [vmem:[%s8611_s27 + $0x70] sm:$0x3]  ;;  %v6541_v29 = vld [vmem:[%s8611_s27 + $0x88] sm:$0x3] }
  0x2a   : > { %323 = vst [vmem:[#allocation2 + $0x58] sm:$0x3] %v6539_v27  ;;  %325 = vst [vmem:[#allocation2 + $0x70] sm:$0x3] %v6540_v28  ;;  %v6542_v30 = vld [vmem:[%s8611_s27 + $0xa0] sm:$0x3] }
  0x2b   : > { %327 = vst [vmem:[#allocation2 + $0x88] sm:$0x3] %v6541_v29  ;;  %v6543_v31 = vld [vmem:[%s8611_s27 + $0xb8] sm:$0x3]  ;;  %v6544_v32 = vld [vmem:[%s8611_s27 + $0xd0] sm:$0x3] }
  0x2c   : > { %329 = vst [vmem:[#allocation2 + $0xa0] sm:$0x3] %v6542_v30  ;;  %331 = vst [vmem:[#allocation2 + $0xb8] sm:$0x3] %v6543_v31  ;;  %v6545_v33 = vld [vmem:[%s8611_s27 + $0xe8] sm:$0x3] }
  0x2d   : > { %333 = vst [vmem:[#allocation2 + $0xd0] sm:$0x3] %v6544_v32  ;;  %v6546_v34 = vld [vmem:[%s8611_s27 + $0x100] sm:$0x3]  ;;  %v6547_v35 = vld [vmem:[%s8611_s27 + $0x118] sm:$0x3] }
  0x2e   : > { %335 = vst [vmem:[#allocation2 + $0xe8] sm:$0x3] %v6545_v33  ;;  %337 = vst [vmem:[#allocation2 + $0x100] sm:$0x3] %v6546_v34 }
  0x2f   : > { %339 = vst [vmem:[#allocation2 + $0x118] sm:$0x3] %v6547_v35 }
  0x30   : > { %343 = vsyncadd [#allocation5], 3456 }
  0x31   : > { %8457 = dma.done.wait [#allocation5], 3456 }
  0x32   : > { %8458 = vsyncadd [#allocation5], 4294963840  ;;  %v8028_v36 = vld [vmem:[%s9927_s1 + $0x78] sm:$0xff]   ;;  %v8032_v40 = vld [vmem:[%s9927_s1 + $0x70] sm:$0xff]   ;;  %vm3168_vm0 = vcmask 1040384   ;;  %vm3485_vm5 = vcmask 1043456  }
  0x33   : > { %v8029_v37 = vld [vmem:[%s9927_s1 + $0x38] sm:$0xff]   ;;  %7291 = vmatprep.subr.bf16.mxu0 %v8028_v36  ;;  %v8033_v41 = vld [vmem:[%s9927_s1 + $0x30] sm:$0xff]   ;;  %v8036_v44 = vld [vmem:[%s9927_s1 + $0x68] sm:$0xff]   ;;  %vm3169_vm1 = vsmask.f32 256  ;;  %p6911_p12 = scmp.ne.s32.totalorder %s8477_s21, 0 }
  0x34   : > { %v8030_v38 = vld [vmem:[%s9927_s1 + $0xf8] sm:$0xff]   ;;  %7292 = vmatpush3.bf16.msra.mxu0 %v8029_v37  ;;  %v8034_v42 = vld [vmem:[%s9927_s1 + $0xf0] sm:$0xff]   ;;  %v8037_v45 = vld [vmem:[%s9927_s1 + $0x28] sm:$0xff]   ;;  %vm3201_vm3 = vsmask.f32 7938 }
  0x35   : > { %v8031_v39 = vld [vmem:[%s9927_s1 + $0xb8] sm:$0xff]   ;;  %7367 = vmatprep.subr.bf16.mxu1 %v8030_v38  ;;  %7293 = vmatprep.subr.bf16.mxu0 %v8032_v40  ;;  %v8035_v43 = vld [vmem:[%s9927_s1 + $0xb0] sm:$0xff]   ;;  %v8038_v46 = vld [vmem:[%s9927_s1 + $0xe8] sm:$0xff]   ;;  %vm3283_vm6 = vsmask.f32 4368 }
  0x36   : > { %7368 = vmatpush3.bf16.msra.mxu1 %v8031_v39  ;;  %v8039_v47 = vld [vmem:[%s9927_s1 + $0xa8] sm:$0xff]   ;;  %v8040_v48 = vld [vmem:[%s9927_s1 + $0x60] sm:$0xff]   ;;  %v8044_v52 = vld [vmem:[%s9927_s1 + $0x58] sm:$0xff]  }
  0x37   : > { %7369 = vmatprep.subr.bf16.mxu1 %v8034_v42  ;;  %v8041_v49 = vld [vmem:[%s9927_s1 + $0x20] sm:$0xff]   ;;  %v8045_v53 = vld [vmem:[%s9927_s1 + $0x18] sm:$0xff]   ;;  %v8048_v56 = vld [vmem:[%s9927_s1 + $0x50] sm:$0xff]  }
  0x38   : > { %7294 = vmatpush3.bf16.msra.mxu0 %v8033_v41  ;;  %v8042_v50 = vld [vmem:[%s9927_s1 + $0xe0] sm:$0xff]   ;;  %v8046_v54 = vld [vmem:[%s9927_s1 + $0xd8] sm:$0xff]   ;;  %v8049_v57 = vld [vmem:[%s9927_s1 + $0x10] sm:$0xff]  }
  0x39   : > { %7295 = vmatprep.subr.bf16.mxu0 %v8036_v44  ;;  %v8043_v51 = vld [vmem:[%s9927_s1 + $0xa0] sm:$0xff]   ;;  %v8047_v55 = vld [vmem:[%s9927_s1 + $0x98] sm:$0xff]   ;;  %v8050_v58 = vld [vmem:[%s9927_s1 + $0xd0] sm:$0xff]  }
  0x3a   : > { %7370 = vmatpush3.bf16.msra.mxu1 %v8035_v43  ;;  %v8051_v59 = vld [vmem:[%s9927_s1 + $0x90] sm:$0xff]   ;;  %v8052_v60 = vld [vmem:[%s9927_s1 + $0x48] sm:$0xff]   ;;  %v8056_v0 = vld [vmem:[%s9927_s1 + $0x40] sm:$0xff]  }
  0x3b   : > { %7371 = vmatprep.subr.bf16.mxu1 %v8038_v46  ;;  %v8053_v61 = vld [vmem:[%s9927_s1 + $0x8] sm:$0xff]   ;;  %v8057_v1 = vld [vmem:[%s9927_s1] sm:$0xff]   ;;  %v8063_v12 = vld [vmem:[%s9927_s1 + $0x178] sm:$0xff]  }
  0x3c   : > { %7296 = vmatpush3.bf16.msra.mxu0 %v8037_v45  ;;  %v8054_v62 = vld [vmem:[%s9927_s1 + $0xc8] sm:$0xff]   ;;  %v8058_v2 = vld [vmem:[%s9927_s1 + $0xc0] sm:$0xff]   ;;  %v709_v17 = vld [vmem:[#allocation2 + $0x18] sm:$0xff] }
  0x3d   : > { %7297 = vmatprep.subr.bf16.mxu0 %v8040_v48  ;;  %v8055_v63 = vld [vmem:[%s9927_s1 + $0x88] sm:$0xff]   ;;  %v348_v3 = vld [vmem:[#allocation2] sm:$0xff]  ;;  %v7150_v19 = vpack.c.bf16 %v709_v17, %v709_v17  ;;  %v711_v29 = vld [vmem:[#allocation2 + $0x30] sm:$0xff] }
  0x3e   : > { %7372 = vmatpush3.bf16.msra.mxu1 %v8039_v47  ;;  %v349_v4 = vld [vmem:[#allocation2 + $0x8] sm:$0xff]  ;;  %v7090_v6 = vpack.c.bf16 %v348_v3, %v348_v3  ;;  %v8062_v11 = vld [vmem:[%s9927_s1 + $0x80] sm:$0xff]   ;;  %v712_v30 = vld [vmem:[#allocation2 + $0x38] sm:$0xff]  ;;  %v7152_v31 = vpack.c.bf16 %v711_v29, %v711_v29 }
  0x3f   : > { %7373 = vmatprep.subr.bf16.mxu1 %v8042_v50  ;;  %v468_v5 = vld [vmem:[#allocation2 + $0x1] sm:$0xff]  ;;  %v7091_v7 = vpack.c.bf16 %v349_v4, %v349_v4  ;;  %v469_v8 = vld [vmem:[#allocation2 + $0x9] sm:$0xff]  ;;  %v470_v21 = vld [vmem:[#allocation2 + $0x19] sm:$0xff]  ;;  %809 = vst [vmem:[#allocation3 + $0xc] sm:$0xf] %v7150_v19  ;;  %v7153_v32 = vpack.c.bf16 %v712_v30, %v712_v30 }
  0x40   : > { %7298 = vmatpush3.bf16.msra.mxu0 %v8041_v49  ;;  %v7110_v9 = vpack.c.bf16 %v468_v5, %v468_v5  ;;  %v7111_v10 = vpack.c.bf16 %v469_v8, %v469_v8  ;;  %448 = vst [vmem:[#allocation3] sm:$0xf] %v7090_v6  ;;  %v588_v13 = vld [vmem:[#allocation2 + $0x2] sm:$0xff]  ;;  %v589_v14 = vld [vmem:[#allocation2 + $0xa] sm:$0xff]  ;;  %v7112_v23 = vpack.c.bf16 %v470_v21, %v470_v21  ;;  %v590_v24 = vld [vmem:[#allocation2 + $0x1a] sm:$0xff] }
  0x41   : > { %7299 = vmatprep.subr.bf16.mxu0 %v8044_v52  ;;  %449 = vst [vmem:[#allocation3 + $0x24] sm:$0xf] %v7091_v7  ;;  %v7130_v15 = vpack.c.bf16 %v588_v13, %v588_v13  ;;  %v7131_v16 = vpack.c.bf16 %v589_v14, %v589_v14  ;;  %v710_v18 = vld [vmem:[#allocation2 + $0x20] sm:$0xff]  ;;  %450 = vst [vmem:[#allocation3 + $0x48] sm:$0xf] %v7150_v19  ;;  %v7132_v27 = vpack.c.bf16 %v590_v24, %v590_v24  ;;  %v8067_v33 = vld [vmem:[%s9927_s1 + $0x138] sm:$0xff]  }
  0x42   : > { %7374 = vmatpush3.bf16.msra.mxu1 %v8043_v51  ;;  %568 = vst [vmem:[#allocation3 + $0x4] sm:$0xf] %v7110_v9  ;;  %569 = vst [vmem:[#allocation3 + $0x28] sm:$0xf] %v7111_v10  ;;  %v7151_v20 = vpack.c.bf16 %v710_v18, %v710_v18  ;;  %v471_v22 = vld [vmem:[#allocation2 + $0x21] sm:$0xff]  ;;  %v472_v34 = vld [vmem:[#allocation2 + $0x31] sm:$0xff] }
  0x43   : > { %7375 = vmatprep.subr.bf16.mxu1 %v8046_v54  ;;  %688 = vst [vmem:[#allocation3 + $0x8] sm:$0xf] %v7130_v15  ;;  %689 = vst [vmem:[#allocation3 + $0x2c] sm:$0xf] %v7131_v16  ;;  %v591_v25 = vld [vmem:[#allocation2 + $0x22] sm:$0xff]  ;;  %v7113_v26 = vpack.c.bf16 %v471_v22, %v471_v22  ;;  %v8074_v35 = vld [vmem:[%s9927_s1 + $0x170] sm:$0xff]   ;;  %v7114_v37 = vpack.c.bf16 %v472_v34, %v472_v34 }
  0x44   : > { %7300 = vmatpush3.bf16.msra.mxu0 %v8045_v53  ;;  %810 = vst [vmem:[#allocation3 + $0x30] sm:$0xf] %v7151_v20  ;;  %451 = vst [vmem:[#allocation3 + $0x6c] sm:$0xf] %v7151_v20  ;;  %v7133_v28 = vpack.c.bf16 %v591_v25, %v591_v25  ;;  %v473_v36 = vld [vmem:[#allocation2 + $0x39] sm:$0xff]  ;;  %v713_v44 = vld [vmem:[#allocation2 + $0x48] sm:$0xff] }
  0x45   : > { %7301 = vmatprep.subr.bf16.mxu0 %v8048_v56  ;;  %570 = vst [vmem:[#allocation3 + $0x4c] sm:$0xf] %v7112_v23  ;;  %929 = vst [vmem:[#allocation3 + $0x10] sm:$0xf] %v7112_v23  ;;  %v592_v38 = vld [vmem:[#allocation2 + $0x32] sm:$0xff]  ;;  %v7115_v41 = vpack.c.bf16 %v473_v36, %v473_v36  ;;  %v593_v43 = vld [vmem:[#allocation2 + $0x3a] sm:$0xff]  ;;  %v7154_v48 = vpack.c.bf16 %v713_v44, %v713_v44 }
  0x46   : > { %7376 = vmatpush3.bf16.msra.mxu1 %v8047_v55  ;;  %571 = vst [vmem:[#allocation3 + $0x70] sm:$0xf] %v7113_v26  ;;  %690 = vst [vmem:[#allocation3 + $0x50] sm:$0xf] %v7132_v27  ;;  %v7134_v42 = vpack.c.bf16 %v592_v38, %v592_v38  ;;  %v714_v45 = vld [vmem:[#allocation2 + $0x50] sm:$0xff]  ;;  %v7135_v47 = vpack.c.bf16 %v593_v43, %v593_v43  ;;  %v8082_v53 = vld [vmem:[%s9927_s1 + $0x168] sm:$0xff]  }
  0x47   : > { %7377 = vmatprep.subr.bf16.mxu1 %v8050_v58  ;;  %691 = vst [vmem:[#allocation3 + $0x74] sm:$0xf] %v7133_v28  ;;  %930 = vst [vmem:[#allocation3 + $0x34] sm:$0xf] %v7113_v26  ;;  %v8075_v46 = vld [vmem:[%s9927_s1 + $0x130] sm:$0xff]   ;;  %v7155_v49 = vpack.c.bf16 %v714_v45, %v714_v45  ;;  %v8083_v56 = vld [vmem:[%s9927_s1 + $0x128] sm:$0xff]  }
  0x48   : > { %7302 = vmatpush3.bf16.msra.mxu0 %v8049_v57  ;;  %1049 = vst [vmem:[#allocation3 + $0x14] sm:$0xf] %v7132_v27  ;;  %1050 = vst [vmem:[#allocation3 + $0x38] sm:$0xf] %v7133_v28  ;;  %v8059_v39 = vld [vmem:[#allocation3] ss:$36 sps:$4 sm:$0xff]  }
  0x49   : > { %7303 = vmatprep.subr.bf16.mxu0 %v8052_v60  ;;  %811 = vst [vmem:[#allocation3 + $0x54] sm:$0xf] %v7152_v31  ;;  %812 = vst [vmem:[#allocation3 + $0x78] sm:$0xf] %v7153_v32  ;;  %v8061_v40 = vld [vmem:[#allocation3 + $0x4] ss:$36 sps:$4 sm:$0xff]  }
  0x4a   : > { %7378 = vmatpush3.bf16.msra.mxu1 %v8051_v59  ;;  %452 = vst [vmem:[#allocation3 + $0x90] sm:$0xf] %v7152_v31  ;;  %453 = vst [vmem:[#allocation3 + $0xb4] sm:$0xf] %v7153_v32  ;;  %2605 = vmatprep.mubr.bf16.mxu0 %v8061_v40  ;;  %v8064_v50 = vld [vmem:[#allocation3 + $0x8] ss:$36 sps:$4 sm:$0xff]  }
  0x4b   : > { %7379 = vmatprep.subr.bf16.mxu1 %v8054_v62  ;;  %1170 = vst [vmem:[#allocation3 + $0x18] sm:$0xf] %v7152_v31  ;;  %1171 = vst [vmem:[#allocation3 + $0x3c] sm:$0xf] %v7153_v32  ;;  %v8066_v51 = vld [vmem:[#allocation3 + $0xc] ss:$36 sps:$4 sm:$0xff]  }
  0x4c   : > { %7304 = vmatpush3.bf16.msra.mxu0 %v8053_v61  ;;  %572 = vst [vmem:[#allocation3 + $0x94] sm:$0xf] %v7114_v37  ;;  %1290 = vst [vmem:[#allocation3 + $0x1c] sm:$0xf] %v7114_v37  ;;  %2718 = vmatprep.mubr.bf16.mxu1 %v8066_v51  ;;  %v8070_v55 = vld [vmem:[#allocation3 + $0x48] ss:$36 sps:$4 sm:$0xff]  }
  0x4d   : > { %7305 = vmatprep.subr.bf16.mxu0 %v8056_v0  ;;  %931 = vst [vmem:[#allocation3 + $0x58] sm:$0xf] %v7114_v37  ;;  %573 = vst [vmem:[#allocation3 + $0xb8] sm:$0xf] %v7115_v41  ;;  %v8068_v52 = vld [vmem:[#allocation3 + $0x4c] ss:$36 sps:$4 sm:$0xff]  }
  0x4e   : > { %7380 = vmatpush3.bf16.msra.mxu1 %v8055_v63  ;;  %692 = vst [vmem:[#allocation3 + $0x98] sm:$0xf] %v7134_v42  ;;  %1291 = vst [vmem:[#allocation3 + $0x40] sm:$0xf] %v7115_v41  ;;  %v474_v57 = vld [vmem:[#allocation2 + $0x49] sm:$0xff]  ;;  %v475_v58 = vld [vmem:[#allocation2 + $0x51] sm:$0xff] }
  0x4f   : > { %7381 = vmatprep.subr.bf16.mxu1 %v8058_v2  ;;  %932 = vst [vmem:[#allocation3 + $0x7c] sm:$0xf] %v7115_v41  ;;  %1051 = vst [vmem:[#allocation3 + $0x5c] sm:$0xf] %v7134_v42  ;;  %v7116_v60 = vpack.c.bf16 %v474_v57, %v474_v57  ;;  %v7117_v61 = vpack.c.bf16 %v475_v58, %v475_v58  ;;  %v594_v62 = vld [vmem:[#allocation2 + $0x4a] sm:$0xff]  ;;  %v595_v63 = vld [vmem:[#allocation2 + $0x52] sm:$0xff] }
  0x50   : > { %7306 = vmatpush3.bf16.msra.mxu0 %v8057_v1  ;;  %693 = vst [vmem:[#allocation3 + $0xbc] sm:$0xf] %v7135_v47  ;;  %813 = vst [vmem:[#allocation3 + $0x9c] sm:$0xf] %v7154_v48  ;;  %v8071_v54 = vld [vmem:[#allocation3 + $0x54] ss:$36 sps:$4 sm:$0xff]   ;;  %v7136_v2 = vpack.c.bf16 %v594_v62, %v594_v62  ;;  %v7137_v3 = vpack.c.bf16 %v595_v63, %v595_v63 }
  0x51   : > { %7443 = vmatprep.subr.bf16.mxu0 %v8063_v12  ;;  %814 = vst [vmem:[#allocation3 + $0xc0] sm:$0xf] %v7155_v49  ;;  %454 = vst [vmem:[#allocation3 + $0xd8] sm:$0xf] %v7154_v48  ;;  %v715_v0 = vld [vmem:[#allocation2 + $0x60] sm:$0xff]  ;;  %v716_v6 = vld [vmem:[#allocation2 + $0x68] sm:$0xff] }
  0x52   : > { %7382 = vmatpush3.bf16.msra.mxu1 %v8062_v11  ;;  %455 = vst [vmem:[#allocation3 + $0xfc] sm:$0xf] %v7155_v49  ;;  %1052 = vst [vmem:[#allocation3 + $0x80] sm:$0xf] %v7135_v47  ;;  %v8073_v1 = vld [vmem:[#allocation3 + $0x50] ss:$36 sps:$4 sm:$0xff]   ;;  %v7156_v4 = vpack.c.bf16 %v715_v0, %v715_v0  ;;  %v7157_v8 = vpack.c.bf16 %v716_v6, %v716_v6 }
  0x53   : > { %2606 = vmatmul.mubr.bf16.vlgmr.msra.gmra.mxu0 %v8059_v39  ;;  %1172 = vst [vmem:[#allocation3 + $0x60] sm:$0xf] %v7154_v48  ;;  %1173 = vst [vmem:[#allocation3 + $0x84] sm:$0xf] %v7155_v49  ;;  %v8078_v7 = vld [vmem:[#allocation3 + $0x90] ss:$36 sps:$4 sm:$0xff]  }
  0x54   : > { %7444 = vmatpush3.bf16.msra.mxu0 %v8067_v33  ;;  %2613 = vmatprep.mubr.bf16.mxu0 %v8068_v52  ;;  %v8076_v59 = vld [vmem:[#allocation3 + $0x94] ss:$36 sps:$4 sm:$0xff]   ;;  %574 = vst [vmem:[#allocation3 + $0xdc] sm:$0xf] %v7116_v60  ;;  %575 = vst [vmem:[#allocation3 + $0x100] sm:$0xf] %v7117_v61 }
  0x55   : > { %7445 = vmatprep.subr.bf16.mxu0 %v8074_v35  ;;  %2719 = vmatmul.mubr.bf16.vlgmr.msra.gmra.mxu1 %v8064_v50  ;;  %1292 = vst [vmem:[#allocation3 + $0x64] sm:$0xf] %v7116_v60  ;;  %1293 = vst [vmem:[#allocation3 + $0x88] sm:$0xf] %v7117_v61  ;;  %v8090_v9 = vld [vmem:[%s9927_s1 + $0x160] sm:$0xff]   ;;  %v477_v11 = vld [vmem:[#allocation2 + $0x69] sm:$0xff] }
  0x56   : > { %2726 = vmatprep.mubr.bf16.mxu1 %v8071_v54  ;;  %933 = vst [vmem:[#allocation3 + $0xa0] sm:$0xf] %v7116_v60  ;;  %934 = vst [vmem:[#allocation3 + $0xc4] sm:$0xf] %v7117_v61  ;;  %v476_v10 = vld [vmem:[#allocation2 + $0x61] sm:$0xff]  ;;  %v7119_v13 = vpack.c.bf16 %v477_v11, %v477_v11  ;;  %v597_v16 = vld [vmem:[#allocation2 + $0x6a] sm:$0xff] }
  0x57   : > { %694 = vst [vmem:[#allocation3 + $0xe0] sm:$0xf] %v7136_v2  ;;  %695 = vst [vmem:[#allocation3 + $0x104] sm:$0xf] %v7137_v3  ;;  %v7118_v12 = vpack.c.bf16 %v476_v10, %v476_v10  ;;  %v8093_v14 = vld [vmem:[%s9927_s1 + $0x120] sm:$0xff]   ;;  %v7139_v18 = vpack.c.bf16 %v597_v16, %v597_v16  ;;  %v717_v19 = vld [vmem:[#allocation2 + $0x78] sm:$0xff] }
  0x58   : > { %7446 = vmatpush3.bf16.msra.mxu0 %v8075_v46  ;;  %v8079_v5 = vld [vmem:[#allocation3 + $0x9c] ss:$36 sps:$4 sm:$0xff]   ;;  %815 = vst [vmem:[#allocation3 + $0xe4] sm:$0xf] %v7156_v4  ;;  %456 = vst [vmem:[#allocation3 + $0x120] sm:$0xf] %v7156_v4  ;;  %v7158_v21 = vpack.c.bf16 %v717_v19, %v717_v19 }
  0x59   : > { %7447 = vmatprep.subr.bf16.mxu0 %v8082_v53  ;;  %1053 = vst [vmem:[#allocation3 + $0xa4] sm:$0xf] %v7136_v2  ;;  %1054 = vst [vmem:[#allocation3 + $0xc8] sm:$0xf] %v7137_v3  ;;  %v596_v15 = vld [vmem:[#allocation2 + $0x62] sm:$0xff]  ;;  %v8098_v23 = vld [vmem:[%s9927_s1 + $0x1f8] sm:$0xff]  }
  0x5a   : > { %1174 = vst [vmem:[#allocation3 + $0xa8] sm:$0xf] %v7156_v4  ;;  %816 = vst [vmem:[#allocation3 + $0x108] sm:$0xf] %v7157_v8  ;;  %v7138_v17 = vpack.c.bf16 %v596_v15, %v596_v15  ;;  %v718_v20 = vld [vmem:[#allocation2 + $0x80] sm:$0xff]  ;;  %7519 = vmatprep.subr.bf16.mxu1 %v8098_v23  ;;  %v8099_v26 = vld [vmem:[%s9927_s1 + $0x1b8] sm:$0xff]  }
  0x5b   : > { %2614 = vmatmul.mubr.bf16.gmra.mxu0 %v8070_v55  ;;  %457 = vst [vmem:[#allocation3 + $0x144] sm:$0xf] %v7157_v8  ;;  %1175 = vst [vmem:[#allocation3 + $0xcc] sm:$0xf] %v7157_v8  ;;  %v7159_v22 = vpack.c.bf16 %v718_v20, %v718_v20  ;;  %v8084_v24 = vld [vmem:[#allocation3 + $0xdc] ss:$36 sps:$4 sm:$0xff]   ;;  %7520 = vmatpush3.bf16.msra.mxu1 %v8099_v26 }
  0x5c   : > { %2621 = vmatprep.mubr.bf16.mxu0 %v8076_v59  ;;  %7448 = vmatpush3.bf16.msra.mxu0 %v8083_v56  ;;  %576 = vst [vmem:[#allocation3 + $0x124] sm:$0xf] %v7118_v12  ;;  %1294 = vst [vmem:[#allocation3 + $0xac] sm:$0xf] %v7118_v12  ;;  %v8081_v25 = vld [vmem:[#allocation3 + $0x98] ss:$36 sps:$4 sm:$0xff]  }
  0x5d   : > { %2727 = vmatmul.mubr.bf16.gmra.mxu1 %v8073_v1  ;;  %7449 = vmatprep.subr.bf16.mxu0 %v8090_v9  ;;  %935 = vst [vmem:[#allocation3 + $0xe8] sm:$0xf] %v7118_v12  ;;  %577 = vst [vmem:[#allocation3 + $0x148] sm:$0xf] %v7119_v13  ;;  %v478_v27 = vld [vmem:[#allocation2 + $0x79] sm:$0xff]  ;;  %v479_v28 = vld [vmem:[#allocation2 + $0x81] sm:$0xff] }
  0x5e   : > { %2734 = vmatprep.mubr.bf16.mxu1 %v8079_v5  ;;  %1295 = vst [vmem:[#allocation3 + $0xd0] sm:$0xf] %v7119_v13  ;;  %936 = vst [vmem:[#allocation3 + $0x10c] sm:$0xf] %v7119_v13  ;;  %v7120_v29 = vpack.c.bf16 %v478_v27, %v478_v27  ;;  %v7121_v30 = vpack.c.bf16 %v479_v28, %v479_v28  ;;  %v8103_v31 = vld [vmem:[%s9927_s1 + $0x158] sm:$0xff]   ;;  %v599_v35 = vld [vmem:[#allocation2 + $0x82] sm:$0xff] }
  0x5f   : > { %696 = vst [vmem:[#allocation3 + $0x128] sm:$0xf] %v7138_v17  ;;  %697 = vst [vmem:[#allocation3 + $0x14c] sm:$0xf] %v7139_v18  ;;  %v8086_v32 = vld [vmem:[#allocation3 + $0xd8] ss:$36 sps:$4 sm:$0xff]   ;;  %v7141_v38 = vpack.c.bf16 %v599_v35, %v599_v35 }
  0x60   : > { %7450 = vmatpush3.bf16.msra.mxu0 %v8093_v14  ;;  %1055 = vst [vmem:[#allocation3 + $0xec] sm:$0xf] %v7138_v17  ;;  %1056 = vst [vmem:[#allocation3 + $0x110] sm:$0xf] %v7139_v18  ;;  %v598_v34 = vld [vmem:[#allocation2 + $0x7a] sm:$0xff]  ;;  %v719_v39 = vld [vmem:[#allocation2 + $0x90] sm:$0xff] }
  0x61   : > { %817 = vst [vmem:[#allocation3 + $0x12c] sm:$0xf] %v7158_v21  ;;  %818 = vst [vmem:[#allocation3 + $0x150] sm:$0xf] %v7159_v22  ;;  %v8087_v33 = vld [vmem:[#allocation3 + $0xe4] ss:$36 sps:$4 sm:$0xff]   ;;  %7451 = vmatprep.subr.bf16.mxu0 %v8103_v31  ;;  %v7140_v37 = vpack.c.bf16 %v598_v34, %v598_v34  ;;  %v7160_v42 = vpack.c.bf16 %v719_v39, %v719_v39 }
  0x62   : > { %458 = vst [vmem:[#allocation3 + $0x168] sm:$0xf] %v7158_v21  ;;  %459 = vst [vmem:[#allocation3 + $0x18c] sm:$0xf] %v7159_v22  ;;  %v720_v40 = vld [vmem:[#allocation2 + $0x98] sm:$0xff]  ;;  %v8108_v46 = vld [vmem:[%s9927_s1 + $0x1f0] sm:$0xff]  }
  0x63   : > { %2622 = vmatmul.mubr.bf16.gmra.mxu0 %v8078_v7  ;;  %1176 = vst [vmem:[#allocation3 + $0xf0] sm:$0xf] %v7158_v21  ;;  %1177 = vst [vmem:[#allocation3 + $0x114] sm:$0xf] %v7159_v22  ;;  %v8089_v41 = vld [vmem:[#allocation3 + $0xe0] ss:$36 sps:$4 sm:$0xff]   ;;  %v7161_v43 = vpack.c.bf16 %v720_v40, %v720_v40  ;;  %7521 = vmatprep.subr.bf16.mxu1 %v8108_v46 }
  0x64   : > { %2629 = vmatprep.mubr.bf16.mxu0 %v8084_v24  ;;  %578 = vst [vmem:[#allocation3 + $0x16c] sm:$0xf] %v7120_v29  ;;  %579 = vst [vmem:[#allocation3 + $0x190] sm:$0xf] %v7121_v30  ;;  %v8091_v36 = vld [vmem:[#allocation3 + $0x124] ss:$36 sps:$4 sm:$0xff]  }
  0x65   : > { %2735 = vmatmul.mubr.bf16.gmra.mxu1 %v8081_v25  ;;  %1296 = vst [vmem:[#allocation3 + $0xf4] sm:$0xf] %v7120_v29  ;;  %1297 = vst [vmem:[#allocation3 + $0x118] sm:$0xf] %v7121_v30  ;;  %v8106_v45 = vld [vmem:[%s9927_s1 + $0x118] sm:$0xff]   ;;  %v8111_v53 = vld [vmem:[%s9927_s1 + $0x1b0] sm:$0xff]  }
  0x66   : > { %937 = vst [vmem:[#allocation3 + $0x130] sm:$0xf] %v7120_v29  ;;  %938 = vst [vmem:[#allocation3 + $0x154] sm:$0xf] %v7121_v30  ;;  %2742 = vmatprep.mubr.bf16.mxu1 %v8087_v33  ;;  %7452 = vmatpush3.bf16.msra.mxu0 %v8106_v45  ;;  %v480_v47 = vld [vmem:[#allocation2 + $0x91] sm:$0xff]  ;;  %v481_v48 = vld [vmem:[#allocation2 + $0x99] sm:$0xff] }
  0x67   : > { %698 = vst [vmem:[#allocation3 + $0x170] sm:$0xf] %v7140_v37  ;;  %699 = vst [vmem:[#allocation3 + $0x194] sm:$0xf] %v7141_v38  ;;  %v8094_v49 = vld [vmem:[#allocation3 + $0x120] ss:$36 sps:$4 sm:$0xff]   ;;  %v7122_v50 = vpack.c.bf16 %v480_v47, %v480_v47  ;;  %v7123_v51 = vpack.c.bf16 %v481_v48, %v481_v48  ;;  %7522 = vmatpush3.bf16.msra.mxu1 %v8111_v53 }
  0x68   : > { %1057 = vst [vmem:[#allocation3 + $0x134] sm:$0xf] %v7140_v37  ;;  %1058 = vst [vmem:[#allocation3 + $0x158] sm:$0xf] %v7141_v38  ;;  %v8095_v44 = vld [vmem:[#allocation3 + $0x12c] ss:$36 sps:$4 sm:$0xff]  }
  0x69   : > { %819 = vst [vmem:[#allocation3 + $0x174] sm:$0xf] %v7160_v42  ;;  %820 = vst [vmem:[#allocation3 + $0x198] sm:$0xf] %v7161_v43  ;;  %v600_v54 = vld [vmem:[#allocation2 + $0x92] sm:$0xff]  ;;  %v601_v55 = vld [vmem:[#allocation2 + $0x9a] sm:$0xff] }
  0x6a   : > { %460 = vst [vmem:[#allocation3 + $0x1b0] sm:$0xf] %v7160_v42  ;;  %461 = vst [vmem:[#allocation3 + $0x1d4] sm:$0xf] %v7161_v43  ;;  %v721_v56 = vld [vmem:[#allocation2 + $0xa8] sm:$0xff]  ;;  %v7142_v57 = vpack.c.bf16 %v600_v54, %v600_v54  ;;  %v7143_v58 = vpack.c.bf16 %v601_v55, %v601_v55  ;;  %v722_v59 = vld [vmem:[#allocation2 + $0xb0] sm:$0xff] }
  0x6b   : > { %2630 = vmatmul.mubr.bf16.gmra.mxu0 %v8086_v32  ;;  %1178 = vst [vmem:[#allocation3 + $0x138] sm:$0xf] %v7160_v42  ;;  %1179 = vst [vmem:[#allocation3 + $0x15c] sm:$0xf] %v7161_v43  ;;  %v8100_v52 = vld [vmem:[#allocation3 + $0x16c] ss:$36 sps:$4 sm:$0xff]   ;;  %v7162_v60 = vpack.c.bf16 %v721_v56, %v721_v56  ;;  %v7163_v61 = vpack.c.bf16 %v722_v59, %v722_v59 }
  0x6c   : > { %2637 = vmatprep.mubr.bf16.mxu0 %v8091_v36  ;;  %580 = vst [vmem:[#allocation3 + $0x1b4] sm:$0xf] %v7122_v50  ;;  %581 = vst [vmem:[#allocation3 + $0x1d8] sm:$0xf] %v7123_v51  ;;  %v8116_v62 = vld [vmem:[%s9927_s1 + $0x150] sm:$0xff]   ;;  %v8121_v6 = vld [vmem:[%s9927_s1 + $0x1e8] sm:$0xff]  }
  0x6d   : > { %2743 = vmatmul.mubr.bf16.gmra.mxu1 %v8089_v41  ;;  %1298 = vst [vmem:[#allocation3 + $0x13c] sm:$0xf] %v7122_v50  ;;  %1299 = vst [vmem:[#allocation3 + $0x160] sm:$0xf] %v7123_v51  ;;  %v8097_v63 = vld [vmem:[#allocation3 + $0x128] ss:$36 sps:$4 sm:$0xff]   ;;  %7453 = vmatprep.subr.bf16.mxu0 %v8116_v62 }
  0x6e   : > { %2750 = vmatprep.mubr.bf16.mxu1 %v8095_v44  ;;  %939 = vst [vmem:[#allocation3 + $0x178] sm:$0xf] %v7122_v50  ;;  %940 = vst [vmem:[#allocation3 + $0x19c] sm:$0xf] %v7123_v51  ;;  %v8117_v1 = vld [vmem:[%s9927_s1 + $0x110] sm:$0xff]   ;;  %7523 = vmatprep.subr.bf16.mxu1 %v8121_v6  ;;  %v723_v13 = vld [vmem:[#allocation2 + $0xc0] sm:$0xff] }
  0x6f   : > { %700 = vst [vmem:[#allocation3 + $0x1b8] sm:$0xf] %v7142_v57  ;;  %701 = vst [vmem:[#allocation3 + $0x1dc] sm:$0xf] %v7143_v58  ;;  %v482_v2 = vld [vmem:[#allocation2 + $0xa9] sm:$0xff]  ;;  %v483_v3 = vld [vmem:[#allocation2 + $0xb1] sm:$0xff]  ;;  %7454 = vmatpush3.bf16.msra.mxu0 %v8117_v1  ;;  %v7164_v15 = vpack.c.bf16 %v723_v13, %v723_v13 }
  0x70   : > { %821 = vst [vmem:[#allocation3 + $0x1bc] sm:$0xf] %v7162_v60  ;;  %462 = vst [vmem:[#allocation3 + $0x1f8] sm:$0xf] %v7162_v60  ;;  %v8104_v0 = vld [vmem:[#allocation3 + $0x174] ss:$36 sps:$4 sm:$0xff]   ;;  %v7124_v4 = vpack.c.bf16 %v482_v2, %v482_v2  ;;  %v7125_v5 = vpack.c.bf16 %v483_v3, %v483_v3 }
  0x71   : > { %1059 = vst [vmem:[#allocation3 + $0x17c] sm:$0xf] %v7142_v57  ;;  %1060 = vst [vmem:[#allocation3 + $0x1a0] sm:$0xf] %v7143_v58  ;;  %v602_v7 = vld [vmem:[#allocation2 + $0xaa] sm:$0xff]  ;;  %v603_v8 = vld [vmem:[#allocation2 + $0xb2] sm:$0xff] }
  0x72   : > { %1180 = vst [vmem:[#allocation3 + $0x180] sm:$0xf] %v7162_v60  ;;  %822 = vst [vmem:[#allocation3 + $0x1e0] sm:$0xf] %v7163_v61  ;;  %v8102_v9 = vld [vmem:[#allocation3 + $0x168] ss:$36 sps:$4 sm:$0xff]   ;;  %v7144_v10 = vpack.c.bf16 %v602_v7, %v602_v7  ;;  %v7145_v11 = vpack.c.bf16 %v603_v8, %v603_v8 }
  0x73   : > { %2638 = vmatmul.mubr.bf16.gmra.mxu0 %v8094_v49  ;;  %463 = vst [vmem:[#allocation3 + $0x21c] sm:$0xf] %v7163_v61  ;;  %1181 = vst [vmem:[#allocation3 + $0x1a4] sm:$0xf] %v7163_v61  ;;  %v8109_v12 = vld [vmem:[#allocation3 + $0x1b4] ss:$36 sps:$4 sm:$0xff]  }
  0x74   : > { %2645 = vmatprep.mubr.bf16.mxu0 %v8100_v52  ;;  %582 = vst [vmem:[#allocation3 + $0x1fc] sm:$0xf] %v7124_v4  ;;  %1300 = vst [vmem:[#allocation3 + $0x184] sm:$0xf] %v7124_v4  ;;  %v724_v14 = vld [vmem:[#allocation2 + $0xc8] sm:$0xff]  ;;  %v8128_v22 = vld [vmem:[%s9927_s1 + $0x1e0] sm:$0xff]  }
  0x75   : > { %2751 = vmatmul.mubr.bf16.gmra.mxu1 %v8097_v63  ;;  %941 = vst [vmem:[#allocation3 + $0x1c0] sm:$0xf] %v7124_v4  ;;  %583 = vst [vmem:[#allocation3 + $0x220] sm:$0xf] %v7125_v5  ;;  %v7165_v16 = vpack.c.bf16 %v724_v14, %v724_v14  ;;  %v8124_v17 = vld [vmem:[%s9927_s1 + $0x1a8] sm:$0xff]   ;;  %v8131_v29 = vld [vmem:[%s9927_s1 + $0x1a0] sm:$0xff]  }
  0x76   : > { %2758 = vmatprep.mubr.bf16.mxu1 %v8104_v0  ;;  %1301 = vst [vmem:[#allocation3 + $0x1a8] sm:$0xf] %v7125_v5  ;;  %942 = vst [vmem:[#allocation3 + $0x1e4] sm:$0xf] %v7125_v5  ;;  %v8107_v18 = vld [vmem:[#allocation3 + $0x170] ss:$36 sps:$4 sm:$0xff]   ;;  %7524 = vmatpush3.bf16.msra.mxu1 %v8124_v17 }
  0x77   : > { %702 = vst [vmem:[#allocation3 + $0x200] sm:$0xf] %v7144_v10  ;;  %703 = vst [vmem:[#allocation3 + $0x224] sm:$0xf] %v7145_v11  ;;  %v8126_v20 = vld [vmem:[%s9927_s1 + $0x148] sm:$0xff]   ;;  %7525 = vmatprep.subr.bf16.mxu1 %v8128_v22  ;;  %v725_v36 = vld [vmem:[#allocation2 + $0xd8] sm:$0xff] }
  0x78   : > { %1061 = vst [vmem:[#allocation3 + $0x1c4] sm:$0xf] %v7144_v10  ;;  %1062 = vst [vmem:[#allocation3 + $0x1e8] sm:$0xf] %v7145_v11  ;;  %v8127_v21 = vld [vmem:[%s9927_s1 + $0x108] sm:$0xff]   ;;  %7455 = vmatprep.subr.bf16.mxu0 %v8126_v20  ;;  %v726_v37 = vld [vmem:[#allocation2 + $0xe0] sm:$0xff]  ;;  %v7166_v38 = vpack.c.bf16 %v725_v36, %v725_v36 }
  0x79   : > { %v8113_v19 = vld [vmem:[#allocation3 + $0x1bc] ss:$36 sps:$4 sm:$0xff]   ;;  %823 = vst [vmem:[#allocation3 + $0x204] sm:$0xf] %v7164_v15  ;;  %824 = vst [vmem:[#allocation3 + $0x228] sm:$0xf] %v7165_v16  ;;  %7456 = vmatpush3.bf16.msra.mxu0 %v8127_v21  ;;  %v7167_v39 = vpack.c.bf16 %v726_v37, %v726_v37 }
  0x7a   : > { %464 = vst [vmem:[#allocation3 + $0x240] sm:$0xf] %v7164_v15  ;;  %465 = vst [vmem:[#allocation3 + $0x264] sm:$0xf] %v7165_v16  ;;  %v484_v23 = vld [vmem:[#allocation2 + $0xc1] sm:$0xff]  ;;  %v485_v27 = vld [vmem:[#allocation2 + $0xc9] sm:$0xff]  ;;  %7526 = vmatpush3.bf16.msra.mxu1 %v8131_v29 }
  0x7b   : > { %2646 = vmatmul.mubr.bf16.gmra.mxu0 %v8102_v9  ;;  %1182 = vst [vmem:[#allocation3 + $0x1c8] sm:$0xf] %v7164_v15  ;;  %1183 = vst [vmem:[#allocation3 + $0x1ec] sm:$0xf] %v7165_v16  ;;  %v8112_v24 = vld [vmem:[#allocation3 + $0x1b0] ss:$36 sps:$4 sm:$0xff]   ;;  %v7126_v26 = vpack.c.bf16 %v484_v23, %v484_v23  ;;  %v7127_v28 = vpack.c.bf16 %v485_v27, %v485_v27 }
  0x7c   : > { %2653 = vmatprep.mubr.bf16.mxu0 %v8109_v12  ;;  %v8118_v25 = vld [vmem:[#allocation3 + $0x1fc] ss:$36 sps:$4 sm:$0xff]   ;;  %v605_v31 = vld [vmem:[#allocation2 + $0xca] sm:$0xff]  ;;  %825 = vst [vmem:[#allocation3 + $0x24c] sm:$0xf] %v7166_v38  ;;  %vm8905_vm2 = vmand %vm3168_vm0, %vm3169_vm1 }
  0x7d   : > { %2759 = vmatmul.mubr.bf16.gmra.mxu1 %v8107_v18  ;;  %584 = vst [vmem:[#allocation3 + $0x244] sm:$0xf] %v7126_v26  ;;  %v604_v30 = vld [vmem:[#allocation2 + $0xc2] sm:$0xff]  ;;  %1302 = vst [vmem:[#allocation3 + $0x1cc] sm:$0xf] %v7126_v26  ;;  %v7147_v34 = vpack.c.bf16 %v605_v31, %v605_v31  ;;  %v8136_v40 = vld [vmem:[%s9927_s1 + $0x1d8] sm:$0xff]  }
  0x7e   : > { %2766 = vmatprep.mubr.bf16.mxu1 %v8113_v19  ;;  %943 = vst [vmem:[#allocation3 + $0x208] sm:$0xf] %v7126_v26  ;;  %v8115_v32 = vld [vmem:[#allocation3 + $0x1b8] ss:$36 sps:$4 sm:$0xff]   ;;  %v7146_v33 = vpack.c.bf16 %v604_v30, %v604_v30  ;;  %585 = vst [vmem:[#allocation3 + $0x268] sm:$0xf] %v7127_v28  ;;  %7527 = vmatprep.subr.bf16.mxu1 %v8136_v40 }
  0x7f   : > { %1303 = vst [vmem:[#allocation3 + $0x1f0] sm:$0xf] %v7127_v28  ;;  %944 = vst [vmem:[#allocation3 + $0x22c] sm:$0xf] %v7127_v28  ;;  %v8120_v41 = vld [vmem:[#allocation3 + $0x1f8] ss:$36 sps:$4 sm:$0xff]  }
  0x80   : > { %v8122_v35 = vld [vmem:[#allocation3 + $0x204] ss:$36 sps:$4 sm:$0xff]   ;;  %704 = vst [vmem:[#allocation3 + $0x248] sm:$0xf] %v7146_v33  ;;  %705 = vst [vmem:[#allocation3 + $0x26c] sm:$0xf] %v7147_v34 }
  0x81   : > { %1063 = vst [vmem:[#allocation3 + $0x20c] sm:$0xf] %v7146_v33  ;;  %1064 = vst [vmem:[#allocation3 + $0x230] sm:$0xf] %v7147_v34  ;;  %v8137_v42 = vld [vmem:[%s9927_s1 + $0x198] sm:$0xff]   ;;  %v8138_v43 = vld [vmem:[%s9927_s1 + $0x140] sm:$0xff]  }
  0x82   : > { %826 = vst [vmem:[#allocation3 + $0x270] sm:$0xf] %v7167_v39  ;;  %466 = vst [vmem:[#allocation3 + $0x288] sm:$0xf] %v7166_v38  ;;  %v8139_v44 = vld [vmem:[%s9927_s1 + $0x1d0] sm:$0xff]   ;;  %7528 = vmatpush3.bf16.msra.mxu1 %v8137_v42  ;;  %v486_v45 = vld [vmem:[#allocation2 + $0xd9] sm:$0xff]  ;;  %7457 = vmatprep.subr.bf16.mxu0 %v8138_v43 }
  0x83   : > { %2654 = vmatmul.mubr.bf16.gmra.mxu0 %v8112_v24  ;;  %467 = vst [vmem:[#allocation3 + $0x2ac] sm:$0xf] %v7167_v39  ;;  %1184 = vst [vmem:[#allocation3 + $0x210] sm:$0xf] %v7166_v38  ;;  %v487_v46 = vld [vmem:[#allocation2 + $0xe1] sm:$0xff]  ;;  %7529 = vmatprep.subr.bf16.mxu1 %v8139_v44  ;;  %v7128_v47 = vpack.c.bf16 %v486_v45, %v486_v45  ;;  %v8143_v52 = vld [vmem:[%s9927_s1 + $0x190] sm:$0xff]  }
  0x84   : > { %2661 = vmatprep.mubr.bf16.mxu0 %v8118_v25  ;;  %1185 = vst [vmem:[#allocation3 + $0x234] sm:$0xf] %v7167_v39  ;;  %v7129_v48 = vpack.c.bf16 %v487_v46, %v487_v46  ;;  %v8142_v49 = vld [vmem:[%s9927_s1 + $0x100] sm:$0xff]   ;;  %v727_v55 = vld [vmem:[#allocation2 + $0xf0] sm:$0xff]  ;;  %v728_v61 = vld [vmem:[#allocation2 + $0xf8] sm:$0xff] }
  0x85   : > { %2767 = vmatmul.mubr.bf16.gmra.mxu1 %v8115_v32  ;;  %v8125_v50 = vld [vmem:[#allocation3 + $0x200] ss:$36 sps:$4 sm:$0xff]   ;;  %586 = vst [vmem:[#allocation3 + $0x28c] sm:$0xf] %v7128_v47  ;;  %1304 = vst [vmem:[#allocation3 + $0x214] sm:$0xf] %v7128_v47  ;;  %7458 = vmatpush3.bf16.msra.mxu0 %v8142_v49  ;;  %v7168_v59 = vpack.c.bf16 %v727_v55, %v727_v55  ;;  %v7169_v62 = vpack.c.bf16 %v728_v61, %v728_v61 }
  0x86   : > { %2774 = vmatprep.mubr.bf16.mxu1 %v8122_v35  ;;  %v8129_v51 = vld [vmem:[#allocation3 + $0x244] ss:$36 sps:$4 sm:$0xff]   ;;  %587 = vst [vmem:[#allocation3 + $0x2b0] sm:$0xf] %v7129_v48  ;;  %1305 = vst [vmem:[#allocation3 + $0x238] sm:$0xf] %v7129_v48  ;;  %7530 = vmatpush3.bf16.msra.mxu1 %v8143_v52 }
  0x87   : > { %945 = vst [vmem:[#allocation3 + $0x250] sm:$0xf] %v7128_v47  ;;  %946 = vst [vmem:[#allocation3 + $0x274] sm:$0xf] %v7129_v48  ;;  %v606_v53 = vld [vmem:[#allocation2 + $0xda] sm:$0xff]  ;;  %v607_v54 = vld [vmem:[#allocation2 + $0xe2] sm:$0xff] }
  0x88   : > { %v7148_v57 = vpack.c.bf16 %v606_v53, %v606_v53  ;;  %v7149_v58 = vpack.c.bf16 %v607_v54, %v607_v54  ;;  %v8132_v60 = vld [vmem:[#allocation3 + $0x240] ss:$36 sps:$4 sm:$0xff]   ;;  %827 = vst [vmem:[#allocation3 + $0x294] sm:$0xf] %v7168_v59  ;;  %v8148_v63 = vld [vmem:[%s9927_s1 + $0x1c8] sm:$0xff]   ;;  %v8155_v5 = vld [vmem:[%s9927_s1 + $0x238] sm:$0xff]  }
  0x89   : > { %v8133_v56 = vld [vmem:[#allocation3 + $0x24c] ss:$36 sps:$4 sm:$0xff]   ;;  %1186 = vst [vmem:[#allocation3 + $0x258] sm:$0xf] %v7168_v59  ;;  %828 = vst [vmem:[#allocation3 + $0x2b8] sm:$0xf] %v7169_v62  ;;  %7531 = vmatprep.subr.bf16.mxu1 %v8148_v63  ;;  %7885 = vmatprep.subr.bf16.mxu0 %v8155_v5 }
  0x8a   : > { %706 = vst [vmem:[#allocation3 + $0x290] sm:$0xf] %v7148_v57  ;;  %707 = vst [vmem:[#allocation3 + $0x2b4] sm:$0xf] %v7149_v58  ;;  %v8149_v0 = vld [vmem:[%s9927_s1 + $0x188] sm:$0xff]   ;;  %v8150_v1 = vld [vmem:[%s9927_s1 + $0x1c0] sm:$0xff]  }
  0x8b   : > { %2662 = vmatmul.mubr.bf16.gmra.mxu0 %v8120_v41  ;;  %1065 = vst [vmem:[#allocation3 + $0x254] sm:$0xf] %v7148_v57  ;;  %1066 = vst [vmem:[#allocation3 + $0x278] sm:$0xf] %v7149_v58  ;;  %7532 = vmatpush3.bf16.msra.mxu1 %v8149_v0  ;;  %v8135_v3 = vld [vmem:[#allocation3 + $0x248] ss:$36 sps:$4 sm:$0xff]  }
  0x8c   : > { %2669 = vmatprep.mubr.bf16.mxu0 %v8129_v51  ;;  %1424 = vst [vmem:[#allocation3 + $0x218] sm:$0xf] %v7148_v57  ;;  %1425 = vst [vmem:[#allocation3 + $0x23c] sm:$0xf] %v7149_v58  ;;  %7533 = vmatprep.subr.bf16.mxu1 %v8150_v1  ;;  %v8154_v4 = vld [vmem:[%s9927_s1 + $0x180] sm:$0xff]   ;;  %v8165_v13 = vld [vmem:[%s9927_s1 + $0x230] sm:$0xff]  }
  0x8d   : > { %2775 = vmatmul.mubr.bf16.gmra.mxu1 %v8125_v50  ;;  %1187 = vst [vmem:[#allocation3 + $0x27c] sm:$0xf] %v7169_v62  ;;  %v8140_v2 = vld [vmem:[#allocation3 + $0x28c] ss:$36 sps:$4 sm:$0xff]   ;;  %v8153_v8 = vld [vmem:[#allocation3 + $0x14] ss:$36 sps:$4 sm:$0xff]   ;;  %vm8916_vm4 = vmand %vm3168_vm0, %vm3201_vm3 }
  0x8e   : > { %2782 = vmatprep.mubr.bf16.mxu1 %v8133_v56  ;;  %v8144_v6 = vld [vmem:[#allocation3 + $0x288] ss:$36 sps:$4 sm:$0xff]   ;;  %v8158_v10 = vld [vmem:[#allocation3 + $0x1c] ss:$36 sps:$4 sm:$0xff]   ;;  %v8151_v11 = vld [vmem:[#allocation3 + $0x10] ss:$36 sps:$4 sm:$0xff]  }
  0x8f   : > { %7534 = vmatpush3.bf16.msra.mxu1 %v8154_v4  ;;  %v8159_v12 = vld [vmem:[#allocation3 + $0x5c] ss:$36 sps:$4 sm:$0xff]   ;;  %v8162_v15 = vld [vmem:[#allocation3 + $0x64] ss:$36 sps:$4 sm:$0xff]   ;;  %v8169_v21 = vld [vmem:[#allocation3 + $0xac] ss:$36 sps:$4 sm:$0xff]  }
  0x90   : > { %v8145_v7 = vld [vmem:[#allocation3 + $0x294] ss:$36 sps:$4 sm:$0xff]   ;;  %v8172_v16 = vld [vmem:[%s9927_s1 + $0x228] sm:$0xff]   ;;  %v8179_v19 = vld [vmem:[%s9927_s1 + $0x220] sm:$0xff]  }
  0x91   : > { %v8147_v9 = vld [vmem:[#allocation3 + $0x290] ss:$36 sps:$4 sm:$0xff]   ;;  %v8156_v14 = vld [vmem:[#allocation3 + $0x18] ss:$36 sps:$4 sm:$0xff]   ;;  %v8166_v18 = vld [vmem:[#allocation3 + $0xa4] ss:$36 sps:$4 sm:$0xff]  }
  0x92   : > { %v8161_v17 = vld [vmem:[#allocation3 + $0x58] ss:$36 sps:$4 sm:$0xff]   ;;  %v8164_v20 = vld [vmem:[#allocation3 + $0x60] ss:$36 sps:$4 sm:$0xff]   ;;  %v8173_v24 = vld [vmem:[#allocation3 + $0xec] ss:$36 sps:$4 sm:$0xff]  }
  0x93   : > { %2670 = vmatmul.mubr.bf16.gmra.mxu0 %v8132_v60  ;;  %v8189_v22 = vld [vmem:[%s9927_s1 + $0x218] sm:$0xff]   ;;  %v8168_v23 = vld [vmem:[#allocation3 + $0xa0] ss:$36 sps:$4 sm:$0xff]   ;;  %v8199_v25 = vld [vmem:[%s9927_s1 + $0x210] sm:$0xff]  }
  0x94   : > { %2677 = vmatprep.mubr.bf16.mxu0 %v8140_v2  ;;  %v8171_v26 = vld [vmem:[#allocation3 + $0xa8] ss:$36 sps:$4 sm:$0xff]   ;;  %v8176_v27 = vld [vmem:[#allocation3 + $0xf4] ss:$36 sps:$4 sm:$0xff]   ;;  %v8870_v46 = vld [vmem:[%s9927_s1 + $0x200] sm:$0xff]  }
  0x95   : > { %2783 = vmatmul.mubr.bf16.gmra.mxu1 %v8135_v3  ;;  %v1206_v28 = vld [vmem:[#allocation2 + $0xf1] sm:$0xff]  ;;  %v1207_v29 = vld [vmem:[#allocation2 + $0xf9] sm:$0xff]  ;;  %v8865_v30 = vld [vmem:[%s9927_s1 + $0x208] sm:$0xff]  }
  0x96   : > { %2790 = vmatprep.mubr.bf16.mxu1 %v8145_v7  ;;  %v7246_v31 = vpack.c.bf16 %v1206_v28, %v1206_v28  ;;  %v7247_v32 = vpack.c.bf16 %v1207_v29, %v1207_v29  ;;  %v967_v33 = vld [vmem:[#allocation2 + $0xf2] sm:$0xff]  ;;  %v8175_v34 = vld [vmem:[#allocation3 + $0xe8] ss:$36 sps:$4 sm:$0xff]   ;;  %v968_v35 = vld [vmem:[#allocation2 + $0xfa] sm:$0xff] }
  0x97   : > { %v7208_v36 = vpack.c.bf16 %v967_v33, %v967_v33  ;;  %v1088_v37 = vld [vmem:[#allocation2 + $0x108] sm:$0xff]  ;;  %v1089_v38 = vld [vmem:[#allocation2 + $0x110] sm:$0xff]  ;;  %v7209_v40 = vpack.c.bf16 %v968_v35, %v968_v35  ;;  %v1311_v49 = vld [vmem:[#allocation2 + $0x3a] sm:$0xff] }
  0x98   : > { %v8180_v39 = vld [vmem:[#allocation3 + $0x134] ss:$36 sps:$4 sm:$0xff]   ;;  %1306 = vst [vmem:[#allocation3 + $0x25c] sm:$0xf] %v7246_v31  ;;  %1307 = vst [vmem:[#allocation3 + $0x280] sm:$0xf] %v7247_v32  ;;  %v7228_v41 = vpack.c.bf16 %v1088_v37, %v1088_v37  ;;  %v7229_v42 = vpack.c.bf16 %v1089_v38, %v1089_v38  ;;  %v7251_v53 = vpack.c.bf16 %v1311_v49, %v1311_v49 }
  0x99   : > { %947 = vst [vmem:[#allocation3 + $0x298] sm:$0xf] %v7246_v31  ;;  %948 = vst [vmem:[#allocation3 + $0x2bc] sm:$0xf] %v7247_v32  ;;  %v1208_v43 = vld [vmem:[#allocation2 + $0x109] sm:$0xff]  ;;  %v1209_v44 = vld [vmem:[#allocation2 + $0x111] sm:$0xff] }
  0x9a   : > { %v1310_v45 = vld [vmem:[#allocation2 + $0x32] sm:$0xff]  ;;  %1067 = vst [vmem:[#allocation3 + $0x29c] sm:$0xf] %v7208_v36  ;;  %v7248_v47 = vpack.c.bf16 %v1208_v43, %v1208_v43  ;;  %v7249_v48 = vpack.c.bf16 %v1209_v44, %v1209_v44  ;;  %v1312_v51 = vld [vmem:[#allocation2 + $0x4a] sm:$0xff]  ;;  %1426 = vst [vmem:[#allocation3 + $0x260] sm:$0xf] %v7208_v36 }
  0x9b   : > { %2678 = vmatmul.mubr.bf16.gmra.mxu0 %v8144_v6  ;;  %v7250_v50 = vpack.c.bf16 %v1310_v45, %v1310_v45  ;;  %v1313_v52 = vld [vmem:[#allocation2 + $0x52] sm:$0xff]  ;;  %1068 = vst [vmem:[#allocation3 + $0x2c0] sm:$0xf] %v7209_v40  ;;  %1188 = vst [vmem:[#allocation3 + $0x2a0] sm:$0xf] %v7228_v41  ;;  %v7252_v54 = vpack.c.bf16 %v1312_v51, %v1312_v51  ;;  %v1314_v56 = vld [vmem:[#allocation2 + $0x62] sm:$0xff] }
  0x9c   : > { %2831 = vmatprep.mubr.bf16.mxu0 %v8153_v8  ;;  %1189 = vst [vmem:[#allocation3 + $0x2c4] sm:$0xf] %v7229_v42  ;;  %v7253_v55 = vpack.c.bf16 %v1313_v52, %v1313_v52  ;;  %v1315_v57 = vld [vmem:[#allocation2 + $0x6a] sm:$0xff]  ;;  %v1316_v58 = vld [vmem:[#allocation2 + $0x7a] sm:$0xff]  ;;  %1427 = vst [vmem:[#allocation3 + $0x284] sm:$0xf] %v7209_v40  ;;  %v7254_v60 = vpack.c.bf16 %v1314_v56, %v1314_v56 }
  0x9d   : > { %2791 = vmatmul.mubr.bf16.gmra.mxu1 %v8147_v9  ;;  %v8178_v59 = vld [vmem:[#allocation3 + $0xf0] ss:$36 sps:$4 sm:$0xff]   ;;  %1308 = vst [vmem:[#allocation3 + $0x2a4] sm:$0xf] %v7248_v47  ;;  %1309 = vst [vmem:[#allocation3 + $0x2c8] sm:$0xf] %v7249_v48  ;;  %v7255_v61 = vpack.c.bf16 %v1315_v57, %v1315_v57  ;;  %v7256_v63 = vpack.c.bf16 %v1316_v58, %v1316_v58 }
  0x9e   : > { %2944 = vmatprep.mubr.bf16.mxu1 %v8158_v10  ;;  %1410 = vst [vmem:[#allocation3 + $0x20] sm:$0xf] %v7250_v50  ;;  %v1317_v62 = vld [vmem:[#allocation2 + $0x82] sm:$0xff]  ;;  %v1318_v0 = vld [vmem:[#allocation2 + $0x92] sm:$0xff]  ;;  %v1319_v1 = vld [vmem:[#allocation2 + $0x9a] sm:$0xff] }
  0x9f   : > { %1411 = vst [vmem:[#allocation3 + $0x44] sm:$0xf] %v7251_v53  ;;  %1412 = vst [vmem:[#allocation3 + $0x68] sm:$0xf] %v7252_v54  ;;  %v7257_v2 = vpack.c.bf16 %v1317_v62, %v1317_v62  ;;  %v7258_v3 = vpack.c.bf16 %v1318_v0, %v1318_v0  ;;  %v7259_v4 = vpack.c.bf16 %v1319_v1, %v1319_v1  ;;  %v1321_v6 = vld [vmem:[#allocation2 + $0xb2] sm:$0xff]  ;;  %v1322_v7 = vld [vmem:[#allocation2 + $0xc2] sm:$0xff] }
  0xa0   : > { %1413 = vst [vmem:[#allocation3 + $0x8c] sm:$0xf] %v7253_v55  ;;  %1414 = vst [vmem:[#allocation3 + $0xb0] sm:$0xf] %v7254_v60  ;;  %v7261_v9 = vpack.c.bf16 %v1321_v6, %v1321_v6  ;;  %v1323_v10 = vld [vmem:[#allocation2 + $0xca] sm:$0xff] }
  0xa1   : > { %1415 = vst [vmem:[#allocation3 + $0xd4] sm:$0xf] %v7255_v61  ;;  %1416 = vst [vmem:[#allocation3 + $0xf8] sm:$0xf] %v7256_v63  ;;  %v8198_v28 = vld [vmem:[#allocation3 + $0x1c8] ss:$36 sps:$4 sm:$0xff]  }
  0xa2   : > { %1417 = vst [vmem:[#allocation3 + $0x11c] sm:$0xf] %v7257_v2  ;;  %1418 = vst [vmem:[#allocation3 + $0x140] sm:$0xf] %v7258_v3  ;;  %v8203_v29 = vld [vmem:[#allocation3 + $0x214] ss:$36 sps:$4 sm:$0xff]  }
  0xa3   : > { %2832 = vmatmul.mubr.bf16.vlgmr.msra.gmra.mxu0 %v8151_v11  ;;  %v7262_v11 = vpack.c.bf16 %v1322_v7, %v1322_v7  ;;  %1419 = vst [vmem:[#allocation3 + $0x164] sm:$0xf] %v7259_v4  ;;  %1421 = vst [vmem:[#allocation3 + $0x1ac] sm:$0xf] %v7261_v9  ;;  %v8207_v31 = vld [vmem:[#allocation3 + $0x254] ss:$36 sps:$4 sm:$0xff]  }
  0xa4   : > { %7886 = vmatpush3.bf16.msra.mxu0 %v8155_v5  ;;  %2839 = vmatprep.mubr.bf16.mxu0 %v8159_v12  ;;  %v1320_v5 = vld [vmem:[#allocation2 + $0xaa] sm:$0xff]  ;;  %v8183_v12 = vld [vmem:[#allocation3 + $0x13c] ss:$36 sps:$4 sm:$0xff]   ;;  %vm9142_vm7 = vmand %vm3485_vm5, %vm3201_vm3 }
  0xa5   : > { %7887 = vmatprep.subr.bf16.mxu0 %v8165_v13  ;;  %2945 = vmatmul.mubr.bf16.vlgmr.msra.gmra.mxu1 %v8156_v14  ;;  %v7260_v8 = vpack.c.bf16 %v1320_v5, %v1320_v5  ;;  %v1328_v14 = vld [vmem:[#allocation2 + $0x10a] sm:$0xff]  ;;  %1422 = vst [vmem:[#allocation3 + $0x1d0] sm:$0xf] %v7262_v11  ;;  %v8210_v33 = vld [vmem:[#allocation3 + $0x25c] ss:$36 sps:$4 sm:$0xff]   ;;  %vm9151_vm8 = vmor %vm3169_vm1, %vm3283_vm6 }
  0xa6   : > { %2952 = vmatprep.mubr.bf16.mxu1 %v8162_v15  ;;  %v1329_v15 = vld [vmem:[#allocation2 + $0x112] sm:$0xff]  ;;  %v8214_v35 = vld [vmem:[#allocation3 + $0x29c] ss:$36 sps:$4 sm:$0xff]   ;;  %v8217_v37 = vld [vmem:[#allocation3 + $0x2a4] ss:$36 sps:$4 sm:$0xff]  }
  0xa7   : > { %1420 = vst [vmem:[#allocation3 + $0x188] sm:$0xf] %v7260_v8  ;;  %v8205_v32 = vld [vmem:[#allocation3 + $0x210] ss:$36 sps:$4 sm:$0xff]   ;;  %v8212_v36 = vld [vmem:[#allocation3 + $0x258] ss:$36 sps:$4 sm:$0xff]  }
  0xa8   : > { %7888 = vmatpush3.bf16.msra.mxu0 %v8165_v13  ;;  %v7263_v13 = vpack.c.bf16 %v1323_v10, %v1323_v10  ;;  %v8216_v38 = vld [vmem:[#allocation3 + $0x298] ss:$36 sps:$4 sm:$0xff]   ;;  %v8219_v40 = vld [vmem:[#allocation3 + $0x2a0] ss:$36 sps:$4 sm:$0xff]   ;;  %v8221_v41 = vld [vmem:[#allocation3 + $0x68] ss:$36 sps:$4 sm:$0xff]  }
  0xa9   : > { %7889 = vmatprep.subr.bf16.mxu0 %v8172_v16  ;;  %v8222_v42 = vld [vmem:[#allocation3 + $0xb0] ss:$36 sps:$4 sm:$0xff]   ;;  %v8223_v43 = vld [vmem:[#allocation3 + $0xf8] ss:$36 sps:$4 sm:$0xff]   ;;  %v8228_v48 = vld [vmem:[#allocation3 + $0x260] ss:$36 sps:$4 sm:$0xff]  }
  0xaa   : > { %1423 = vst [vmem:[#allocation3 + $0x1f4] sm:$0xf] %v7263_v13  ;;  %v8224_v44 = vld [vmem:[#allocation3 + $0x140] ss:$36 sps:$4 sm:$0xff]   ;;  %v8227_v47 = vld [vmem:[#allocation3 + $0x218] ss:$36 sps:$4 sm:$0xff]  }
  0xab   : > { %2840 = vmatmul.mubr.bf16.gmra.mxu0 %v8161_v17  ;;  %v7269_v17 = vpack.c.bf16 %v1329_v15, %v1329_v15  ;;  %v8879_v51 = vld [vmem:[%s9928_s2] ss:$0 sm:$0xff] }
  0xac   : > { %2847 = vmatprep.mubr.bf16.mxu0 %v8166_v18  ;;  %7890 = vmatpush3.bf16.msra.mxu0 %v8172_v16  ;;  %v7268_v16 = vpack.c.bf16 %v1328_v14, %v1328_v14  ;;  %v8182_v18 = vld [vmem:[#allocation3 + $0x130] ss:$36 sps:$4 sm:$0xff]  }
  0xad   : > { %7891 = vmatprep.subr.bf16.mxu0 %v8179_v19  ;;  %2953 = vmatmul.mubr.bf16.gmra.mxu1 %v8164_v20  ;;  %1429 = vst [vmem:[#allocation3 + $0x2cc] sm:$0xf] %v7269_v17  ;;  %v8185_v20 = vld [vmem:[#allocation3 + $0x138] ss:$36 sps:$4 sm:$0xff]  }
  0xae   : > { %2960 = vmatprep.mubr.bf16.mxu1 %v8169_v21  ;;  %1428 = vst [vmem:[#allocation3 + $0x2a8] sm:$0xf] %v7268_v16  ;;  %v8190_v21 = vld [vmem:[#allocation3 + $0x184] ss:$36 sps:$4 sm:$0xff]  }
  0xaf   : > { %v8225_v45 = vld [vmem:[#allocation3 + $0x188] ss:$36 sps:$4 sm:$0xff]  }
  0xb0   : > { %7892 = vmatpush3.bf16.msra.mxu0 %v8179_v19  ;;  %v8186_v19 = vld [vmem:[#allocation3 + $0x17c] ss:$36 sps:$4 sm:$0xff]  }
  0xb1   : > { %7893 = vmatprep.subr.bf16.mxu0 %v8189_v22 }
  0xb3   : > { %2848 = vmatmul.mubr.bf16.gmra.mxu0 %v8168_v23  ;;  %v8193_v23 = vld [vmem:[#allocation3 + $0x1c4] ss:$36 sps:$4 sm:$0xff]  }
  0xb4   : > { %2855 = vmatprep.mubr.bf16.mxu0 %v8173_v24  ;;  %7894 = vmatpush3.bf16.msra.mxu0 %v8189_v22  ;;  %v8188_v22 = vld [vmem:[#allocation3 + $0x178] ss:$36 sps:$4 sm:$0xff]   ;;  %v8192_v24 = vld [vmem:[#allocation3 + $0x180] ss:$36 sps:$4 sm:$0xff]  }
  0xb5   : > { %7895 = vmatprep.subr.bf16.mxu0 %v8199_v25  ;;  %2961 = vmatmul.mubr.bf16.gmra.mxu1 %v8171_v26  ;;  %v8195_v26 = vld [vmem:[#allocation3 + $0x1c0] ss:$36 sps:$4 sm:$0xff]   ;;  %v8229_v49 = vld [vmem:[#allocation3 + $0x2a8] ss:$36 sps:$4 sm:$0xff]  }
  0xb6   : > { %2968 = vmatprep.mubr.bf16.mxu1 %v8176_v27  ;;  %v8200_v27 = vld [vmem:[#allocation3 + $0x20c] ss:$36 sps:$4 sm:$0xff]  }
  0xb8   : > { %7896 = vmatpush3.bf16.msra.mxu0 %v8199_v25  ;;  %v8196_v25 = vld [vmem:[#allocation3 + $0x1cc] ss:$36 sps:$4 sm:$0xff]  }
  0xb9   : > { %7897 = vmatprep.subr.bf16.mxu0 %v8865_v30 }
  0xbb   : > { %2856 = vmatmul.mubr.bf16.gmra.mxu0 %v8175_v34  ;;  %v8209_v34 = vld [vmem:[#allocation3 + $0x250] ss:$36 sps:$4 sm:$0xff]  }
  0xbc   : > { %2863 = vmatprep.mubr.bf16.mxu0 %v8180_v39  ;;  %7898 = vmatpush3.bf16.msra.mxu0 %v8865_v30  ;;  %v8202_v30 = vld [vmem:[#allocation3 + $0x208] ss:$36 sps:$4 sm:$0xff]   ;;  %v8220_v39 = vld [vmem:[#allocation3 + $0x20] ss:$36 sps:$4 sm:$0xff]  }
  0xbd   : > { %7899 = vmatprep.subr.bf16.mxu0 %v8870_v46  ;;  %2969 = vmatmul.mubr.bf16.gmra.mxu1 %v8178_v59 }
  0xbe   : > { %2976 = vmatprep.mubr.bf16.mxu1 %v8183_v12 }
  0xc0   : > { %7900 = vmatpush3.bf16.msra.mxu0 %v8870_v46  ;;  %v8226_v46 = vld [vmem:[#allocation3 + $0x1d0] ss:$36 sps:$4 sm:$0xff]  }
  0xc3   : > { %2864 = vmatmul.mubr.bf16.gmra.mxu0 %v8182_v18 }
  0xc4   : > { %2871 = vmatprep.mubr.bf16.mxu0 %v8186_v19 }
  0xc5   : > { %2977 = vmatmul.mubr.bf16.gmra.mxu1 %v8185_v20 }
  0xc6   : > { %2984 = vmatprep.mubr.bf16.mxu1 %v8190_v21 }
  0xcb   : > { %2872 = vmatmul.mubr.bf16.gmra.mxu0 %v8188_v22 }
  0xcc   : > { %2879 = vmatprep.mubr.bf16.mxu0 %v8193_v23 }
  0xcd   : > { %2985 = vmatmul.mubr.bf16.gmra.mxu1 %v8192_v24 }
  0xce   : > { %2992 = vmatprep.mubr.bf16.mxu1 %v8196_v25 }
  0xd3   : > { %2880 = vmatmul.mubr.bf16.gmra.mxu0 %v8195_v26 }
  0xd4   : > { %2887 = vmatprep.mubr.bf16.mxu0 %v8200_v27 }
  0xd5   : > { %2993 = vmatmul.mubr.bf16.gmra.mxu1 %v8198_v28 }
  0xd6   : > { %3000 = vmatprep.mubr.bf16.mxu1 %v8203_v29 }
  0xdb   : > { %2888 = vmatmul.mubr.bf16.gmra.mxu0 %v8202_v30 }
  0xdc   : > { %2895 = vmatprep.mubr.bf16.mxu0 %v8207_v31 }
  0xdd   : > { %3001 = vmatmul.mubr.bf16.gmra.mxu1 %v8205_v32 }
  0xde   : > { %3008 = vmatprep.mubr.bf16.mxu1 %v8210_v33 }
  0xe3   : > { %2896 = vmatmul.mubr.bf16.gmra.mxu0 %v8209_v34 }
  0xe4   : > { %2903 = vmatprep.mubr.bf16.mxu0 %v8214_v35 }
  0xe5   : > { %3009 = vmatmul.mubr.bf16.gmra.mxu1 %v8212_v36 }
  0xe6   : > { %3016 = vmatprep.mubr.bf16.mxu1 %v8217_v37 }
  0xeb   : > { %2904 = vmatmul.mubr.bf16.gmra.mxu0 %v8216_v38 }
  0xec   : > { %7901 = vmatprep.mubr.bf16.mxu0 %v8220_v39 }
  0xed   : > { %3017 = vmatmul.mubr.bf16.gmra.mxu1 %v8219_v40 }
  0xf3   : > { %7902 = vmatmul.mubr.bf16.vlgmr.msra.gmra.mxu0 %v8221_v41 }
  0xf4   : > { %7905 = vmatprep.mubr.bf16.mxu0 %v8222_v42 }
  0xfb   : > { %7906 = vmatmul.mubr.bf16.gmra.mxu0 %v8223_v43 }
  0xfc   : > { %7909 = vmatprep.mubr.bf16.mxu0 %v8224_v44 }
 0x103   : > { %7910 = vmatmul.mubr.bf16.gmra.mxu0 %v8225_v45 }
 0x104   : > { %7913 = vmatprep.mubr.bf16.mxu0 %v8226_v46 }
 0x10b   : > { %7914 = vmatmul.mubr.bf16.gmra.mxu0 %v8227_v47 }
 0x10c   : > { %7917 = vmatprep.mubr.bf16.mxu0 %v8228_v48 }
 0x113   : > { %v7307_v50 = vpop.f32.mrf.mxu0  ;;  %7918 = vmatmul.mubr.bf16.gmra.mxu0 %v8229_v49 }
 0x115   : > { %v7308_v52 = vpop.f32.mrf.mxu0  ;;  %v7383_v54 = vpop.f32.mrf.mxu1 }
 0x116   : > { %v7309_v53 = vadd.f32 %v7308_v52, %v7307_v50 }
 0x117   : > { %v7310_v55 = vpop.f32.mrf.mxu0  ;;  %v7384_v57 = vpop.f32.mrf.mxu1 }
 0x118   : > { %v2608_v56 = vadd.f32 %v7309_v53, %v8879_v51  ;;  %v7385_v59 = vadd.f32 %v7384_v57, %v7383_v54  ;;  %v3174_v54 = vld [vmem:[#allocation4 + $0xc] sm:$0x1]  ;;  %v9936_v57 = vmov 0 }
 0x119   : > { %v7311_v58 = vpop.f32.mrf.mxu0  ;;  %v7386_v61 = vpop.f32.mrf.mxu1  ;;  %v9937_v57 = vsel %vm8905_vm2, 4294967295, %v9936_v57 }
 0x11a   : > { %v7312_v60 = vadd.f32 %v7311_v58, %v7310_v55  ;;  %v8882_v63 = vadd.f32 %v7385_v59, %v2608_v56  ;;  %9938 = vst [vmem:[#allocation11_spill] sm:$0xff] %v9937_v57 }
 0x11b   : > { %v7313_v62 = vpop.f32.mrf.mxu0  ;;  %v7387_v1 = vpop.f32.mrf.mxu1 }
 0x11c   : > { %v2611_v0 = vadd.f32 %v7312_v60, %v8879_v51  ;;  %v7388_v3 = vadd.f32 %v7387_v1, %v7386_v61  ;;  %v3175_v60 = vsel %vm8905_vm2, 0, %v3174_v54  ;;  %v3186_v54 = vld [vmem:[#allocation4 + $0x3c] sm:$0x1] }
 0x11d   : > { %v7314_v2 = vpop.f32.mrf.mxu0  ;;  %v7389_v5 = vpop.f32.mrf.mxu1  ;;  %3176 = vst [vmem:[#allocation4 + $0xc] sm:$0x1] %v3175_v60 }
 0x11e   : > { %v7315_v4 = vadd.f32 %v7314_v2, %v7313_v62  ;;  %v8885_v7 = vadd.f32 %v7388_v3, %v2611_v0  ;;  %v3171_v3 = vld [vmem:[#allocation4] sm:$0x1] }
 0x11f   : > { %v7316_v6 = vpop.f32.mrf.mxu0  ;;  %v7390_v9 = vpop.f32.mrf.mxu1 }
 0x120   : > { %v2616_v8 = vadd.f32 %v7315_v4, %v8879_v51  ;;  %v7391_v11 = vadd.f32 %v7390_v9, %v7389_v5 }
 0x121   : > { %v7317_v10 = vpop.f32.mrf.mxu0  ;;  %v7392_v13 = vpop.f32.mrf.mxu1 }
 0x122   : > { %v7318_v12 = vadd.f32 %v7317_v10, %v7316_v6  ;;  %v8888_v15 = vadd.f32 %v7391_v11, %v2616_v8  ;;  %v3172_v6 = vsel %vm8905_vm2, 0, %v3171_v3  ;;  %v3206_v10 = vld [vmem:[#allocation4 + $0x14] sm:$0x1] }
 0x123   : > { %v7319_v14 = vpop.f32.mrf.mxu0  ;;  %v7393_v17 = vpop.f32.mrf.mxu1  ;;  %3173 = vst [vmem:[#allocation4] sm:$0x1] %v3172_v6  ;;  %v3218_v6 = vld [vmem:[#allocation4 + $0x44] sm:$0x1] }
 0x124   : > { %v2619_v16 = vadd.f32 %v7318_v12, %v8879_v51  ;;  %v7394_v19 = vadd.f32 %v7393_v17, %v7392_v13  ;;  %v3207_v13 = vsel %vm8916_vm4, 0, %v3206_v10  ;;  %v3203_v17 = vld [vmem:[#allocation4 + $0x8] sm:$0x1] }
 0x125   : > { %v7320_v18 = vpop.f32.mrf.mxu0  ;;  %v7395_v21 = vpop.f32.mrf.mxu1  ;;  %3208 = vst [vmem:[#allocation4 + $0x14] sm:$0x1] %v3207_v13 }
 0x126   : > { %v7321_v20 = vadd.f32 %v7320_v18, %v7319_v14  ;;  %v8891_v23 = vadd.f32 %v7394_v19, %v2619_v16 }
 0x127   : > { %v7322_v22 = vpop.f32.mrf.mxu0  ;;  %v7396_v25 = vpop.f32.mrf.mxu1 }
 0x128   : > { %v2624_v24 = vadd.f32 %v7321_v20, %v8879_v51  ;;  %v7397_v27 = vadd.f32 %v7396_v25, %v7395_v21  ;;  %v3204_v20 = vsel %vm8916_vm4, 0, %v3203_v17 }
 0x129   : > { %v7323_v26 = vpop.f32.mrf.mxu0  ;;  %v7398_v29 = vpop.f32.mrf.mxu1  ;;  %3205 = vst [vmem:[#allocation4 + $0x8] sm:$0x1] %v3204_v20 }
 0x12a   : > { %v7324_v28 = vadd.f32 %v7323_v26, %v7322_v22  ;;  %v8894_v31 = vadd.f32 %v7397_v27, %v2624_v24  ;;  %v3180_v24 = vld [vmem:[#allocation4 + $0x24] sm:$0x1] }
 0x12b   : > { %v7325_v30 = vpop.f32.mrf.mxu0  ;;  %v7399_v33 = vpop.f32.mrf.mxu1  ;;  %v3181_v27 = vsel %vm8905_vm2, 0, %v3180_v24 }
 0x12c   : > { %v2627_v32 = vadd.f32 %v7324_v28, %v8879_v51  ;;  %v7400_v35 = vadd.f32 %v7399_v33, %v7398_v29  ;;  %3182 = vst [vmem:[#allocation4 + $0x24] sm:$0x1] %v3181_v27 }
 0x12d   : > { %v7326_v34 = vpop.f32.mrf.mxu0  ;;  %v7401_v37 = vpop.f32.mrf.mxu1 }
 0x12e   : > { %v7327_v36 = vadd.f32 %v7326_v34, %v7325_v30  ;;  %v8897_v39 = vadd.f32 %v7400_v35, %v2627_v32  ;;  %v3177_v30 = vld [vmem:[#allocation4 + $0x18] sm:$0x1] }
 0x12f   : > { %v7328_v38 = vpop.f32.mrf.mxu0  ;;  %v7402_v41 = vpop.f32.mrf.mxu1  ;;  %v3178_v34 = vsel %vm8905_vm2, 0, %v3177_v30 }
 0x130   : > { %v2632_v40 = vadd.f32 %v7327_v36, %v8879_v51  ;;  %v7403_v43 = vadd.f32 %v7402_v41, %v7401_v37  ;;  %3179 = vst [vmem:[#allocation4 + $0x18] sm:$0x1] %v3178_v34  ;;  %v3212_v37 = vld [vmem:[#allocation4 + $0x2c] sm:$0x1] }
 0x131   : > { %v7329_v42 = vpop.f32.mrf.mxu0  ;;  %v7404_v45 = vpop.f32.mrf.mxu1  ;;  %v3213_v41 = vsel %vm8916_vm4, 0, %v3212_v37  ;;  %v3189_v37 = vld [vmem:[#allocation4 + $0x48] sm:$0x1] }
 0x132   : > { %v7330_v44 = vadd.f32 %v7329_v42, %v7328_v38  ;;  %v8900_v47 = vadd.f32 %v7403_v43, %v2632_v40  ;;  %3214 = vst [vmem:[#allocation4 + $0x2c] sm:$0x1] %v3213_v41  ;;  %v3190_v41 = vsel %vm8905_vm2, 0, %v3189_v37 }
 0x133   : > { %v7331_v46 = vpop.f32.mrf.mxu0  ;;  %v7405_v49 = vpop.f32.mrf.mxu1  ;;  %3191 = vst [vmem:[#allocation4 + $0x48] sm:$0x1] %v3190_v41 }
 0x134   : > { %v2635_v48 = vadd.f32 %v7330_v44, %v8879_v51  ;;  %v7406_v52 = vadd.f32 %v7405_v49, %v7404_v45  ;;  %v3209_v44 = vld [vmem:[#allocation4 + $0x20] sm:$0x1] }
 0x135   : > { %v7332_v50 = vpop.f32.mrf.mxu0  ;;  %v7407_v55 = vpop.f32.mrf.mxu1 }
 0x136   : > { %v7333_v53 = vadd.f32 %v7332_v50, %v7331_v46  ;;  %v8909_v58 = vadd.f32 %v7406_v52, %v2635_v48  ;;  %v3210_v48 = vsel %vm8916_vm4, 0, %v3209_v44  ;;  %v3224_v44 = vld [vmem:[#allocation4 + $0x5c] sm:$0x1] }
 0x137   : > { %v7334_v56 = vpop.f32.mrf.mxu0  ;;  %v7408_v61 = vpop.f32.mrf.mxu1  ;;  %3211 = vst [vmem:[#allocation4 + $0x20] sm:$0x1] %v3210_v48  ;;  %v3225_v48 = vsel %vm8916_vm4, 0, %v3224_v44 }
 0x138   : > { %v2640_v59 = vadd.f32 %v7333_v53, %v8879_v51  ;;  %v7409_v0 = vadd.f32 %v7408_v61, %v7407_v55  ;;  %3226 = vst [vmem:[#allocation4 + $0x5c] sm:$0x1] %v3225_v48 }
 0x139   : > { %v7335_v62 = vpop.f32.mrf.mxu0  ;;  %v7410_v4 = vpop.f32.mrf.mxu1 }
 0x13a   : > { %v7336_v1 = vadd.f32 %v7335_v62, %v7334_v56  ;;  %v8922_v8 = vadd.f32 %v7409_v0, %v2640_v59  ;;  %v3187_v59 = vsel %vm8905_vm2, 0, %v3186_v54  ;;  %v3183_v62 = vld [vmem:[#allocation4 + $0x30] sm:$0x1] }
 0x13b   : > { %v7337_v5 = vpop.f32.mrf.mxu0  ;;  %v7411_v11 = vpop.f32.mrf.mxu1  ;;  %3188 = vst [vmem:[#allocation4 + $0x3c] sm:$0x1] %v3187_v59  ;;  %v3184_v3 = vsel %vm8905_vm2, 0, %v3183_v62 }
 0x13c   : > { %v2643_v9 = vadd.f32 %v7336_v1, %v8879_v51  ;;  %v7412_v14 = vadd.f32 %v7411_v11, %v7410_v4  ;;  %3185 = vst [vmem:[#allocation4 + $0x30] sm:$0x1] %v3184_v3  ;;  %v3219_v11 = vsel %vm8916_vm4, 0, %v3218_v6  ;;  %v3195_v6 = vld [vmem:[#allocation4 + $0x60] sm:$0x1] }
 0x13d   : > { %v7338_v12 = vpop.f32.mrf.mxu0  ;;  %v7413_v18 = vpop.f32.mrf.mxu1  ;;  %3220 = vst [vmem:[#allocation4 + $0x44] sm:$0x1] %v3219_v11  ;;  %v3196_v11 = vsel %vm8905_vm2, 0, %v3195_v6 }
 0x13e   : > { %v7339_v16 = vadd.f32 %v7338_v12, %v7337_v5  ;;  %v8929_v21 = vadd.f32 %v7412_v14, %v2643_v9  ;;  %3197 = vst [vmem:[#allocation4 + $0x60] sm:$0x1] %v3196_v11 }
 0x13f   : > { %v7340_v19 = vpop.f32.mrf.mxu0  ;;  %v7414_v25 = vpop.f32.mrf.mxu1 }
 0x140   : > { %v2648_v22 = vadd.f32 %v7339_v16, %v8879_v51  ;;  %v7415_v28 = vadd.f32 %v7414_v25, %v7413_v18 }
 0x141   : > { %v7341_v26 = vpop.f32.mrf.mxu0  ;;  %v7416_v32 = vpop.f32.mrf.mxu1 }
 0x142   : > { %v7342_v29 = vadd.f32 %v7341_v26, %v7340_v19  ;;  %v8936_v35 = vadd.f32 %v7415_v28, %v2648_v22  ;;  %v3215_v22 = vld [vmem:[#allocation4 + $0x38] sm:$0x1] }
 0x143   : > { %v7343_v33 = vpop.f32.mrf.mxu0  ;;  %v7417_v38 = vpop.f32.mrf.mxu1  ;;  %v3216_v26 = vsel %vm8916_vm4, 0, %v3215_v22 }
 0x144   : > { %v2651_v36 = vadd.f32 %v7342_v29, %v8879_v51  ;;  %v7418_v42 = vadd.f32 %v7417_v38, %v7416_v32  ;;  %3217 = vst [vmem:[#allocation4 + $0x38] sm:$0x1] %v3216_v26  ;;  %v3192_v29 = vld [vmem:[#allocation4 + $0x54] sm:$0x1] }
 0x145   : > { %v7344_v40 = vpop.f32.mrf.mxu0  ;;  %v7419_v45 = vpop.f32.mrf.mxu1 }
 0x146   : > { %v7345_v43 = vadd.f32 %v7344_v40, %v7343_v33  ;;  %v8943_v49 = vadd.f32 %v7418_v42, %v2651_v36  ;;  %v3193_v33 = vsel %vm8905_vm2, 0, %v3192_v29 }
 0x147   : > { %v7346_v46 = vpop.f32.mrf.mxu0  ;;  %v7420_v52 = vpop.f32.mrf.mxu1  ;;  %3194 = vst [vmem:[#allocation4 + $0x54] sm:$0x1] %v3193_v33 }
 0x148   : > { %9941 = vst [vmem:[#allocation12_spill] sm:$0xff] %v8943_v49  ;;  %v2656_v50 = vadd.f32 %v7345_v43, %v8879_v51  ;;  %v7421_v55 = vadd.f32 %v7420_v52, %v7419_v45 }
 0x149   : > { %v7347_v53 = vpop.f32.mrf.mxu0  ;;  %v7422_v60 = vpop.f32.mrf.mxu1 }
 0x14a   : > { %v7348_v56 = vadd.f32 %v7347_v53, %v7346_v46  ;;  %v8948_v0 = vadd.f32 %v7421_v55, %v2656_v50  ;;  %v3221_v53 = vld [vmem:[#allocation4 + $0x50] sm:$0x1] }
 0x14b   : > { %v7349_v61 = vpop.f32.mrf.mxu0  ;;  %v7423_v4 = vpop.f32.mrf.mxu1 }
 0x14c   : > { %9942 = vst [vmem:[#allocation13_spill] sm:$0xff] %v8948_v0  ;;  %v2659_v1 = vadd.f32 %v7348_v56, %v8879_v51  ;;  %v7424_v9 = vadd.f32 %v7423_v4, %v7422_v60  ;;  %v3222_v56 = vsel %vm8916_vm4, 0, %v3221_v53 }
 0x14d   : > { %v7350_v5 = vpop.f32.mrf.mxu0  ;;  %v7425_v12 = vpop.f32.mrf.mxu1  ;;  %3223 = vst [vmem:[#allocation4 + $0x50] sm:$0x1] %v3222_v56 }
 0x14e   : > { %v7351_v10 = vadd.f32 %v7350_v5, %v7349_v61  ;;  %v8955_v14 = vadd.f32 %v7424_v9, %v2659_v1  ;;  %v3198_v61 = vld [vmem:[#allocation4 + $0x6c] sm:$0x1] }
 0x14f   : > { %v7352_v13 = vpop.f32.mrf.mxu0  ;;  %v7426_v17 = vpop.f32.mrf.mxu1  ;;  %v3199_v3 = vsel %vm8905_vm2, 0, %v3198_v61 }
 0x150   : > { %9943 = vst [vmem:[#allocation14_spill] sm:$0xff] %v8955_v14  ;;  %v2664_v16 = vadd.f32 %v7351_v10, %v8879_v51  ;;  %v7427_v19 = vadd.f32 %v7426_v17, %v7425_v12  ;;  %3200 = vst [vmem:[#allocation4 + $0x6c] sm:$0x1] %v3199_v3 }
 0x151   : > { %v7353_v18 = vpop.f32.mrf.mxu0  ;;  %v7428_v24 = vpop.f32.mrf.mxu1 }
 0x152   : > { %v7354_v20 = vadd.f32 %v7353_v18, %v7352_v13  ;;  %v8960_v27 = vadd.f32 %v7427_v19, %v2664_v16 }
 0x153   : > { %v7355_v25 = vpop.f32.mrf.mxu0  ;;  %v7429_v30 = vpop.f32.mrf.mxu1 }
 0x154   : > { %9944 = vst [vmem:[#allocation15_spill] sm:$0xff] %v8960_v27  ;;  %v2667_v28 = vadd.f32 %v7354_v20, %v8879_v51  ;;  %v7430_v34 = vadd.f32 %v7429_v30, %v7428_v24  ;;  %v3230_v20 = vld [vmem:[#allocation4 + $0x74] sm:$0x1] }
 0x155   : > { %v7356_v32 = vpop.f32.mrf.mxu0  ;;  %v7431_v38 = vpop.f32.mrf.mxu1 }
 0x156   : > { %v7357_v36 = vadd.f32 %v7356_v32, %v7355_v25  ;;  %v8967_v42 = vadd.f32 %v7430_v34, %v2667_v28  ;;  %v3231_v25 = vsel %vm8916_vm4, 0, %v3230_v20  ;;  %v3227_v32 = vld [vmem:[#allocation4 + $0x68] sm:$0x1] }
 0x157   : > { %v7358_v40 = vpop.f32.mrf.mxu0  ;;  %v7432_v45 = vpop.f32.mrf.mxu1  ;;  %3232 = vst [vmem:[#allocation4 + $0x74] sm:$0x1] %v3231_v25 }
 0x158   : > { %9945 = vst [vmem:[#allocation16_spill] sm:$0xff] %v8967_v42  ;;  %v2672_v43 = vadd.f32 %v7357_v36, %v8879_v51  ;;  %v7433_v50 = vadd.f32 %v7432_v45, %v7431_v38  ;;  %v3228_v36 = vsel %vm8916_vm4, 0, %v3227_v32 }
 0x159   : > { %v7359_v46 = vpop.f32.mrf.mxu0  ;;  %v7434_v54 = vpop.f32.mrf.mxu1  ;;  %3229 = vst [vmem:[#allocation4 + $0x68] sm:$0x1] %v3228_v36 }
 0x15a   : > { %v7360_v52 = vadd.f32 %v7359_v46, %v7358_v40  ;;  %v8974_v59 = vadd.f32 %v7433_v50, %v2672_v43 }
 0x15b   : > { %v7361_v55 = vpop.f32.mrf.mxu0  ;;  %v7435_v62 = vpop.f32.mrf.mxu1 }
 0x15c   : > { %9946 = vst [vmem:[#allocation17_spill] sm:$0xff] %v8974_v59  ;;  %v2675_v60 = vadd.f32 %v7360_v52, %v8879_v51  ;;  %v7436_v4 = vadd.f32 %v7435_v62, %v7434_v54 }
 0x15d   : > { %v7362_v1 = vpop.f32.mrf.mxu0  ;;  %v7437_v9 = vpop.f32.mrf.mxu1 }
 0x15e   : > { %v7363_v5 = vadd.f32 %v7362_v1, %v7361_v55  ;;  %v8981_v12 = vadd.f32 %v7436_v4, %v2675_v60 }
 0x15f   : > { %v7364_v10 = vpop.f32.mrf.mxu0  ;;  %v7438_v16 = vpop.f32.mrf.mxu1 }
 0x160   : > { %9947 = vst [vmem:[#allocation18_spill] sm:$0xff] %v8981_v12  ;;  %v2680_v13 = vadd.f32 %v7363_v5, %v8879_v51  ;;  %v7439_v18 = vadd.f32 %v7438_v16, %v7437_v9 }
 0x161   : > { %v7365_v17 = vpop.f32.mrf.mxu0  ;;  %v7440_v22 = vpop.f32.mrf.mxu1 }
 0x162   : > { %v7366_v19 = vadd.f32 %v7365_v17, %v7364_v10  ;;  %v8986_v26 = vadd.f32 %v7439_v18, %v2680_v13 }
 0x163   : > { %v7459_v24 = vpop.f32.mrf.mxu0  ;;  %v7441_v29 = vpop.f32.mrf.mxu1 }
 0x164   : > { %9948 = vst [vmem:[#allocation19_spill] sm:$0xff] %v8986_v26  ;;  %v2683_v28 = vadd.f32 %v7366_v19, %v8879_v51  ;;  %v7442_v33 = vadd.f32 %v7441_v29, %v7440_v22 }
 0x165   : > { %v7460_v30 = vpop.f32.mrf.mxu0  ;;  %v8991_v37 = vpop.f32.mrf.mxu1 }
 0x166   : > { %v7461_v34 = vadd.f32 %v7460_v30, %v7459_v24  ;;  %v8993_v40 = vadd.f32 %v7442_v33, %v2683_v28 }
 0x167   : > { %v7462_v38 = vpop.f32.mrf.mxu0  ;;  %v8998_v43 = vpop.f32.mrf.mxu1 }
 0x168   : > { %9949 = vst [vmem:[#allocation20_spill] sm:$0xff] %v8993_v40  ;;  %v8996_v41 = vadd.f32 %v7461_v34, %v8882_v63 }
 0x169   : > { %v7463_v51 = vpop.f32.mrf.mxu0  ;;  %v9000_v45 = vpop.f32.mrf.mxu1 }
 0x16a   : > { %v7464_v44 = vadd.f32 %v7463_v51, %v7462_v38 }
 0x16b   : > { %v7465_v46 = vpop.f32.mrf.mxu0  ;;  %v9005_v2 = vpop.f32.mrf.mxu1 }
 0x16c   : > { %v9003_v48 = vadd.f32 %v7464_v44, %v8885_v7 }
 0x16d   : > { %v7466_v50 = vpop.f32.mrf.mxu0  ;;  %v9007_v53 = vpop.f32.mrf.mxu1 }
 0x16e   : > { %v7467_v52 = vadd.f32 %v7466_v50, %v7465_v46 }
 0x16f   : > { %v7468_v54 = vpop.f32.mrf.mxu0  ;;  %v9012_v55 = vpop.f32.mrf.mxu1 }
 0x170   : > { %v9010_v63 = vadd.f32 %v7467_v52, %v8888_v15 }
 0x171   : > { %v7469_v56 = vpop.f32.mrf.mxu0  ;;  %v9014_v61 = vpop.f32.mrf.mxu1 }
 0x172   : > { %v7470_v60 = vadd.f32 %v7469_v56, %v7468_v54 }
 0x173   : > { %v7471_v62 = vpop.f32.mrf.mxu0  ;;  %v9019_v1 = vpop.f32.mrf.mxu1 }
 0x174   : > { %v9017_v7 = vadd.f32 %v7470_v60, %v8891_v23 }
 0x175   : > { %v7472_v3 = vpop.f32.mrf.mxu0  ;;  %v9021_v5 = vpop.f32.mrf.mxu1 }
 0x176   : > { %v7473_v4 = vadd.f32 %v7472_v3, %v7471_v62 }
 0x177   : > { %v7474_v6 = vpop.f32.mrf.mxu0  ;;  %v9026_v9 = vpop.f32.mrf.mxu1 }
 0x178   : > { %v9024_v15 = vadd.f32 %v7473_v4, %v8894_v31 }
 0x179   : > { %v7475_v10 = vpop.f32.mrf.mxu0  ;;  %v9028_v13 = vpop.f32.mrf.mxu1 }
 0x17a   : > { %v7476_v11 = vadd.f32 %v7475_v10, %v7474_v6 }
 0x17b   : > { %v7477_v16 = vpop.f32.mrf.mxu0  ;;  %v7551_v17 = vpop.f32.mrf.mxu1 }
 0x17c   : > { %v9031_v23 = vadd.f32 %v7476_v11, %v8897_v39 }
 0x17d   : > { %v7478_v18 = vpop.f32.mrf.mxu0  ;;  %v7553_v19 = vpop.f32.mrf.mxu1 }
 0x17e   : > { %9950 = vst [vmem:[#allocation21_spill] sm:$0xff] %v9031_v23 }
 0x17f   : > { %v7480_v20 = vpop.f32.mrf.mxu0  ;;  %v7554_v22 = vpop.f32.mrf.mxu1 }
 0x181   : > { %v7481_v24 = vpop.f32.mrf.mxu0  ;;  %v7556_v25 = vpop.f32.mrf.mxu1 }
 0x183   : > { %v7483_v28 = vpop.f32.mrf.mxu0  ;;  %v7557_v31 = vpop.f32.mrf.mxu1 }
 0x185   : > { %v7484_v29 = vpop.f32.mrf.mxu0  ;;  %v7559_v30 = vpop.f32.mrf.mxu1 }
 0x187   : > { %v7486_v32 = vpop.f32.mrf.mxu0  ;;  %v7560_v33 = vpop.f32.mrf.mxu1 }
 0x189   : > { %v7487_v34 = vpop.f32.mrf.mxu0  ;;  %v7562_v38 = vpop.f32.mrf.mxu1 }
 0x18a   : > { %v7488_v36 = vadd.f32 %v7487_v34, %v7486_v32 }
 0x18b   : > { %v7489_v51 = vpop.f32.mrf.mxu0  ;;  %v7563_v44 = vpop.f32.mrf.mxu1 }
 0x18c   : > { %v9034_v39 = vadd.f32 %v7488_v36, %v8929_v21 }
 0x18d   : > { %v7490_v46 = vpop.f32.mrf.mxu0  ;;  %v7565_v50 = vpop.f32.mrf.mxu1 }
 0x18e   : > { %9951 = vst [vmem:[#allocation22_spill] sm:$0xff] %v9034_v39  ;;  %v7491_v49 = vadd.f32 %v7490_v46, %v7489_v51 }
 0x18f   : > { %v7492_v52 = vpop.f32.mrf.mxu0  ;;  %v7566_v54 = vpop.f32.mrf.mxu1 }
 0x191   : > { %v7493_v56 = vpop.f32.mrf.mxu0  ;;  %v9036_v60 = vpop.f32.mrf.mxu1 }
 0x192   : > { %9952 = vst [vmem:[#allocation23_spill] sm:$0xff] %v9036_v60  ;;  %v7485_v60 = vadd.f32 %v7484_v29, %v7483_v28  ;;  %v7564_v28 = vadd.f32 %v7563_v44, %v7562_v38  ;;  %v7567_v29 = vadd.f32 %v7566_v54, %v7565_v50  ;;  %v7494_v51 = vadd.f32 %v7493_v56, %v7492_v52 }
 0x193   : > { %v7495_v62 = vpop.f32.mrf.mxu0  ;;  %v9038_v3 = vpop.f32.mrf.mxu1 }
 0x194   : > { %9953 = vst [vmem:[#allocation24_spill] sm:$0xff] %v9038_v3  ;;  %v7482_v3 = vadd.f32 %v7481_v24, %v7480_v20  ;;  %v7555_v24 = vadd.f32 %v7554_v22, %v7553_v19 }
 0x195   : > { %v7496_v4 = vpop.f32.mrf.mxu0  ;;  %v9040_v6 = vpop.f32.mrf.mxu1 }
 0x196   : > { %9954 = vst [vmem:[#allocation25_spill] sm:$0xff] %v9040_v6 }
 0x197   : > { %v7498_v10 = vpop.f32.mrf.mxu0  ;;  %v9042_v11 = vpop.f32.mrf.mxu1 }
 0x198   : > { %9955 = vst [vmem:[#allocation26_spill] sm:$0xff] %v9042_v11  ;;  %v7537_v11 = vadd.f32 %v8998_v43, %v8991_v37 }
 0x199   : > { %v7499_v32 = vpop.f32.mrf.mxu0  ;;  %v9044_v21 = vpop.f32.mrf.mxu1 }
 0x19a   : > { %9956 = vst [vmem:[#allocation27_spill] sm:$0xff] %v9044_v21  ;;  %v2947_v43 = vadd.f32 %v7537_v11, %v8996_v41  ;;  %v2874_v41 = vadd.f32 %v7491_v49, %v8936_v35  ;;  %v7500_v19 = vadd.f32 %v7499_v32, %v7498_v10  ;;  %v9973_v10 = vld [vmem:[#allocation15_spill] sm:$0xff] }
 0x19b   : > { %v7501_v34 = vpop.f32.mrf.mxu0  ;;  %v9046_v36 = vpop.f32.mrf.mxu1  ;;  %v9966_v44 = vld [vmem:[#allocation24_spill] sm:$0xff] }
 0x19c   : > { %9957 = vst [vmem:[#allocation28_spill] sm:$0xff] %v9046_v36  ;;  %v7479_v36 = vadd.f32 %v7478_v18, %v7477_v16  ;;  %v7549_v16 = vadd.f32 %v9026_v9, %v9021_v5  ;;  %v7552_v18 = vadd.f32 %v7551_v17, %v9028_v13  ;;  %v7497_v5 = vadd.f32 %v7496_v4, %v7495_v62  ;;  %v9970_v62 = vld [vmem:[#allocation14_spill] sm:$0xff] }
 0x19d   : > { %v7502_v57 = vpop.f32.mrf.mxu0  ;;  %v9048_v40 = vpop.f32.mrf.mxu1  ;;  %v9968_v50 = vld [vmem:[#allocation25_spill] sm:$0xff] }
 0x19e   : > { %9958 = vst [vmem:[#allocation29_spill] sm:$0xff] %v9048_v40  ;;  %v2858_v20 = vadd.f32 %v7479_v36, %v8900_v47  ;;  %v9082_v22 = vadd.f32 %v7549_v16, %v9024_v15  ;;  %v9965_v15 = vld [vmem:[#allocation23_spill] sm:$0xff] }
 0x19f   : > { %v7504_v12 = vpop.f32.mrf.mxu0  ;;  %v9050_v26 = vpop.f32.mrf.mxu1  ;;  %v7570_v46 = vadd.f32 %v9966_v44, %v9965_v15  ;;  %v9969_v52 = vld [vmem:[#allocation26_spill] sm:$0xff] }
 0x1a0   : > { %9959 = vst [vmem:[#allocation30_spill] sm:$0xff] %v9050_v26  ;;  %v7540_v26 = vadd.f32 %v9005_v2, %v9000_v45  ;;  %v2861_v45 = vadd.f32 %v7482_v3, %v8909_v58  ;;  %v7558_v2 = vadd.f32 %v7557_v31, %v7556_v25  ;;  %v9962_v25 = vld [vmem:[#allocation21_spill] sm:$0xff]  ;;  %v7573_v54 = vadd.f32 %v9969_v52, %v9968_v50 }
 0x1a1   : > { %v7505_v59 = vpop.f32.mrf.mxu0  ;;  %v9052_v42 = vpop.f32.mrf.mxu1  ;;  %v9085_v31 = vadd.f32 %v7552_v18, %v9962_v25  ;;  %v2885_v3 = vadd.f32 %v7500_v19, %v9970_v62  ;;  %v9976_v18 = vld [vmem:[#allocation16_spill] sm:$0xff] }
 0x1a2   : > { %9960 = vst [vmem:[#allocation31_spill] sm:$0xff] %v9052_v42  ;;  %v7543_v42 = vadd.f32 %v9012_v55, %v9007_v53  ;;  %v2866_v53 = vadd.f32 %v7485_v60, %v8922_v8  ;;  %v7561_v55 = vadd.f32 %v7560_v33, %v7559_v30  ;;  %v2950_v58 = vadd.f32 %v7540_v26, %v9003_v48 }
 0x1a3   : > { %v7507_v27 = vpop.f32.mrf.mxu0  ;;  %v9054_v14 = vpop.f32.mrf.mxu1  ;;  %v7503_v8 = vadd.f32 %v7502_v57, %v7501_v34  ;;  %v7506_v35 = vadd.f32 %v7505_v59, %v7504_v12  ;;  %v2971_v30 = vadd.f32 %v7555_v24, %v2858_v20  ;;  %v9087_v33 = vadd.f32 %v7558_v2, %v2861_v45  ;;  %v9964_v57 = vld [vmem:[#allocation22_spill] sm:$0xff]  ;;  %v9967_v59 = vld [vmem:[#allocation13_spill] sm:$0xff]  ;;  %v9972_v4 = vld [vmem:[#allocation28_spill] sm:$0xff] }
 0x1a4   : > { %9961 = vst [vmem:[#allocation32_spill] sm:$0xff] %v9054_v14  ;;  %v7546_v14 = vadd.f32 %v9019_v1, %v9014_v61  ;;  %v2955_v47 = vadd.f32 %v7543_v42, %v9010_v63  ;;  %v9089_v38 = vadd.f32 %v7561_v55, %v2866_v53  ;;  %v9963_v42 = vld [vmem:[#allocation12_spill] sm:$0xff]  ;;  %v9092_v26 = vadd.f32 %v7567_v29, %v2874_v41 }
 0x1a5   : > { %v7508_v6 = vpop.f32.mrf.mxu0  ;;  %v9058_v21 = vpop.f32.mrf.mxu1  ;;  %v2877_v63 = vadd.f32 %v7494_v51, %v9963_v42  ;;  %v9095_v48 = vadd.f32 %v7564_v28, %v9964_v57  ;;  %v2882_v12 = vadd.f32 %v7497_v5, %v9967_v59  ;;  %v2890_v11 = vadd.f32 %v7503_v8, %v9973_v10  ;;  %v9974_v34 = vld [vmem:[#allocation29_spill] sm:$0xff]  ;;  %v9980_v5 = vld [vmem:[#allocation19_spill] sm:$0xff] }
 0x1a6   : > { %v2958_v17 = vadd.f32 %v7546_v14, %v9017_v7  ;;  %v7509_v14 = vadd.f32 %v7508_v6, %v7507_v27  ;;  %v9971_v27 = vld [vmem:[#allocation27_spill] sm:$0xff]  ;;  %v2893_v20 = vadd.f32 %v7506_v35, %v9976_v18 }
 0x1a7   : > { %v7510_v0 = vpop.f32.mrf.mxu0  ;;  %v7584_v40 = vpop.f32.mrf.mxu1  ;;  %v7576_v6 = vadd.f32 %v9972_v4, %v9971_v27  ;;  %v9975_v36 = vld [vmem:[#allocation30_spill] sm:$0xff]  ;;  %v9114_v42 = vadd.f32 %v7570_v46, %v2877_v63  ;;  %v9982_v46 = vld [vmem:[#allocation20_spill] sm:$0xff] }
 0x1a8   : > { %v7579_v16 = vadd.f32 %v9975_v36, %v9974_v34  ;;  %v7585_v28 = vadd.f32 %v7584_v40, %v9058_v21  ;;  %v3487_v36 = vld [vmem:[#allocation4] sm:$0xf] }
 0x1a9   : > { %v7511_v39 = vpop.f32.mrf.mxu0  ;;  %v9066_v23 = vpop.f32.mrf.mxu1  ;;  %v9977_v24 = vld [vmem:[#allocation31_spill] sm:$0xff]  ;;  %v9125_v44 = vadd.f32 %v7576_v6, %v2885_v3 }
 0x1aa   : > { %v7512_v53 = vadd.f32 %v7511_v39, %v7510_v0  ;;  %v9116_v0 = vadd.f32 %v7573_v54, %v2882_v12  ;;  %v9981_v39 = vld [vmem:[#allocation18_spill] sm:$0xff]  ;;  %v9121_v21 = vadd.f32 %v7579_v16, %v2890_v11 }
 0x1ab   : > { %v7513_v37 = vpop.f32.mrf.mxu0  ;;  %v9075_v61 = vpop.f32.mrf.mxu1  ;;  %v9978_v45 = vld [vmem:[#allocation32_spill] sm:$0xff] }
 0x1ac   : > { %v7582_v2 = vadd.f32 %v9978_v45, %v9977_v24 }
 0x1ad   : > { %v7514_v1 = vpop.f32.mrf.mxu0  ;;  %v7589_v9 = vpop.f32.mrf.mxu1 }
 0x1ae   : > { %v7515_v56 = vadd.f32 %v7514_v1, %v7513_v37  ;;  %v9979_v37 = vld [vmem:[#allocation17_spill] sm:$0xff] }
 0x1af   : > { %v7516_v13 = vpop.f32.mrf.mxu0  ;;  %v7590_v7 = vpop.f32.mrf.mxu1  ;;  %v2898_v1 = vadd.f32 %v7509_v14, %v9979_v37  ;;  %v9119_v14 = vadd.f32 %v7512_v53, %v9981_v39 }
 0x1b0   : > { %v7591_v19 = vadd.f32 %v7590_v7, %v7589_v9 }
 0x1b1   : > { %v7517_v49 = vpop.f32.mrf.mxu0  ;;  %v7592_v41 = vpop.f32.mrf.mxu1  ;;  %v9127_v7 = vadd.f32 %v7585_v28, %v2898_v1  ;;  %v3498_v1 = vld [vmem:[#allocation4 + $0x14] sm:$0x1] }
 0x1b2   : > { %v7518_v8 = vadd.f32 %v7517_v49, %v7516_v13 }
 0x1b3   : > { %v7903_v60 = vpop.f32.mrf.mxu0  ;;  %v7593_v9 = vpop.f32.mrf.mxu1 }
 0x1b4   : > { %v3068_v32 = vadd.f32 %v7903_v60, %v2955_v47  ;;  %v2906_v47 = vadd.f32 %v7515_v56, %v9980_v5  ;;  %v9134_v59 = vadd.f32 %v7518_v8, %v9982_v46  ;;  %v9138_v3 = vadd.f32 %v7593_v9, %v7592_v41 }
 0x1b5   : > { %v3059_v55 = vpop.f32.mrf.mxu0 }
 0x1b6   : > { %v3140_v29 = vmax.f32 %v3068_v32, 0.0  ;;  %v3060_v51 = vadd.f32 %v3059_v55, %v2947_v43  ;;  %v9123_v43 = vadd.f32 %v7582_v2, %v2893_v20  ;;  %v9136_v52 = vadd.f32 %v7591_v19, %v2906_v47 }
 0x1b7   : > { %v7904_v25 = vpop.f32.mrf.mxu0 }
 0x1b8   : > { %v7272_v35 = vpack.c.bf16 %v3140_v29, %v3140_v29  ;;  %v3138_v57 = vmax.f32 %v3060_v51, 0.0  ;;  %v3071_v15 = vadd.f32 %v7904_v25, %v2958_v17  ;;  %v9131_v17 = vadd.f32 %v9075_v61, %v9066_v23  ;;  %v3494_v23 = vld [vmem:[#allocation4 + $0xc] sm:$0xf] }
 0x1b9   : > { %v3062_v40 = vpop.f32.mrf.mxu0 }
 0x1ba   : > { %v3303_v13 = vshrl.u32 %v7272_v35, 16  ;;  %v7270_v49 = vpack.c.bf16 %v3138_v57, %v3138_v57  ;;  %v3141_v63 = vmax.f32 %v3071_v15, 0.0  ;;  %v3063_v12 = vadd.f32 %v3062_v40, %v2950_v58 }
 0x1bb   : > { %v7907_v50 = vpop.f32.mrf.mxu0  ;;  %v3306_v56 = vshll.u32 %v7272_v35, 16 }
 0x1bc   : > { %v3305_v54 = vrot.slane %v3303_v13, 7  ;;  %v3286_v60 = vshrl.u32 %v7270_v49, 16  ;;  %v7273_v62 = vpack.c.bf16 %v3141_v63, %v3141_v63  ;;  %v3289_v61 = vshll.u32 %v7270_v49, 16  ;;  %v3491_v49 = vld [vmem:[#allocation4 + $0x8] sm:$0x1] }
 0x1bd   : > { %v3139_v4 = vmax.f32 %v3063_v12, 0.0  ;;  %v3084_v6 = vadd.f32 %v7907_v50, %v2971_v30  ;;  %v3075_v58 = vpop.f32.mrf.mxu0 }
 0x1be   : > { %v3308_v10 = vor.u32 %v3306_v56, %v3305_v54  ;;  %v3309_v11 = vrot.slane %v3305_v54, 4  ;;  %v3288_v32 = vrot.slane %v3286_v60, 7  ;;  %v3311_v34 = vshrl.u32 %v7273_v62, 16  ;;  %v3508_v60 = vld [vmem:[#allocation4 + $0x24] sm:$0xf] }
 0x1bf   : > { %v3314_v16 = vshll.u32 %v7273_v62, 16  ;;  %v7271_v18 = vpack.c.bf16 %v3139_v4, %v3139_v4  ;;  %v3144_v20 = vmax.f32 %v3084_v6, 0.0  ;;  %v3076_v24 = vadd.f32 %v3075_v58, %v9082_v22  ;;  %v7908_v45 = vpop.f32.mrf.mxu0 }
 0x1c0   : > { %v3495_v2 = vsel %vm9142_vm7, %v3308_v10, %v3494_v23  ;;  %v3291_v53 = vor.u32 %v3289_v61, %v3288_v32  ;;  %v3292_v55 = vrot.slane %v3288_v32, 4  ;;  %v3313_v37 = vrot.slane %v3311_v34, 7 }
 0x1c1   : > { %3496 = vst [vmem:[#allocation4 + $0xc] sm:$0xf] %v3495_v2  ;;  %v3294_v28 = vshrl.u32 %v7271_v18, 16  ;;  %v3297_v41 = vshll.u32 %v7271_v18, 16  ;;  %v7276_v29 = vpack.c.bf16 %v3144_v20, %v3144_v20  ;;  %v3142_v51 = vmax.f32 %v3076_v24, 0.0  ;;  %v3078_v22 = vpop.f32.mrf.mxu0 }
 0x1c2   : > { %v3488_v5 = vsel %vm9142_vm7, %v3291_v53, %v3487_v36  ;;  %v3316_v47 = vor.u32 %v3314_v16, %v3313_v37  ;;  %v3318_v19 = vrot.slane %v3313_v37, 4  ;;  %v3087_v8 = vadd.f32 %v7908_v45, %v9087_v33  ;;  %v3501_v20 = vld [vmem:[#allocation4 + $0x18] sm:$0xf] }
 0x1c3   : > { %3489 = vst [vmem:[#allocation4] sm:$0xf] %v3488_v5  ;;  %v3296_v25 = vrot.slane %v3294_v28, 7  ;;  %v3337_v35 = vshrl.u32 %v7276_v29, 16  ;;  %v3340_v57 = vshll.u32 %v7276_v29, 16  ;;  %v7274_v15 = vpack.c.bf16 %v3142_v51, %v3142_v51  ;;  %v7911_v39 = vpop.f32.mrf.mxu0 }
 0x1c4   : > { %v3317_v40 = vsel %vm9151_vm8, %v3309_v11, %v3316_v47  ;;  %v3499_v13 = vsel %vm8905_vm2, %v3318_v19, %v3498_v1  ;;  %v3145_v63 = vmax.f32 %v3087_v8, 0.0  ;;  %v3079_v46 = vadd.f32 %v3078_v22, %v9085_v31  ;;  %v3512_v28 = vld [vmem:[#allocation4 + $0x2c] sm:$0x1] }
 0x1c5   : > { %3497 = vst [vmem:[#allocation4 + $0x10] sm:$0xf] %v3317_v40  ;;  %3500 = vst [vmem:[#allocation4 + $0x14] sm:$0x1] %v3499_v13  ;;  %v3299_v12 = vor.u32 %v3297_v41, %v3296_v25  ;;  %v3301_v33 = vrot.slane %v3296_v25, 4  ;;  %v3339_v50 = vrot.slane %v3337_v35, 7  ;;  %v3091_v56 = vpop.f32.mrf.mxu0  ;;  %v3100_v4 = vadd.f32 %v7911_v39, %v9092_v26 }
 0x1c6   : > { %v3320_v54 = vshrl.u32 %v7274_v15, 16  ;;  %v3323_v62 = vshll.u32 %v7274_v15, 16  ;;  %v7277_v23 = vpack.c.bf16 %v3145_v63, %v3145_v63  ;;  %v3143_v61 = vmax.f32 %v3079_v46, 0.0 }
 0x1c7   : > { %v3300_v6 = vsel %vm9151_vm8, %v3292_v55, %v3299_v12  ;;  %v3492_v58 = vsel %vm8905_vm2, %v3301_v33, %v3491_v49  ;;  %v3342_v31 = vor.u32 %v3340_v57, %v3339_v50  ;;  %v3343_v10 = vrot.slane %v3339_v50, 4  ;;  %v7912_v11 = vpop.f32.mrf.mxu0 }
 0x1c8   : > { %3490 = vst [vmem:[#allocation4 + $0x4] sm:$0xf] %v3300_v6  ;;  %3493 = vst [vmem:[#allocation4 + $0x8] sm:$0x1] %v3492_v58  ;;  %v3322_v32 = vrot.slane %v3320_v54, 7  ;;  %v3345_v34 = vshrl.u32 %v7277_v23, 16  ;;  %v7275_v16 = vpack.c.bf16 %v3143_v61, %v3143_v61  ;;  %v3092_v24 = vadd.f32 %v3091_v56, %v9089_v38 }
 0x1c9   : > { %v3348_v36 = vshll.u32 %v7277_v23, 16  ;;  %v3509_v18 = vsel %vm9142_vm7, %v3342_v31, %v3508_v60  ;;  %v3148_v26 = vmax.f32 %v3100_v4, 0.0  ;;  %v3103_v45 = vadd.f32 %v7912_v11, %v9114_v42  ;;  %v3094_v2 = vpop.f32.mrf.mxu0  ;;  %v3505_v42 = vld [vmem:[#allocation4 + $0x20] sm:$0x1]  ;;  %v3515_v11 = vld [vmem:[#allocation4 + $0x30] sm:$0xf] }
 0x1ca   : > { %3510 = vst [vmem:[#allocation4 + $0x24] sm:$0xf] %v3509_v18  ;;  %v3325_v53 = vor.u32 %v3323_v62, %v3322_v32  ;;  %v3326_v55 = vrot.slane %v3322_v32, 4  ;;  %v3347_v37 = vrot.slane %v3345_v34, 7  ;;  %v3328_v1 = vshrl.u32 %v7275_v16, 16 }
 0x1cb   : > { %v3331_v41 = vshll.u32 %v7275_v16, 16  ;;  %v7280_v29 = vpack.c.bf16 %v3148_v26, %v3148_v26  ;;  %v3146_v51 = vmax.f32 %v3092_v24, 0.0  ;;  %v3149_v22 = vmax.f32 %v3103_v45, 0.0  ;;  %v7915_v5 = vpop.f32.mrf.mxu0  ;;  %v3522_v62 = vld [vmem:[#allocation4 + $0x3c] sm:$0xf] }
 0x1cc   : > { %v3502_v47 = vsel %vm9142_vm7, %v3325_v53, %v3501_v20  ;;  %v3350_v19 = vor.u32 %v3348_v36, %v3347_v37  ;;  %v3352_v8 = vrot.slane %v3347_v37, 4  ;;  %v3330_v38 = vrot.slane %v3328_v1, 7  ;;  %v3526_v24 = vld [vmem:[#allocation4 + $0x44] sm:$0x1] }
 0x1cd   : > { %3503 = vst [vmem:[#allocation4 + $0x18] sm:$0xf] %v3502_v47  ;;  %v3371_v25 = vshrl.u32 %v7280_v29, 16  ;;  %v3374_v35 = vshll.u32 %v7280_v29, 16  ;;  %v7278_v57 = vpack.c.bf16 %v3146_v51, %v3146_v51  ;;  %v7281_v15 = vpack.c.bf16 %v3149_v22, %v3149_v22  ;;  %v3107_v39 = vpop.f32.mrf.mxu0 }
 0x1ce   : > { %v3351_v40 = vsel %vm9151_vm8, %v3343_v10, %v3350_v19  ;;  %v3513_v13 = vsel %vm8905_vm2, %v3352_v8, %v3512_v28  ;;  %v3333_v49 = vor.u32 %v3331_v41, %v3330_v38  ;;  %v3335_v63 = vrot.slane %v3330_v38, 4 }
 0x1cf   : > { %3511 = vst [vmem:[#allocation4 + $0x28] sm:$0xf] %v3351_v40  ;;  %3514 = vst [vmem:[#allocation4 + $0x2c] sm:$0x1] %v3513_v13  ;;  %v3373_v46 = vrot.slane %v3371_v25, 7  ;;  %v3354_v12 = vshrl.u32 %v7278_v57, 16  ;;  %v7916_v54 = vpop.f32.mrf.mxu0  ;;  %v3095_v61 = vadd.f32 %v3094_v2, %v9095_v48  ;;  %v3116_v34 = vadd.f32 %v7915_v5, %v9121_v21 }
 0x1d0   : > { %v3357_v33 = vshll.u32 %v7278_v57, 16  ;;  %v3379_v50 = vshrl.u32 %v7281_v15, 16  ;;  %v3334_v56 = vsel %vm9151_vm8, %v3326_v55, %v3333_v49  ;;  %v3506_v60 = vsel %vm8905_vm2, %v3335_v63, %v3505_v42 }
 0x1d1   : > { %v3382_v23 = vshll.u32 %v7281_v15, 16  ;;  %3504 = vst [vmem:[#allocation4 + $0x1c] sm:$0xf] %v3334_v56  ;;  %3507 = vst [vmem:[#allocation4 + $0x20] sm:$0x1] %v3506_v60  ;;  %v3376_v4 = vor.u32 %v3374_v35, %v3373_v46  ;;  %v3377_v6 = vrot.slane %v3373_v46, 4  ;;  %v3110_v10 = vpop.f32.mrf.mxu0  ;;  %v3108_v36 = vadd.f32 %v3107_v39, %v9116_v0 }
 0x1d2   : > { %v3356_v58 = vrot.slane %v3354_v12, 7  ;;  %v3381_v31 = vrot.slane %v3379_v50, 7  ;;  %v3147_v32 = vmax.f32 %v3095_v61, 0.0  ;;  %v3119_v16 = vadd.f32 %v7916_v54, %v9123_v43  ;;  %v3519_v35 = vld [vmem:[#allocation4 + $0x38] sm:$0x1] }
 0x1d3   : > { %v3523_v18 = vsel %vm9142_vm7, %v3376_v4, %v3522_v62  ;;  %v7919_v45 = vpop.f32.mrf.mxu0  ;;  %v3152_v55 = vmax.f32 %v3116_v34, 0.0  ;;  %v3150_v37 = vmax.f32 %v3108_v36, 0.0  ;;  %v3111_v1 = vadd.f32 %v3110_v10, %v9125_v44  ;;  %v3540_v61 = vld [vmem:[#allocation4 + $0x5c] sm:$0x1] }
 0x1d4   : > { %v3359_v20 = vor.u32 %v3357_v33, %v3356_v58  ;;  %v3360_v48 = vrot.slane %v3356_v58, 4  ;;  %v3384_v26 = vor.u32 %v3382_v23, %v3381_v31  ;;  %3524 = vst [vmem:[#allocation4 + $0x3c] sm:$0xf] %v3523_v18  ;;  %v3386_v2 = vrot.slane %v3381_v31, 4  ;;  %v3536_v33 = vld [vmem:[#allocation4 + $0x54] sm:$0xf] }
 0x1d5   : > { %v7279_v53 = vpack.c.bf16 %v3147_v32, %v3147_v32  ;;  %v3153_v43 = vmax.f32 %v3119_v16, 0.0  ;;  %v3123_v28 = vpop.f32.mrf.mxu0  ;;  %v7284_v22 = vpack.c.bf16 %v3152_v55, %v3152_v55  ;;  %v7282_v5 = vpack.c.bf16 %v3150_v37, %v3150_v37  ;;  %v3529_v23 = vld [vmem:[#allocation4 + $0x48] sm:$0xf] }
 0x1d6   : > { %v3516_v21 = vsel %vm9142_vm7, %v3359_v20, %v3515_v11  ;;  %v3385_v0 = vsel %vm9151_vm8, %v3377_v6, %v3384_v26  ;;  %v3527_v41 = vsel %vm8905_vm2, %v3386_v2, %v3526_v24  ;;  %v3151_v19 = vmax.f32 %v3111_v1, 0.0  ;;  %v3550_v1 = vld [vmem:[#allocation4 + $0x6c] sm:$0xf] }
 0x1d7   : > { %3517 = vst [vmem:[#allocation4 + $0x30] sm:$0xf] %v3516_v21  ;;  %3525 = vst [vmem:[#allocation4 + $0x40] sm:$0xf] %v3385_v0  ;;  %v3362_v29 = vshrl.u32 %v7279_v53, 16  ;;  %v3365_v51 = vshll.u32 %v7279_v53, 16  ;;  %v7285_v47 = vpack.c.bf16 %v3153_v43, %v3153_v43  ;;  %v3132_v8 = vadd.f32 %v7919_v45, %v9136_v52  ;;  %v7920_v12 = vpop.f32.mrf.mxu0 }
 0x1d8   : > { %3528 = vst [vmem:[#allocation4 + $0x44] sm:$0x1] %v3527_v41  ;;  %v3405_v42 = vshrl.u32 %v7284_v22, 16  ;;  %v3408_v25 = vshll.u32 %v7284_v22, 16  ;;  %v3124_v44 = vadd.f32 %v3123_v28, %v9127_v7  ;;  %v3388_v57 = vshrl.u32 %v7282_v5, 16 }
 0x1d9   : > { %v3364_v38 = vrot.slane %v3362_v29, 7  ;;  %v3391_v15 = vshll.u32 %v7282_v5, 16  ;;  %v3413_v39 = vshrl.u32 %v7285_v47, 16  ;;  %v3416_v40 = vshll.u32 %v7285_v47, 16  ;;  %v3126_v16 = vpop.f32.mrf.mxu0  ;;  %v3543_v47 = vld [vmem:[#allocation4 + $0x60] sm:$0xf] }
 0x1da   : > { %v3407_v63 = vrot.slane %v3405_v42, 7  ;;  %v7283_v46 = vpack.c.bf16 %v3151_v19, %v3151_v19  ;;  %v3390_v50 = vrot.slane %v3388_v57, 7  ;;  %v3156_v56 = vmax.f32 %v3132_v8, 0.0 }
 0x1db   : > { %v3367_v13 = vor.u32 %v3365_v51, %v3364_v38  ;;  %v3369_v49 = vrot.slane %v3364_v38, 4  ;;  %v3415_v54 = vrot.slane %v3413_v39, 7  ;;  %v3154_v52 = vmax.f32 %v3124_v44, 0.0 }
 0x1dc   : > { %v3410_v62 = vor.u32 %v3408_v25, %v3407_v63  ;;  %v3014_v4 = vadd.f32 %v9131_v17, %v9119_v14  ;;  %v3411_v6 = vrot.slane %v3407_v63, 4  ;;  %v3393_v58 = vor.u32 %v3391_v15, %v3390_v50  ;;  %v3554_v63 = vld [vmem:[#allocation4 + $0x74] sm:$0x1] }
 0x1dd   : > { %v3368_v60 = vsel %vm9151_vm8, %v3360_v48, %v3367_v13  ;;  %v3520_v7 = vsel %vm8905_vm2, %v3369_v49, %v3519_v35  ;;  %v3418_v31 = vor.u32 %v3416_v40, %v3415_v54  ;;  %v3420_v10 = vrot.slane %v3415_v54, 4 }
 0x1de   : > { %3518 = vst [vmem:[#allocation4 + $0x34] sm:$0xf] %v3368_v60  ;;  %3521 = vst [vmem:[#allocation4 + $0x38] sm:$0x1] %v3520_v7  ;;  %v3537_v11 = vsel %vm9142_vm7, %v3410_v62, %v3536_v33  ;;  %v3396_v32 = vshrl.u32 %v7283_v46, 16  ;;  %v7288_v34 = vpack.c.bf16 %v3156_v56, %v3156_v56  ;;  %v3022_v36 = vadd.f32 %v9138_v3, %v9134_v59 }
 0x1df   : > { %3538 = vst [vmem:[#allocation4 + $0x54] sm:$0xf] %v3537_v11  ;;  %v3530_v18 = vsel %vm9142_vm7, %v3393_v58, %v3529_v23  ;;  %v3419_v14 = vsel %vm9151_vm8, %v3411_v6, %v3418_v31  ;;  %v3541_v17 = vsel %vm8905_vm2, %v3420_v10, %v3540_v61  ;;  %v7286_v20 = vpack.c.bf16 %v3154_v52, %v3154_v52  ;;  %v3533_v3 = vld [vmem:[#allocation4 + $0x50] sm:$0x1] }
 0x1e0   : > { %3531 = vst [vmem:[#allocation4 + $0x48] sm:$0xf] %v3530_v18  ;;  %3539 = vst [vmem:[#allocation4 + $0x58] sm:$0xf] %v3419_v14  ;;  %v3398_v48 = vrot.slane %v3396_v32, 7  ;;  %v3399_v26 = vshll.u32 %v7283_v46, 16  ;;  %v3135_v45 = vadd.f32 %v7920_v12, %v3022_v36  ;;  %v3127_v55 = vadd.f32 %v3126_v16, %v3014_v4 }
 0x1e1   : > { %3542 = vst [vmem:[#allocation4 + $0x5c] sm:$0x1] %v3541_v17  ;;  %v3439_v24 = vshrl.u32 %v7288_v34, 16  ;;  %v3394_v59 = vrot.slane %v3390_v50, 4  ;;  %v3442_v2 = vshll.u32 %v7288_v34, 16  ;;  %v3422_v53 = vshrl.u32 %v7286_v20, 16 }
 0x1e2   : > { %v3401_v37 = vor.u32 %v3399_v26, %v3398_v48  ;;  %v3403_v21 = vrot.slane %v3398_v48, 4  ;;  %v3157_v43 = vmax.f32 %v3135_v45, 0.0  ;;  %v3425_v41 = vshll.u32 %v7286_v20, 16  ;;  %v3547_v46 = vld [vmem:[#allocation4 + $0x68] sm:$0x1] }
 0x1e3   : > { %v3441_v0 = vrot.slane %v3439_v24, 7  ;;  %v3424_v28 = vrot.slane %v3422_v53, 7  ;;  %v3155_v29 = vmax.f32 %v3127_v55, 0.0 }
 0x1e4   : > { %v3402_v51 = vsel %vm9151_vm8, %v3394_v59, %v3401_v37  ;;  %v3534_v22 = vsel %vm8905_vm2, %v3403_v21, %v3533_v3  ;;  %v7289_v8 = vpack.c.bf16 %v3157_v43, %v3157_v43 }
 0x1e5   : > { %v3444_v5 = vor.u32 %v3442_v2, %v3441_v0  ;;  %3532 = vst [vmem:[#allocation4 + $0x4c] sm:$0xf] %v3402_v51  ;;  %3535 = vst [vmem:[#allocation4 + $0x50] sm:$0x1] %v3534_v22  ;;  %v3427_v19 = vor.u32 %v3425_v41, %v3424_v28  ;;  %v7287_v38 = vpack.c.bf16 %v3155_v29, %v3155_v29  ;;  %v3445_v13 = vrot.slane %v3441_v0, 4 }
 0x1e6   : > { %v3447_v44 = vshrl.u32 %v7289_v8, 16  ;;  %v3450_v15 = vshll.u32 %v7289_v8, 16  ;;  %v3428_v49 = vrot.slane %v3424_v28, 4 }
 0x1e7   : > { %v3551_v42 = vsel %vm9142_vm7, %v3444_v5, %v3550_v1  ;;  %v3544_v25 = vsel %vm9142_vm7, %v3427_v19, %v3543_v47  ;;  %v3430_v35 = vshrl.u32 %v7287_v38, 16  ;;  %v3433_v40 = vshll.u32 %v7287_v38, 16 }
 0x1e8   : > { %3552 = vst [vmem:[#allocation4 + $0x6c] sm:$0xf] %v3551_v42  ;;  %3545 = vst [vmem:[#allocation4 + $0x60] sm:$0xf] %v3544_v25  ;;  %v3449_v57 = vrot.slane %v3447_v44, 7 }
 0x1e9   : > { %v3432_v39 = vrot.slane %v3430_v35, 7 }
 0x1ea   : > { %v3452_v12 = vor.u32 %v3450_v15, %v3449_v57  ;;  %v3454_v33 = vrot.slane %v3449_v57, 4  ;;  %3560 = sbr.rel (%p6911_p12) target bundleno = 498 (0x1f2), region = 77 }
 0x1eb   : > { %v3435_v50 = vor.u32 %v3433_v40, %v3432_v39  ;;  %v3437_v54 = vrot.slane %v3432_v39, 4 }
 0x1ec   : > { %v3453_v56 = vsel %vm9151_vm8, %v3445_v13, %v3452_v12  ;;  %v3555_v27 = vsel %vm8905_vm2, %v3454_v33, %v3554_v63 }
 0x1ed   : > { %v3436_v52 = vsel %vm9151_vm8, %v3428_v49, %v3435_v50  ;;  %v3548_v60 = vsel %vm8905_vm2, %v3437_v54, %v3547_v46  ;;  %3553 = vst [vmem:[#allocation4 + $0x70] sm:$0xf] %v3453_v56  ;;  %3556 = vst [vmem:[#allocation4 + $0x74] sm:$0x1] %v3555_v27 }
 0x1ee   : > { %3546 = vst [vmem:[#allocation4 + $0x64] sm:$0xf] %v3436_v52  ;;  %3549 = vst [vmem:[#allocation4 + $0x68] sm:$0x1] %v3548_v60 }
 0x1ef   : > { %v8495_v7 = vmov 0  }
 0x1f0   : > { %3561 = vst [vmem:[#allocation4] sm:$0xf] %v8495_v7  ;;  %3562 = vst [vmem:[#allocation4 + $0x4] sm:$0xf] %v8495_v7 }
 0x1f1   : > { %3563 = vst [vmem:[#allocation4 + $0x8] sm:$0x1] %v8495_v7 }
 0x1f2 PF: > { %p6912_p13 = scmp.ne.s32.totalorder %s8477_s21, 1 }
 0x1f4   : > { %3567 = sbr.rel (%p6912_p13) target bundleno = 508 (0x1fc), region = 81 }
 0x1f9   : > { %v8496_v30 = vmov 0  }
 0x1fa   : > { %3569 = vst [vmem:[#allocation4 + $0x6c] sm:$0xf] %v8496_v30  ;;  %3570 = vst [vmem:[#allocation4 + $0x70] sm:$0xf] %v8496_v30 }
 0x1fb   : > { %3571 = vst [vmem:[#allocation4 + $0x74] sm:$0x1] %v8496_v30 }
 0x1fc PF: > { %v8230_v9 = vld [vmem:[%s9929_s3 + $0x78] sm:$0xff]   ;;  %v8234_v4 = vld [vmem:[%s9929_s3 + $0x70] sm:$0xff]   ;;  %v8238_v10 = vld [vmem:[%s9929_s3 + $0x68] sm:$0xff]   ;;  %vm3903_vm9 = vcmask 1042432   ;;  %vm3904_vm10 = vcmask 1046532   ;;  %s7290_s10 = sshll.u32 %s8477_s21, 4 }
 0x1fd   : > { %v8231_v62 = vld [vmem:[%s9929_s3 + $0xf8] sm:$0xff]   ;;  %7613 = vmatprep.subr.bf16.mxu1 %v8230_v9  ;;  %v8235_v6 = vld [vmem:[%s9929_s3 + $0xf0] sm:$0xff]   ;;  %v8239_v11 = vld [vmem:[%s9929_s3 + $0xe8] sm:$0xff]   ;;  %vm3628_vm11 = vsmask.f32 3328  ;;  %s7085_s13 = sshll.u32 %s8481_s22, 5 }
 0x1fe   : > { %v8232_v23 = vld [vmem:[%s9929_s3 + $0x38] sm:$0xff]   ;;  %7677 = vmatprep.subr.bf16.mxu0 %v8231_v62  ;;  %v8236_v58 = vld [vmem:[%s9929_s3 + $0x30] sm:$0xff]   ;;  %v8240_v32 = vld [vmem:[%s9929_s3 + $0x28] sm:$0xff]   ;;  %vm3629_vm12 = vsmask.f32 7440  ;;  %s6438_s21 = sadd.s32 %s7290_s10, %s7085_s13  ;;  %s6441_s22 = sshll.u32 %s8650_s30, 4  ;;  %s9864_s22 = int_to_ptr.vmem [resolvable:$true] %s6441_s22 }
 0x1ff   : > { %v8233_v61 = vld [vmem:[%s9929_s3 + $0xb8] sm:$0xff]   ;;  %7614 = vmatpush3.bf16.msra.mxu1 %v8232_v23  ;;  %v8237_v31 = vld [vmem:[%s9929_s3 + $0xb0] sm:$0xff]   ;;  %v8241_v34 = vld [vmem:[%s9929_s3 + $0xa8] sm:$0xff]   ;;  %s7086_s15 = sshll.u32 %s6438_s21, 7  ;;  %s9875_s26 = scalar_lea.sflag [#allocation7], %s188_s12 }
 0x200   : > { %7678 = vmatpush3.bf16.msra.mxu0 %v8233_v61  ;;  %7615 = vmatprep.subr.bf16.mxu1 %v8234_v4  ;;  %v8242_v36 = vld [vmem:[%s9929_s3 + $0x60] sm:$0xff]   ;;  %v8246_v17 = vld [vmem:[%s9929_s3 + $0x58] sm:$0xff]   ;;  %v8250_v24 = vld [vmem:[%s9929_s3 + $0x50] sm:$0xff]   ;;  %s9870_s14 = scalar_lea.hbm %s9931_s5, %s7086_s15  ;;  %s8399_s27 = scalar_lea.vmem %s9864_s22, 2048 }
 0x201   : > { %7679 = vmatprep.subr.bf16.mxu0 %v8235_v6  ;;  %v8243_v16 = vld [vmem:[%s9929_s3 + $0xe0] sm:$0xff]   ;;  %v8247_v20 = vld [vmem:[%s9929_s3 + $0xd8] sm:$0xff]   ;;  %v8251_v45 = vld [vmem:[%s9929_s3 + $0xd0] sm:$0xff]   ;;  %p8400_p0 = scmp.ne.s32.totalorder %s9864_s22, %s8399_s27  ;;  %s8497_s8 = smov [#allocation6]  }
 0x202   : > { %v8244_v18 = vld [vmem:[%s9929_s3 + $0x20] sm:$0xff]   ;;  %v8248_v48 = vld [vmem:[%s9929_s3 + $0x18] sm:$0xff]   ;;  %v8252_v59 = vld [vmem:[%s9929_s3 + $0x10] sm:$0xff]   ;;  %s8403_s9 = sshll.u32 %s8497_s8, 4  ;;  %s8404_s9 = int_to_ptr.vmem [resolvable:$false] %s8403_s9 }
 0x203   : > { %7616 = vmatpush3.bf16.msra.mxu1 %v8236_v58  ;;  %v8245_v14 = vld [vmem:[%s9929_s3 + $0xa0] sm:$0xff]   ;;  %v8249_v26 = vld [vmem:[%s9929_s3 + $0x98] sm:$0xff]   ;;  %v8253_v3 = vld [vmem:[%s9929_s3 + $0x90] sm:$0xff]   ;;  %p8401_p1 = pnand %p8400_p0, %p8581_p3  ;;  %s8405_s10 = scalar_lea.vmem %s8404_s9, 4096 }
 0x204   : > { %7680 = vmatpush3.bf16.msra.mxu0 %v8237_v31  ;;  %7617 = vmatprep.subr.bf16.mxu1 %v8238_v10  ;;  %v8254_v2 = vld [vmem:[%s9929_s3 + $0x48] sm:$0xff]   ;;  %v8258_v21 = vld [vmem:[%s9929_s3 + $0x40] sm:$0xff]   ;;  %v3572_v28 = vld [vmem:[#allocation4] sm:$0xf]  ;;  %p8406_p4 = scmp.lt.s32.totalorder %s9864_s22, %s8404_s9  ;;  %p8407_p5 = scmp.lt.s32.totalorder %s8405_s10, %s8399_s27 }
 0x205   : > { %7681 = vmatprep.subr.bf16.mxu0 %v8239_v11  ;;  %v8255_v53 = vld [vmem:[%s9929_s3 + $0xc8] sm:$0xff]   ;;  %v8259_v0 = vld [vmem:[%s9929_s3 + $0xc0] sm:$0xff]   ;;  %v3573_v41 = vld [vmem:[#allocation4 + $0x4] sm:$0xf]  ;;  %3588 = vst [vmem:[#allocation3] sm:$0xf] %v3572_v28  ;;  %p8402_p2 = pneg %p8401_p1 }
 0x206   : > { %v8256_v55 = vld [vmem:[%s9929_s3 + $0x8] sm:$0xff]   ;;  %v8260_v43 = vld [vmem:[%s9929_s3] sm:$0xff]   ;;  %v3604_v29 = vld [vmem:[#allocation4] sm:$0xf]  ;;  %3589 = vst [vmem:[#allocation3 + $0x24] sm:$0xf] %v3573_v41  ;;  %p8408_p6 = por %p8407_p5, %p8406_p4 }
 0x207   : > { %7618 = vmatpush3.bf16.msra.mxu1 %v8240_v32  ;;  %v8257_v37 = vld [vmem:[%s9929_s3 + $0x88] sm:$0xff]   ;;  %v8261_v1 = vld [vmem:[%s9929_s3 + $0x80] sm:$0xff]   ;;  %v3605_v51 = vld [vmem:[#allocation4 + $0x4] sm:$0xf]  ;;  %v3632_v5 = vshrl.u32 %v3604_v29, 16  ;;  %v3635_v47 = vshll.u32 %v3604_v29, 16 }
 0x208   : > { %7682 = vmatpush3.bf16.msra.mxu0 %v8241_v34  ;;  %7619 = vmatprep.subr.bf16.mxu1 %v8242_v36  ;;  %v3606_v22 = vld [vmem:[#allocation4 + $0x8] sm:$0x1]  ;;  %v3641_v19 = vshll.u32 %v3605_v51, 16  ;;  %v3645_v38 = vshrl.u32 %v3605_v51, 16  ;;  %v3855_v25 = vld [vmem:[#allocation4] sm:$0xe]  ;;  %vm9332_vm13 = vmor %vm3903_vm9, %vm3904_vm10  ;;  %p8409_p7 = pnand %p8408_p6, %p8402_p2 }
 0x209   : > { %7683 = vmatprep.subr.bf16.mxu0 %v8243_v16  ;;  %v8268_v8 = vld [vmem:[%s9929_s3 + $0x178] sm:$0xff]   ;;  %v3651_v42 = vshll.u32 %v3606_v22, 16  ;;  %v3856_v44 = vld [vmem:[#allocation4 + $0x4] sm:$0xf]  ;;  %v3634_v35 = vrot.slane %v3632_v5, 4  ;;  %v3637_v57 = vrot.slane %v3635_v47, 5  ;;  %vm9338_vm14 = vmor %vm3628_vm11, %vm3629_vm12 }
 0x20a   : > { %v3643_v15 = vrot.slane %v3641_v19, 5  ;;  %v3857_v39 = vld [vmem:[#allocation4 + $0x8] sm:$0x1]  ;;  %v6913_v13 = vrot.slane %v3855_v25, 9  ;;  %v3647_v49 = vrot.slane %v3645_v38, 4  ;;  %v3908_v63 = vrot.slane %v3856_v44, 5 }
 0x20b   : > { %7620 = vmatpush3.bf16.msra.mxu1 %v8244_v18  ;;  %v3911_v46 = vrot.slane %v3857_v39, 5  ;;  %v3995_v12 = vld [vmem:[#allocation4 + $0xc] sm:$0xf]  ;;  %v3638_v33 = vor.u32 %v3637_v57, %v3634_v35  ;;  %v3996_v50 = vld [vmem:[#allocation4 + $0x10] sm:$0xf]  ;;  %v3653_v27 = vrot.slane %v3651_v42, 5 }
 0x20c   : > { %7684 = vmatpush3.bf16.msra.mxu0 %v8245_v14  ;;  %7621 = vmatprep.subr.bf16.mxu1 %v8246_v17  ;;  %4011 = vst [vmem:[#allocation3 + $0xc] sm:$0xf] %v3995_v12  ;;  %v3648_v56 = vor.u32 %v3647_v49, %v3643_v15  ;;  %v3909_v52 = vsel %vm9332_vm13, %v6913_v13, %v3908_v63  ;;  %v3910_v60 = vrot.slane %v3908_v63, 4  ;;  %4012 = vst [vmem:[#allocation3 + $0x30] sm:$0xf] %v3996_v50  ;;  %v8269_v51 = vld [vmem:[%s9929_s3 + $0x138] sm:$0xff]  }
 0x20d   : > { %7685 = vmatprep.subr.bf16.mxu0 %v8247_v20  ;;  %v3639_v7 = vrot.slane %v3638_v33, 4  ;;  %3978 = vst [vmem:[#allocation3 + $0x8] sm:$0xf] %v3909_v52  ;;  %v3574_v30 = vld [vmem:[#allocation4 + $0xc] sm:$0xf]  ;;  %v8275_v35 = vld [vmem:[%s9929_s3 + $0x170] sm:$0xff]  }
 0x20e   : > { %v3575_v9 = vld [vmem:[#allocation4 + $0x10] sm:$0xf]  ;;  %v3649_v62 = vrot.slane %v3648_v56, 4  ;;  %v3912_v23 = vsel %vm9332_vm13, %v3910_v60, %v3911_v46  ;;  %3590 = vst [vmem:[#allocation3 + $0x48] sm:$0xf] %v3574_v30  ;;  %v8276_v49 = vld [vmem:[%s9929_s3 + $0x130] sm:$0xff]  }
 0x20f   : > { %7622 = vmatpush3.bf16.msra.mxu1 %v8248_v48  ;;  %3591 = vst [vmem:[#allocation3 + $0x6c] sm:$0xf] %v3575_v9  ;;  %v3607_v61 = vld [vmem:[#allocation4 + $0xc] sm:$0xf]  ;;  %v3608_v4 = vld [vmem:[#allocation4 + $0x10] sm:$0xf]  ;;  %v3644_v6 = vsel %vm9338_vm14, %v3639_v7, %v3643_v15 }
 0x210   : > { %7686 = vmatpush3.bf16.msra.mxu0 %v8249_v26  ;;  %7623 = vmatprep.subr.bf16.mxu1 %v8250_v24  ;;  %3979 = vst [vmem:[#allocation3 + $0x2c] sm:$0xf] %v3912_v23  ;;  %v3609_v58 = vld [vmem:[#allocation4 + $0x14] sm:$0x1]  ;;  %v3656_v31 = vshrl.u32 %v3607_v61, 16  ;;  %v3659_v10 = vshll.u32 %v3607_v61, 16  ;;  %v3654_v32 = vsel %vm9338_vm14, %v3649_v62, %v3653_v27 }
 0x211   : > { %7687 = vmatprep.subr.bf16.mxu0 %v8251_v45  ;;  %v3665_v11 = vshll.u32 %v3608_v4, 16  ;;  %3839 = vst [vmem:[#allocation3 + $0x4] sm:$0xf] %v3644_v6  ;;  %v3669_v34 = vshrl.u32 %v3608_v4, 16  ;;  %v3675_v36 = vshll.u32 %v3609_v58, 16  ;;  %v8282_v7 = vld [vmem:[%s9929_s3 + $0x168] sm:$0xff]  }
 0x212   : > { %v3858_v16 = vld [vmem:[#allocation4 + $0xc] sm:$0xe]  ;;  %v3859_v18 = vld [vmem:[#allocation4 + $0x10] sm:$0xf]  ;;  %3840 = vst [vmem:[#allocation3 + $0x28] sm:$0xf] %v3654_v32 }
 0x213   : > { %7624 = vmatpush3.bf16.msra.mxu1 %v8252_v59  ;;  %v3658_v14 = vrot.slane %v3656_v31, 4  ;;  %v3661_v17 = vrot.slane %v3659_v10, 5  ;;  %v3667_v20 = vrot.slane %v3665_v11, 5  ;;  %v3860_v48 = vld [vmem:[#allocation4 + $0x14] sm:$0x1]  ;;  %v6914_v26 = vrot.slane %v3858_v16, 9 }
 0x214   : > { %7688 = vmatpush3.bf16.msra.mxu0 %v8253_v3  ;;  %7625 = vmatprep.subr.bf16.mxu1 %v8254_v2  ;;  %v3671_v24 = vrot.slane %v3669_v34, 4  ;;  %v3677_v45 = vrot.slane %v3675_v36, 5  ;;  %v3915_v59 = vrot.slane %v3859_v18, 5  ;;  %v3918_v3 = vrot.slane %v3860_v48, 5  ;;  %v3997_v2 = vld [vmem:[#allocation4 + $0x18] sm:$0xf] }
 0x215   : > { %7689 = vmatprep.subr.bf16.mxu0 %v8255_v53  ;;  %v3662_v53 = vor.u32 %v3661_v17, %v3658_v14  ;;  %4013 = vst [vmem:[#allocation3 + $0x54] sm:$0xf] %v3997_v2  ;;  %v3577_v28 = vld [vmem:[#allocation4 + $0x1c] sm:$0xf]  ;;  %v3610_v19 = vld [vmem:[#allocation4 + $0x18] sm:$0xf] }
 0x216   : > { %v8267_v29 = vld [vmem:[#allocation3 + $0xc] ss:$36 sps:$4 sm:$0xff]   ;;  %3593 = vst [vmem:[#allocation3 + $0xb4] sm:$0xf] %v3577_v28  ;;  %v8262_v38 = vld [vmem:[#allocation3] ss:$36 sps:$4 sm:$0xff]  }
 0x217   : > { %7626 = vmatpush3.bf16.msra.mxu1 %v8256_v55  ;;  %v3998_v55 = vld [vmem:[#allocation4 + $0x1c] sm:$0xf]  ;;  %5981 = vmatprep.mubr.bf16.mxu0 %v8267_v29  ;;  %v3680_v44 = vshrl.u32 %v3610_v19, 16  ;;  %v3612_v57 = vld [vmem:[#allocation4 + $0x20] sm:$0x1]  ;;  %v3683_v15 = vshll.u32 %v3610_v19, 16 }
 0x218   : > { %7690 = vmatpush3.bf16.msra.mxu0 %v8257_v37  ;;  %7627 = vmatprep.subr.bf16.mxu1 %v8258_v21  ;;  %v3672_v37 = vor.u32 %v3671_v24, %v3667_v20  ;;  %v3916_v21 = vsel %vm9332_vm13, %v6914_v26, %v3915_v59  ;;  %4014 = vst [vmem:[#allocation3 + $0x78] sm:$0xf] %v3998_v55  ;;  %v8265_v41 = vld [vmem:[#allocation3 + $0x8] ss:$36 sps:$4 sm:$0xff]   ;;  %v3699_v46 = vshll.u32 %v3612_v57, 16  ;;  %v8289_v18 = vld [vmem:[%s9929_s3 + $0x160] sm:$0xff]  }
 0x219   : > { %7691 = vmatprep.subr.bf16.mxu0 %v8259_v0  ;;  %v3917_v0 = vrot.slane %v3915_v59, 4  ;;  %3980 = vst [vmem:[#allocation3 + $0x50] sm:$0xf] %v3916_v21  ;;  %v8264_v42 = vld [vmem:[#allocation3 + $0x4] ss:$36 sps:$4 sm:$0xff]   ;;  %v3682_v63 = vrot.slane %v3680_v44, 4 }
 0x21a   : > { %v3673_v22 = vrot.slane %v3672_v37, 4  ;;  %5884 = vmatprep.mubr.bf16.mxu1 %v8264_v42  ;;  %v3861_v12 = vld [vmem:[#allocation4 + $0x18] sm:$0xe]  ;;  %v3862_v33 = vld [vmem:[#allocation4 + $0x1c] sm:$0xf]  ;;  %v3685_v50 = vrot.slane %v3683_v15, 5 }
 0x21b   : > { %7628 = vmatpush3.bf16.msra.mxu1 %v8260_v43  ;;  %v3663_v43 = vrot.slane %v3662_v53, 4  ;;  %v3919_v5 = vsel %vm9332_vm13, %v3917_v0, %v3918_v3  ;;  %v3863_v52 = vld [vmem:[#allocation4 + $0x20] sm:$0x1]  ;;  %v6915_v60 = vrot.slane %v3861_v12, 9  ;;  %v3701_v30 = vrot.slane %v3699_v46, 5  ;;  %v8283_v32 = vld [vmem:[%s9929_s3 + $0x128] sm:$0xff]  }
 0x21c   : > { %7692 = vmatpush3.bf16.msra.mxu0 %v8261_v1  ;;  %7741 = vmatprep.subr.bf16.mxu1 %v8268_v8  ;;  %v3576_v1 = vld [vmem:[#allocation4 + $0x18] sm:$0xf]  ;;  %3981 = vst [vmem:[#allocation3 + $0x74] sm:$0xf] %v3919_v5  ;;  %v3611_v8 = vld [vmem:[#allocation4 + $0x1c] sm:$0xf]  ;;  %v3678_v25 = vsel %vm9338_vm14, %v3673_v22, %v3677_v45  ;;  %v3686_v61 = vor.u32 %v3685_v50, %v3682_v63 }
 0x21d   : > { %3592 = vst [vmem:[#allocation3 + $0x90] sm:$0xf] %v3576_v1  ;;  %v3668_v47 = vsel %vm9338_vm14, %v3663_v43, %v3667_v20  ;;  %3842 = vst [vmem:[#allocation3 + $0x70] sm:$0xf] %v3678_v25  ;;  %v3689_v39 = vshll.u32 %v3611_v8, 16  ;;  %v3693_v13 = vshrl.u32 %v3611_v8, 16 }
 0x21e   : > { %3841 = vst [vmem:[#allocation3 + $0x4c] sm:$0xf] %v3668_v47  ;;  %5885 = vmatmul.mubr.bf16.vlgmr.msra.gmra.mxu1 %v8262_v38  ;;  %v3922_v9 = vrot.slane %v3862_v33, 5  ;;  %v3925_v62 = vrot.slane %v3863_v52, 5  ;;  %v3999_v23 = vld [vmem:[#allocation4 + $0x24] sm:$0xf] }
 0x21f   : > { %5982 = vmatmul.mubr.bf16.vlgmr.msra.gmra.mxu0 %v8265_v41  ;;  %v3691_v56 = vrot.slane %v3689_v39, 5  ;;  %v3695_v27 = vrot.slane %v3693_v13, 4  ;;  %7742 = vmatpush3.bf16.msra.mxu1 %v8269_v51  ;;  %v4000_v6 = vld [vmem:[#allocation4 + $0x28] sm:$0xf]  ;;  %4015 = vst [vmem:[#allocation3 + $0x9c] sm:$0xf] %v3999_v23 }
 0x220   : > { %7743 = vmatprep.subr.bf16.mxu1 %v8275_v35  ;;  %v8272_v58 = vld [vmem:[#allocation3 + $0x54] ss:$36 sps:$4 sm:$0xff]   ;;  %v3923_v10 = vsel %vm9332_vm13, %v6915_v60, %v3922_v9  ;;  %v3924_v11 = vrot.slane %v3922_v9, 4  ;;  %4016 = vst [vmem:[#allocation3 + $0xc0] sm:$0xf] %v4000_v6  ;;  %v3687_v36 = vrot.slane %v3686_v61, 4 }
 0x221   : > { %v3696_v4 = vor.u32 %v3695_v27, %v3691_v56  ;;  %3982 = vst [vmem:[#allocation3 + $0x98] sm:$0xf] %v3923_v10  ;;  %5989 = vmatprep.mubr.bf16.mxu0 %v8272_v58  ;;  %v3578_v45 = vld [vmem:[#allocation4 + $0x24] sm:$0xf]  ;;  %v3579_v59 = vld [vmem:[#allocation4 + $0x28] sm:$0xf] }
 0x222   : > { %v3926_v20 = vsel %vm9332_vm13, %v3924_v11, %v3925_v62  ;;  %v3692_v26 = vsel %vm9338_vm14, %v3687_v36, %v3691_v56  ;;  %v3613_v3 = vld [vmem:[#allocation4 + $0x24] sm:$0xf]  ;;  %3594 = vst [vmem:[#allocation3 + $0xd8] sm:$0xf] %v3578_v45  ;;  %3595 = vst [vmem:[#allocation3 + $0xfc] sm:$0xf] %v3579_v59 }
 0x223   : > { %v8274_v31 = vld [vmem:[#allocation3 + $0x50] ss:$36 sps:$4 sm:$0xff]   ;;  %v3697_v16 = vrot.slane %v3696_v4, 4  ;;  %7744 = vmatpush3.bf16.msra.mxu1 %v8276_v49  ;;  %3983 = vst [vmem:[#allocation3 + $0xbc] sm:$0xf] %v3926_v20  ;;  %v3704_v55 = vshrl.u32 %v3613_v3, 16 }
 0x224   : > { %v4843_v14 = vld [vmem:[#allocation3 + $0x6c] sm:$0xff]  ;;  %7745 = vmatprep.subr.bf16.mxu1 %v8282_v7  ;;  %3843 = vst [vmem:[#allocation3 + $0x94] sm:$0xf] %v3692_v26  ;;  %v3614_v2 = vld [vmem:[#allocation4 + $0x28] sm:$0xf]  ;;  %v3707_v37 = vshll.u32 %v3613_v3, 16 }
 0x225   : > { %v4838_v34 = vld [vmem:[#allocation3 + $0x48] sm:$0xff]  ;;  %v3702_v24 = vsel %vm9338_vm14, %v3697_v16, %v3701_v30  ;;  %v3615_v53 = vld [vmem:[#allocation4 + $0x2c] sm:$0x1]  ;;  %v8290_v21 = vld [vmem:[%s9929_s3 + $0x120] sm:$0xff]   ;;  %v3713_v0 = vshll.u32 %v3614_v2, 16  ;;  %v3717_v43 = vshrl.u32 %v3614_v2, 16 }
 0x226   : > { %v8270_v17 = vld [vmem:[#allocation3 + $0x4c] ss:$36 sps:$4 sm:$0xff]   ;;  %v6946_v48 = vcombine.low %v4838_v34, %v4843_v14  ;;  %3844 = vst [vmem:[#allocation3 + $0xb8] sm:$0xf] %v3702_v24  ;;  %v3723_v1 = vshll.u32 %v3615_v53, 16  ;;  %v8291_v41 = vld [vmem:[%s9929_s3 + $0x1f8] sm:$0xff]  }
 0x227   : > { %5990 = vmatmul.mubr.bf16.gmra.mxu0 %v8274_v31  ;;  %5892 = vmatprep.mubr.bf16.mxu1 %v8270_v17  ;;  %v3864_v28 = vld [vmem:[#allocation4 + $0x24] sm:$0xe]  ;;  %v3706_v29 = vrot.slane %v3704_v55, 4  ;;  %v3709_v51 = vrot.slane %v3707_v37, 5  ;;  %v3865_v22 = vld [vmem:[#allocation4 + $0x28] sm:$0xf] }
 0x228   : > { %5893 = vmatmul.mubr.bf16.gmra.mxu1 %v6946_v48  ;;  %v3866_v5 = vld [vmem:[#allocation4 + $0x2c] sm:$0x1]  ;;  %v3715_v47 = vrot.slane %v3713_v0, 5  ;;  %v3719_v19 = vrot.slane %v3717_v43, 4  ;;  %v3725_v8 = vrot.slane %v3723_v1, 5  ;;  %v6916_v38 = vrot.slane %v3864_v28, 9  ;;  %7805 = vmatprep.subr.bf16.mxu0 %v8291_v41 }
 0x229   : > { %7746 = vmatpush3.bf16.msra.mxu1 %v8283_v32  ;;  %v4001_v42 = vld [vmem:[#allocation4 + $0x30] sm:$0xf]  ;;  %v3710_v25 = vor.u32 %v3709_v51, %v3706_v29  ;;  %v3929_v44 = vrot.slane %v3865_v22, 5  ;;  %v3932_v35 = vrot.slane %v3866_v5, 5  ;;  %v4002_v57 = vld [vmem:[#allocation4 + $0x34] sm:$0xf] }
 0x22a   : > { %7747 = vmatprep.subr.bf16.mxu1 %v8289_v18  ;;  %4017 = vst [vmem:[#allocation3 + $0xe4] sm:$0xf] %v4001_v42  ;;  %v8292_v15 = vld [vmem:[%s9929_s3 + $0x1b8] sm:$0xff]   ;;  %v3720_v39 = vor.u32 %v3719_v19, %v3715_v47  ;;  %4018 = vst [vmem:[#allocation3 + $0x108] sm:$0xf] %v4002_v57 }
 0x22b   : > { %v8279_v13 = vld [vmem:[#allocation3 + $0x9c] ss:$36 sps:$4 sm:$0xff]   ;;  %v3711_v63 = vrot.slane %v3710_v25, 4  ;;  %v3930_v46 = vsel %vm9332_vm13, %v6916_v38, %v3929_v44  ;;  %7806 = vmatpush3.bf16.msra.mxu0 %v8292_v15  ;;  %v4848_v12 = vld [vmem:[#allocation3 + $0x90] sm:$0xff]  ;;  %v3931_v27 = vrot.slane %v3929_v44, 4 }
 0x22c   : > { %v8281_v49 = vld [vmem:[#allocation3 + $0x98] ss:$36 sps:$4 sm:$0xff]   ;;  %v3721_v56 = vrot.slane %v3720_v39, 4  ;;  %3984 = vst [vmem:[#allocation3 + $0xe0] sm:$0xf] %v3930_v46  ;;  %5997 = vmatprep.mubr.bf16.mxu0 %v8279_v13  ;;  %v8301_v38 = vld [vmem:[%s9929_s3 + $0x1b0] sm:$0xff]  }
 0x22d   : > { %7748 = vmatpush3.bf16.msra.mxu1 %v8290_v21  ;;  %v4853_v33 = vld [vmem:[#allocation3 + $0xb4] sm:$0xff]  ;;  %v3716_v60 = vsel %vm9338_vm14, %v3711_v63, %v3715_v47  ;;  %v3933_v30 = vsel %vm9332_vm13, %v3931_v27, %v3932_v35  ;;  %v3580_v9 = vld [vmem:[#allocation4 + $0x30] sm:$0xf]  ;;  %v3581_v62 = vld [vmem:[#allocation4 + $0x34] sm:$0xf] }
 0x22e   : > { %v8277_v50 = vld [vmem:[#allocation3 + $0x94] ss:$36 sps:$4 sm:$0xff]   ;;  %v6955_v52 = vcombine.low %v4848_v12, %v4853_v33  ;;  %v3726_v7 = vsel %vm9338_vm14, %v3721_v56, %v3725_v8  ;;  %3845 = vst [vmem:[#allocation3 + $0xdc] sm:$0xf] %v3716_v60  ;;  %3985 = vst [vmem:[#allocation3 + $0x104] sm:$0xf] %v3933_v30 }
 0x22f   : > { %5900 = vmatprep.mubr.bf16.mxu1 %v8277_v50  ;;  %5998 = vmatmul.mubr.bf16.gmra.mxu0 %v8281_v49  ;;  %3846 = vst [vmem:[#allocation3 + $0x100] sm:$0xf] %v3726_v7  ;;  %3596 = vst [vmem:[#allocation3 + $0x120] sm:$0xf] %v3580_v9  ;;  %v3616_v23 = vld [vmem:[#allocation4 + $0x30] sm:$0xf] }
 0x230   : > { %5901 = vmatmul.mubr.bf16.gmra.mxu1 %v6955_v52  ;;  %v3617_v61 = vld [vmem:[#allocation4 + $0x34] sm:$0xf]  ;;  %3597 = vst [vmem:[#allocation3 + $0x144] sm:$0xf] %v3581_v62  ;;  %v3618_v4 = vld [vmem:[#allocation4 + $0x38] sm:$0x1] }
 0x231   : > { %v3728_v6 = vshrl.u32 %v3616_v23, 16  ;;  %v3731_v58 = vshll.u32 %v3616_v23, 16  ;;  %v3737_v31 = vshll.u32 %v3617_v61, 16  ;;  %v3741_v10 = vshrl.u32 %v3617_v61, 16  ;;  %v3867_v32 = vld [vmem:[#allocation4 + $0x30] sm:$0xe] }
 0x232   : > { %v3747_v11 = vshll.u32 %v3618_v4, 16  ;;  %v3868_v34 = vld [vmem:[#allocation4 + $0x34] sm:$0xf]  ;;  %v8298_v36 = vld [vmem:[%s9929_s3 + $0x158] sm:$0xff]   ;;  %v3869_v20 = vld [vmem:[#allocation4 + $0x38] sm:$0x1] }
 0x233   : > { %v3730_v16 = vrot.slane %v3728_v6, 4  ;;  %v3733_v18 = vrot.slane %v3731_v58, 5  ;;  %v3739_v14 = vrot.slane %v3737_v31, 5  ;;  %v3743_v17 = vrot.slane %v3741_v10, 4  ;;  %7749 = vmatprep.subr.bf16.mxu1 %v8298_v36  ;;  %v8299_v59 = vld [vmem:[%s9929_s3 + $0x118] sm:$0xff]   ;;  %v8300_v8 = vld [vmem:[%s9929_s3 + $0x1f0] sm:$0xff]  }
 0x234   : > { %v3749_v48 = vrot.slane %v3747_v11, 5  ;;  %v6917_v26 = vrot.slane %v3867_v32, 9  ;;  %v3936_v24 = vrot.slane %v3868_v34, 5  ;;  %v3939_v45 = vrot.slane %v3869_v20, 5  ;;  %v4003_v53 = vld [vmem:[#allocation4 + $0x3c] sm:$0xf]  ;;  %7750 = vmatpush3.bf16.msra.mxu1 %v8299_v59  ;;  %7807 = vmatprep.subr.bf16.mxu0 %v8300_v8 }
 0x235   : > { %v3734_v3 = vor.u32 %v3733_v18, %v3730_v16  ;;  %v3744_v2 = vor.u32 %v3743_v17, %v3739_v14  ;;  %v4004_v55 = vld [vmem:[#allocation4 + $0x40] sm:$0xf]  ;;  %v4858_v37 = vld [vmem:[#allocation3 + $0xd8] sm:$0xff]  ;;  %4019 = vst [vmem:[#allocation3 + $0x12c] sm:$0xf] %v4003_v53  ;;  %7808 = vmatpush3.bf16.msra.mxu0 %v8301_v38  ;;  %v8311_v59 = vld [vmem:[%s9929_s3 + $0x1e0] sm:$0xff]  }
 0x236   : > { %v3937_v21 = vsel %vm9332_vm13, %v6917_v26, %v3936_v24  ;;  %v3938_v0 = vrot.slane %v3936_v24, 4  ;;  %4020 = vst [vmem:[#allocation3 + $0x150] sm:$0xf] %v4004_v55  ;;  %v4863_v43 = vld [vmem:[#allocation3 + $0xfc] sm:$0xff]  ;;  %v8286_v29 = vld [vmem:[#allocation3 + $0xe4] ss:$36 sps:$4 sm:$0xff]  }
 0x237   : > { %v8284_v1 = vld [vmem:[#allocation3 + $0xdc] ss:$36 sps:$4 sm:$0xff]   ;;  %v3735_v28 = vrot.slane %v3734_v3, 4  ;;  %v3745_v41 = vrot.slane %v3744_v2, 4  ;;  %3986 = vst [vmem:[#allocation3 + $0x128] sm:$0xf] %v3937_v21  ;;  %v6964_v51 = vcombine.low %v4858_v37, %v4863_v43  ;;  %6005 = vmatprep.mubr.bf16.mxu0 %v8286_v29 }
 0x238   : > { %v8288_v22 = vld [vmem:[#allocation3 + $0xe0] ss:$36 sps:$4 sm:$0xff]   ;;  %v3940_v5 = vsel %vm9332_vm13, %v3938_v0, %v3939_v45  ;;  %5908 = vmatprep.mubr.bf16.mxu1 %v8284_v1  ;;  %v3582_v42 = vld [vmem:[#allocation4 + $0x3c] sm:$0xf]  ;;  %v3583_v25 = vld [vmem:[#allocation4 + $0x40] sm:$0xf] }
 0x239   : > { %v3740_v47 = vsel %vm9338_vm14, %v3735_v28, %v3739_v14  ;;  %v3750_v19 = vsel %vm9338_vm14, %v3745_v41, %v3749_v48  ;;  %3987 = vst [vmem:[#allocation3 + $0x14c] sm:$0xf] %v3940_v5  ;;  %5909 = vmatmul.mubr.bf16.gmra.mxu1 %v6964_v51  ;;  %6006 = vmatmul.mubr.bf16.gmra.mxu0 %v8288_v22  ;;  %v3619_v44 = vld [vmem:[#allocation4 + $0x3c] sm:$0xf]  ;;  %3598 = vst [vmem:[#allocation3 + $0x168] sm:$0xf] %v3582_v42 }
 0x23a   : > { %3847 = vst [vmem:[#allocation3 + $0x124] sm:$0xf] %v3740_v47  ;;  %3848 = vst [vmem:[#allocation3 + $0x148] sm:$0xf] %v3750_v19  ;;  %v3620_v35 = vld [vmem:[#allocation4 + $0x40] sm:$0xf] }
 0x23b   : > { %3599 = vst [vmem:[#allocation3 + $0x18c] sm:$0xf] %v3583_v25  ;;  %v3621_v57 = vld [vmem:[#allocation4 + $0x44] sm:$0x1]  ;;  %v3752_v15 = vshrl.u32 %v3619_v44, 16  ;;  %v3755_v39 = vshll.u32 %v3619_v44, 16 }
 0x23c   : > { %v3761_v13 = vshll.u32 %v3620_v35, 16  ;;  %v3765_v49 = vshrl.u32 %v3620_v35, 16  ;;  %v3771_v63 = vshll.u32 %v3621_v57, 16  ;;  %v3870_v46 = vld [vmem:[#allocation4 + $0x3c] sm:$0xe]  ;;  %v8307_v12 = vld [vmem:[%s9929_s3 + $0x150] sm:$0xff]  }
 0x23d   : > { %v3754_v33 = vrot.slane %v3752_v15, 4  ;;  %v3757_v50 = vrot.slane %v3755_v39, 5  ;;  %v3871_v56 = vld [vmem:[#allocation4 + $0x40] sm:$0xf]  ;;  %v6918_v27 = vrot.slane %v3870_v46, 9  ;;  %7751 = vmatprep.subr.bf16.mxu1 %v8307_v12  ;;  %v8309_v48 = vld [vmem:[%s9929_s3 + $0x1e8] sm:$0xff]  }
 0x23e   : > { %v3763_v52 = vrot.slane %v3761_v13, 5  ;;  %v3767_v60 = vrot.slane %v3765_v49, 4  ;;  %v3872_v7 = vld [vmem:[#allocation4 + $0x44] sm:$0x1]  ;;  %v3943_v30 = vrot.slane %v3871_v56, 5  ;;  %v3773_v10 = vrot.slane %v3771_v63, 5  ;;  %7809 = vmatprep.subr.bf16.mxu0 %v8309_v48 }
 0x23f   : > { %v8295_v9 = vld [vmem:[#allocation3 + $0x12c] ss:$36 sps:$4 sm:$0xff]   ;;  %v3758_v23 = vor.u32 %v3757_v50, %v3754_v33  ;;  %v3946_v61 = vrot.slane %v3872_v7, 5  ;;  %v4005_v16 = vld [vmem:[#allocation4 + $0x48] sm:$0xf]  ;;  %v8316_v44 = vld [vmem:[%s9929_s3 + $0x1a0] sm:$0xff]  }
 0x240   : > { %v8297_v62 = vld [vmem:[#allocation3 + $0x128] ss:$36 sps:$4 sm:$0xff]   ;;  %v3768_v31 = vor.u32 %v3767_v60, %v3763_v52  ;;  %v3944_v11 = vsel %vm9332_vm13, %v6918_v27, %v3943_v30  ;;  %v3945_v32 = vrot.slane %v3943_v30, 4  ;;  %6013 = vmatprep.mubr.bf16.mxu0 %v8295_v9  ;;  %v4006_v18 = vld [vmem:[#allocation4 + $0x4c] sm:$0xf]  ;;  %v8308_v14 = vld [vmem:[%s9929_s3 + $0x110] sm:$0xff]  }
 0x241   : > { %v4868_v4 = vld [vmem:[#allocation3 + $0x120] sm:$0xff]  ;;  %v3759_v36 = vrot.slane %v3758_v23, 4  ;;  %3988 = vst [vmem:[#allocation3 + $0x170] sm:$0xf] %v3944_v11  ;;  %6014 = vmatmul.mubr.bf16.gmra.mxu0 %v8297_v62  ;;  %4021 = vst [vmem:[#allocation3 + $0x174] sm:$0xf] %v4005_v16  ;;  %7752 = vmatpush3.bf16.msra.mxu1 %v8308_v14 }
 0x242   : > { %v4873_v6 = vld [vmem:[#allocation3 + $0x144] sm:$0xff]  ;;  %v3769_v17 = vrot.slane %v3768_v31, 4  ;;  %v3947_v20 = vsel %vm9332_vm13, %v3945_v32, %v3946_v61  ;;  %4022 = vst [vmem:[#allocation3 + $0x198] sm:$0xf] %v4006_v18  ;;  %v3584_v3 = vld [vmem:[#allocation4 + $0x48] sm:$0xf] }
 0x243   : > { %v8293_v58 = vld [vmem:[#allocation3 + $0x124] ss:$36 sps:$4 sm:$0xff]   ;;  %v6973_v34 = vcombine.low %v4868_v4, %v4873_v6  ;;  %v3764_v26 = vsel %vm9338_vm14, %v3759_v36, %v3763_v52  ;;  %3989 = vst [vmem:[#allocation3 + $0x194] sm:$0xf] %v3947_v20  ;;  %v3585_v2 = vld [vmem:[#allocation4 + $0x4c] sm:$0xf] }
 0x244   : > { %5916 = vmatprep.mubr.bf16.mxu1 %v8293_v58  ;;  %v3774_v24 = vsel %vm9338_vm14, %v3769_v17, %v3773_v10  ;;  %3849 = vst [vmem:[#allocation3 + $0x16c] sm:$0xf] %v3764_v26  ;;  %v8310_v45 = vld [vmem:[%s9929_s3 + $0x1a8] sm:$0xff]   ;;  %3600 = vst [vmem:[#allocation3 + $0x1b0] sm:$0xf] %v3584_v3  ;;  %v8320_v23 = vld [vmem:[%s9929_s3 + $0x1d8] sm:$0xff]  }
 0x245   : > { %5917 = vmatmul.mubr.bf16.gmra.mxu1 %v6973_v34  ;;  %3850 = vst [vmem:[#allocation3 + $0x190] sm:$0xf] %v3774_v24  ;;  %7810 = vmatpush3.bf16.msra.mxu0 %v8310_v45  ;;  %3601 = vst [vmem:[#allocation3 + $0x1d4] sm:$0xf] %v3585_v2  ;;  %v3622_v53 = vld [vmem:[#allocation4 + $0x48] sm:$0xf] }
 0x246   : > { %v3623_v55 = vld [vmem:[#allocation4 + $0x4c] sm:$0xf]  ;;  %v3624_v37 = vld [vmem:[#allocation4 + $0x50] sm:$0x1]  ;;  %7811 = vmatprep.subr.bf16.mxu0 %v8311_v59  ;;  %v3776_v21 = vshrl.u32 %v3622_v53, 16  ;;  %v3779_v0 = vshll.u32 %v3622_v53, 16 }
 0x247   : > { %v3785_v43 = vshll.u32 %v3623_v55, 16  ;;  %v3789_v1 = vshrl.u32 %v3623_v55, 16  ;;  %v3873_v28 = vld [vmem:[#allocation4 + $0x48] sm:$0xe]  ;;  %v3795_v41 = vshll.u32 %v3624_v37, 16  ;;  %v8318_v27 = vld [vmem:[%s9929_s3 + $0x148] sm:$0xff]  }
 0x248   : > { %v3874_v29 = vld [vmem:[#allocation4 + $0x4c] sm:$0xf]  ;;  %v3875_v51 = vld [vmem:[#allocation4 + $0x50] sm:$0x1]  ;;  %v3778_v47 = vrot.slane %v3776_v21, 4  ;;  %v3781_v8 = vrot.slane %v3779_v0, 5  ;;  %7753 = vmatprep.subr.bf16.mxu1 %v8318_v27 }
 0x249   : > { %v8304_v22 = vld [vmem:[#allocation3 + $0x174] ss:$36 sps:$4 sm:$0xff]   ;;  %v3787_v38 = vrot.slane %v3785_v43, 5  ;;  %v3791_v42 = vrot.slane %v3789_v1, 4  ;;  %v3797_v25 = vrot.slane %v3795_v41, 5  ;;  %v6919_v15 = vrot.slane %v3873_v28, 9  ;;  %7812 = vmatpush3.bf16.msra.mxu0 %v8316_v44 }
 0x24a   : > { %v8306_v5 = vld [vmem:[#allocation3 + $0x170] ss:$36 sps:$4 sm:$0xff]   ;;  %6021 = vmatprep.mubr.bf16.mxu0 %v8304_v22  ;;  %v3950_v39 = vrot.slane %v3874_v29, 5  ;;  %v3953_v13 = vrot.slane %v3875_v51, 5  ;;  %v3782_v63 = vor.u32 %v3781_v8, %v3778_v47  ;;  %v4007_v12 = vld [vmem:[#allocation4 + $0x54] sm:$0xf]  ;;  %7813 = vmatprep.subr.bf16.mxu0 %v8320_v23 }
 0x24b   : > { %v4878_v19 = vld [vmem:[#allocation3 + $0x168] sm:$0xff]  ;;  %6022 = vmatmul.mubr.bf16.gmra.mxu0 %v8306_v5  ;;  %v3792_v46 = vor.u32 %v3791_v42, %v3787_v38  ;;  %4023 = vst [vmem:[#allocation3 + $0x1bc] sm:$0xf] %v4007_v12  ;;  %v8321_v61 = vld [vmem:[%s9929_s3 + $0x198] sm:$0xff]   ;;  %v8322_v4 = vld [vmem:[%s9929_s3 + $0x1d0] sm:$0xff]  }
 0x24c   : > { %v4883_v35 = vld [vmem:[#allocation3 + $0x18c] sm:$0xff]  ;;  %v4008_v33 = vld [vmem:[#allocation4 + $0x58] sm:$0xf]  ;;  %v3951_v50 = vsel %vm9332_vm13, %v6919_v15, %v3950_v39  ;;  %v3952_v56 = vrot.slane %v3950_v39, 4  ;;  %v3783_v52 = vrot.slane %v3782_v63, 4  ;;  %v8333_v39 = vld [vmem:[%s9929_s3 + $0x1c0] sm:$0xff]  }
 0x24d   : > { %v8302_v57 = vld [vmem:[#allocation3 + $0x16c] ss:$36 sps:$4 sm:$0xff]   ;;  %v6982_v49 = vcombine.low %v4878_v19, %v4883_v35  ;;  %4024 = vst [vmem:[#allocation3 + $0x1e0] sm:$0xf] %v4008_v33  ;;  %v3793_v60 = vrot.slane %v3792_v46, 4  ;;  %7814 = vmatpush3.bf16.msra.mxu0 %v8321_v61  ;;  %v8330_v35 = vld [vmem:[%s9929_s3 + $0x100] sm:$0xff]  }
 0x24e   : > { %5924 = vmatprep.mubr.bf16.mxu1 %v8302_v57  ;;  %3990 = vst [vmem:[#allocation3 + $0x1b8] sm:$0xf] %v3951_v50  ;;  %v3954_v7 = vsel %vm9332_vm13, %v3952_v56, %v3953_v13  ;;  %v8319_v30 = vld [vmem:[%s9929_s3 + $0x108] sm:$0xff]   ;;  %v3788_v9 = vsel %vm9338_vm14, %v3783_v52, %v3787_v38  ;;  %v3586_v6 = vld [vmem:[#allocation4 + $0x54] sm:$0xf]  ;;  %7815 = vmatprep.subr.bf16.mxu0 %v8322_v4  ;;  %v8327_v22 = vld [vmem:[%s9929_s3 + $0x190] sm:$0xff]  }
 0x24f   : > { %5925 = vmatmul.mubr.bf16.gmra.mxu1 %v6982_v49  ;;  %v3798_v62 = vsel %vm9338_vm14, %v3793_v60, %v3797_v25  ;;  %3991 = vst [vmem:[#allocation3 + $0x1dc] sm:$0xf] %v3954_v7  ;;  %3851 = vst [vmem:[#allocation3 + $0x1b4] sm:$0xf] %v3788_v9  ;;  %v3587_v58 = vld [vmem:[#allocation4 + $0x58] sm:$0xf] }
 0x250   : > { %3852 = vst [vmem:[#allocation3 + $0x1d8] sm:$0xf] %v3798_v62  ;;  %7754 = vmatpush3.bf16.msra.mxu1 %v8319_v30  ;;  %3602 = vst [vmem:[#allocation3 + $0x1f8] sm:$0xf] %v3586_v6  ;;  %v3625_v31 = vld [vmem:[#allocation4 + $0x54] sm:$0xf] }
 0x251   : > { %v3626_v10 = vld [vmem:[#allocation4 + $0x58] sm:$0xf]  ;;  %3603 = vst [vmem:[#allocation3 + $0x21c] sm:$0xf] %v3587_v58  ;;  %v3627_v11 = vld [vmem:[#allocation4 + $0x5c] sm:$0x1]  ;;  %7816 = vmatpush3.bf16.msra.mxu0 %v8327_v22 }
 0x252   : > { %v3800_v32 = vshrl.u32 %v3625_v31, 16  ;;  %v3803_v34 = vshll.u32 %v3625_v31, 16  ;;  %v3809_v36 = vshll.u32 %v3626_v10, 16  ;;  %v3813_v16 = vshrl.u32 %v3626_v10, 16  ;;  %v3876_v14 = vld [vmem:[#allocation4 + $0x54] sm:$0xe] }
 0x253   : > { %v3819_v18 = vshll.u32 %v3627_v11, 16  ;;  %v3877_v17 = vld [vmem:[#allocation4 + $0x58] sm:$0xf]  ;;  %v3878_v45 = vld [vmem:[#allocation4 + $0x5c] sm:$0x1]  ;;  %v6920_v43 = vrot.slane %v3876_v14, 9 }
 0x254   : > { %v3802_v20 = vrot.slane %v3800_v32, 4  ;;  %v3805_v48 = vrot.slane %v3803_v34, 5  ;;  %v3811_v26 = vrot.slane %v3809_v36, 5  ;;  %v3815_v24 = vrot.slane %v3813_v16, 4  ;;  %v8314_v59 = vld [vmem:[#allocation3 + $0x1bc] ss:$36 sps:$4 sm:$0xff]  }
 0x255   : > { %v3821_v2 = vrot.slane %v3819_v18, 5  ;;  %v3957_v1 = vrot.slane %v3877_v17, 5  ;;  %6029 = vmatprep.mubr.bf16.mxu0 %v8314_v59  ;;  %v3960_v41 = vrot.slane %v3878_v45, 5  ;;  %v4009_v29 = vld [vmem:[#allocation4 + $0x60] sm:$0xf]  ;;  %v8329_v38 = vld [vmem:[%s9929_s3 + $0x140] sm:$0xff]  }
 0x256   : > { %v8317_v3 = vld [vmem:[#allocation3 + $0x1b8] ss:$36 sps:$4 sm:$0xff]   ;;  %v4888_v53 = vld [vmem:[#allocation3 + $0x1b0] sm:$0xff]  ;;  %v3806_v21 = vor.u32 %v3805_v48, %v3802_v20  ;;  %v3816_v0 = vor.u32 %v3815_v24, %v3811_v26  ;;  %4025 = vst [vmem:[#allocation3 + $0x204] sm:$0xf] %v4009_v29  ;;  %7755 = vmatprep.subr.bf16.mxu1 %v8329_v38  ;;  %v8331_v57 = vld [vmem:[%s9929_s3 + $0x1c8] sm:$0xff]  }
 0x257   : > { %v4893_v55 = vld [vmem:[#allocation3 + $0x1d4] sm:$0xff]  ;;  %6030 = vmatmul.mubr.bf16.gmra.mxu0 %v8317_v3  ;;  %v3958_v19 = vsel %vm9332_vm13, %v6920_v43, %v3957_v1  ;;  %v3959_v8 = vrot.slane %v3957_v1, 4  ;;  %7756 = vmatpush3.bf16.msra.mxu1 %v8330_v35  ;;  %v8332_v15 = vld [vmem:[%s9929_s3 + $0x188] sm:$0xff]   ;;  %v4027_v13 = vld [vmem:[#allocation4 + $0xc] sm:$0xf] }
 0x258   : > { %v8312_v37 = vld [vmem:[#allocation3 + $0x1b4] ss:$36 sps:$4 sm:$0xff]   ;;  %v6991_v28 = vcombine.low %v4888_v53, %v4893_v55  ;;  %v3807_v5 = vrot.slane %v3806_v21, 4  ;;  %v3817_v47 = vrot.slane %v3816_v0, 4  ;;  %3992 = vst [vmem:[#allocation3 + $0x200] sm:$0xf] %v3958_v19  ;;  %7817 = vmatprep.subr.bf16.mxu0 %v8331_v57 }
 0x259   : > { %v4010_v51 = vld [vmem:[#allocation4 + $0x64] sm:$0xf]  ;;  %5932 = vmatprep.mubr.bf16.mxu1 %v8312_v37  ;;  %v3961_v44 = vsel %vm9332_vm13, %v3959_v8, %v3960_v41  ;;  %7818 = vmatpush3.bf16.msra.mxu0 %v8332_v15  ;;  %v4028_v49 = vld [vmem:[#allocation4 + $0x10] sm:$0xf]  ;;  %v4029_v63 = vld [vmem:[#allocation4 + $0x14] sm:$0x1] }
 0x25a   : > { %4026 = vst [vmem:[#allocation3 + $0x228] sm:$0xf] %v4010_v51  ;;  %5933 = vmatmul.mubr.bf16.gmra.mxu1 %v6991_v28  ;;  %v3812_v42 = vsel %vm9338_vm14, %v3807_v5, %v3811_v26  ;;  %v3822_v25 = vsel %vm9338_vm14, %v3817_v47, %v3821_v2  ;;  %3993 = vst [vmem:[#allocation3 + $0x224] sm:$0xf] %v3961_v44  ;;  %7819 = vmatprep.subr.bf16.mxu0 %v8333_v39  ;;  %v4052_v46 = vshrl.u32 %v4027_v13, 16  ;;  %v8337_v18 = vld [vmem:[%s9929_s3 + $0x180] sm:$0xff]  }
 0x25b   : > { %3853 = vst [vmem:[#allocation3 + $0x1fc] sm:$0xf] %v3812_v42  ;;  %3854 = vst [vmem:[#allocation3 + $0x220] sm:$0xf] %v3822_v25  ;;  %v4055_v12 = vshll.u32 %v4027_v13, 16  ;;  %v4061_v33 = vshll.u32 %v4028_v49, 16 }
 0x25c   : > { %v4065_v50 = vshrl.u32 %v4028_v49, 16  ;;  %v4275_v56 = vld [vmem:[#allocation4 + $0xc] sm:$0xe]  ;;  %v4071_v27 = vshll.u32 %v4029_v63, 16  ;;  %v4276_v52 = vld [vmem:[#allocation4 + $0x10] sm:$0xf] }
 0x25d   : > { %v4277_v60 = vld [vmem:[#allocation4 + $0x14] sm:$0x1]  ;;  %v4054_v7 = vrot.slane %v4052_v46, 4  ;;  %v4057_v30 = vrot.slane %v4055_v12, 5  ;;  %v4063_v9 = vrot.slane %v4061_v33, 5  ;;  %v6921_v58 = vrot.slane %v4275_v56, 9  ;;  %7820 = vmatpush3.bf16.msra.mxu0 %v8337_v18 }
 0x25e   : > { %v4067_v62 = vrot.slane %v4065_v50, 4  ;;  %v4073_v6 = vrot.slane %v4071_v27, 5  ;;  %v4325_v36 = vrot.slane %v4276_v52, 5  ;;  %v4328_v16 = vrot.slane %v4277_v60, 5  ;;  %v9504_v26 = vld [vmem:[%s9929_s3 + $0x238] sm:$0xff]  }
 0x25f   : > { %v4058_v32 = vor.u32 %v4057_v30, %v4054_v7  ;;  %v4412_v24 = vld [vmem:[#allocation4 + $0x18] sm:$0xf]  ;;  %v4413_v45 = vld [vmem:[#allocation4 + $0x1c] sm:$0xf]  ;;  %7921 = vmatprep.subr.bf16.mxu1 %v9504_v26  ;;  %v4446_v37 = vld [vmem:[#allocation4 + $0x20] sm:$0x1] }
 0x260   : > { %v4068_v34 = vor.u32 %v4067_v62, %v4063_v9  ;;  %v4326_v20 = vsel %vm9332_vm13, %v6921_v58, %v4325_v36  ;;  %v4327_v48 = vrot.slane %v4325_v36, 4  ;;  %v4444_v59 = vld [vmem:[#allocation4 + $0x18] sm:$0xf]  ;;  %4428 = vst [vmem:[#allocation3 + $0x18] sm:$0xf] %v4412_v24  ;;  %v4488_v28 = vshll.u32 %v4446_v37, 16 }
 0x261   : > { %v8325_v31 = vld [vmem:[#allocation3 + $0x204] ss:$36 sps:$4 sm:$0xff]   ;;  %v4059_v14 = vrot.slane %v4058_v32, 4  ;;  %4395 = vst [vmem:[#allocation3 + $0x14] sm:$0xf] %v4326_v20  ;;  %v4469_v21 = vshrl.u32 %v4444_v59, 16 }
 0x262   : > { %v4898_v23 = vld [vmem:[#allocation3 + $0x1f8] sm:$0xff]  ;;  %v8328_v11 = vld [vmem:[#allocation3 + $0x200] ss:$36 sps:$4 sm:$0xff]   ;;  %6037 = vmatprep.mubr.bf16.mxu0 %v8325_v31  ;;  %v4069_v17 = vrot.slane %v4068_v34, 4  ;;  %v4329_v53 = vsel %vm9332_vm13, %v4327_v48, %v4328_v16  ;;  %4429 = vst [vmem:[#allocation3 + $0x3c] sm:$0xf] %v4413_v45 }
 0x263   : > { %v4903_v61 = vld [vmem:[#allocation3 + $0x21c] sm:$0xff]  ;;  %6038 = vmatmul.mubr.bf16.gmra.mxu0 %v8328_v11  ;;  %v4064_v3 = vsel %vm9338_vm14, %v4059_v14, %v4063_v9  ;;  %v4445_v55 = vld [vmem:[#allocation4 + $0x1c] sm:$0xf]  ;;  %4396 = vst [vmem:[#allocation3 + $0x38] sm:$0xf] %v4329_v53  ;;  %v4472_v0 = vshll.u32 %v4444_v59, 16 }
 0x264   : > { %v8323_v4 = vld [vmem:[#allocation3 + $0x1fc] ss:$36 sps:$4 sm:$0xff]   ;;  %v7000_v10 = vcombine.low %v4898_v23, %v4903_v61  ;;  %v4074_v2 = vsel %vm9338_vm14, %v4069_v17, %v4073_v6  ;;  %4259 = vst [vmem:[#allocation3 + $0x10] sm:$0xf] %v4064_v3  ;;  %v4478_v43 = vshll.u32 %v4445_v55, 16  ;;  %v4482_v1 = vshrl.u32 %v4445_v55, 16 }
 0x265   : > { %5940 = vmatprep.mubr.bf16.mxu1 %v8323_v4  ;;  %4260 = vst [vmem:[#allocation3 + $0x34] sm:$0xf] %v4074_v2  ;;  %v4030_v41 = vld [vmem:[#allocation4 + $0x18] sm:$0xf]  ;;  %v4471_v29 = vrot.slane %v4469_v21, 4  ;;  %v4474_v47 = vrot.slane %v4472_v0, 5 }
 0x266   : > { %5941 = vmatmul.mubr.bf16.gmra.mxu1 %v7000_v10  ;;  %v4031_v51 = vld [vmem:[#allocation4 + $0x1c] sm:$0xf]  ;;  %v4032_v22 = vld [vmem:[#allocation4 + $0x20] sm:$0x1]  ;;  %v4076_v5 = vshrl.u32 %v4030_v41, 16  ;;  %v4480_v19 = vrot.slane %v4478_v43, 5 }
 0x267   : > { %v4484_v8 = vrot.slane %v4482_v1, 4  ;;  %v4490_v38 = vrot.slane %v4488_v28, 5  ;;  %v4278_v42 = vld [vmem:[#allocation4 + $0x18] sm:$0xe]  ;;  %v4079_v44 = vshll.u32 %v4030_v41, 16  ;;  %v4085_v35 = vshll.u32 %v4031_v51, 16 }
 0x268   : > { %v4078_v25 = vrot.slane %v4076_v5, 4  ;;  %v4089_v57 = vshrl.u32 %v4031_v51, 16  ;;  %v4279_v15 = vld [vmem:[#allocation4 + $0x1c] sm:$0xf]  ;;  %v4475_v39 = vor.u32 %v4474_v47, %v4471_v29  ;;  %v4095_v49 = vshll.u32 %v4032_v22, 16  ;;  %v8345_v6 = vld [vmem:[%s9929_s3 + $0x230] sm:$0xff]  }
 0x269   : > { %v4485_v13 = vor.u32 %v4484_v8, %v4480_v19  ;;  %v4280_v63 = vld [vmem:[#allocation4 + $0x20] sm:$0x1]  ;;  %v6922_v46 = vrot.slane %v4278_v42, 9  ;;  %v4081_v12 = vrot.slane %v4079_v44, 5  ;;  %v4087_v33 = vrot.slane %v4085_v35, 5 }
 0x26a   : > { %v4091_v50 = vrot.slane %v4089_v57, 4  ;;  %v4332_v56 = vrot.slane %v4279_v15, 5  ;;  %v4476_v27 = vrot.slane %v4475_v39, 4  ;;  %v4097_v60 = vrot.slane %v4095_v49, 5  ;;  %v4414_v30 = vld [vmem:[#allocation4 + $0x24] sm:$0xf] }
 0x26b   : > { %v4486_v52 = vrot.slane %v4485_v13, 4  ;;  %v4335_v7 = vrot.slane %v4280_v63, 5  ;;  %v4082_v62 = vor.u32 %v4081_v12, %v4078_v25  ;;  %4430 = vst [vmem:[#allocation3 + $0x60] sm:$0xf] %v4414_v30  ;;  %v8336_v58 = vld [vmem:[#allocation3 + $0x14] ss:$36 sps:$4 sm:$0xff]  }
 0x26c   : > { %v8334_v9 = vld [vmem:[#allocation3 + $0x10] ss:$36 sps:$4 sm:$0xff]   ;;  %v4092_v23 = vor.u32 %v4091_v50, %v4087_v33  ;;  %v4333_v61 = vsel %vm9332_vm13, %v6922_v46, %v4332_v56  ;;  %v4334_v4 = vrot.slane %v4332_v56, 4  ;;  %v4481_v31 = vsel %vm9338_vm14, %v4476_v27, %v4480_v19  ;;  %v4415_v11 = vld [vmem:[#allocation4 + $0x28] sm:$0xf]  ;;  %6078 = vmatprep.mubr.bf16.mxu1 %v8336_v58  ;;  %v8352_v12 = vld [vmem:[%s9929_s3 + $0x228] sm:$0xff]  }
 0x26d   : > { %v4491_v10 = vsel %vm9338_vm14, %v4486_v52, %v4490_v38  ;;  %4397 = vst [vmem:[#allocation3 + $0x5c] sm:$0xf] %v4333_v61  ;;  %v4447_v32 = vld [vmem:[#allocation4 + $0x24] sm:$0xf]  ;;  %4676 = vst [vmem:[#allocation3 + $0x1c] sm:$0xf] %v4481_v31 }
 0x26e   : > { %4677 = vst [vmem:[#allocation3 + $0x40] sm:$0xf] %v4491_v10  ;;  %v4083_v34 = vrot.slane %v4082_v62, 4  ;;  %v4093_v36 = vrot.slane %v4092_v23, 4  ;;  %v4336_v16 = vsel %vm9332_vm13, %v4334_v4, %v4335_v7  ;;  %4431 = vst [vmem:[#allocation3 + $0x84] sm:$0xf] %v4415_v11  ;;  %6079 = vmatmul.mubr.bf16.vlgmr.msra.gmra.mxu1 %v8334_v9 }
 0x26f   : > { %v4448_v18 = vld [vmem:[#allocation4 + $0x28] sm:$0xf]  ;;  %v4449_v14 = vld [vmem:[#allocation4 + $0x2c] sm:$0x1]  ;;  %4398 = vst [vmem:[#allocation3 + $0x80] sm:$0xf] %v4336_v16  ;;  %7922 = vmatpush3.bf16.msra.mxu1 %v9504_v26 }
 0x270   : > { %v4493_v17 = vshrl.u32 %v4447_v32, 16  ;;  %v4496_v20 = vshll.u32 %v4447_v32, 16  ;;  %v4502_v48 = vshll.u32 %v4448_v18, 16  ;;  %v4506_v24 = vshrl.u32 %v4448_v18, 16  ;;  %v4033_v45 = vld [vmem:[#allocation4 + $0x24] sm:$0xf]  ;;  %7923 = vmatprep.subr.bf16.mxu1 %v8345_v6 }
 0x271   : > { %v4088_v59 = vsel %vm9338_vm14, %v4083_v34, %v4087_v33  ;;  %v4098_v3 = vsel %vm9338_vm14, %v4093_v36, %v4097_v60  ;;  %v4512_v2 = vshll.u32 %v4449_v14, 16  ;;  %v4034_v53 = vld [vmem:[#allocation4 + $0x28] sm:$0xf]  ;;  %v4035_v55 = vld [vmem:[#allocation4 + $0x2c] sm:$0x1]  ;;  %v4100_v37 = vshrl.u32 %v4033_v45, 16 }
 0x272   : > { %4261 = vst [vmem:[#allocation3 + $0x58] sm:$0xf] %v4088_v59  ;;  %4262 = vst [vmem:[#allocation3 + $0x7c] sm:$0xf] %v4098_v3  ;;  %v4495_v21 = vrot.slane %v4493_v17, 4  ;;  %v4498_v0 = vrot.slane %v4496_v20, 5 }
 0x273   : > { %v4504_v43 = vrot.slane %v4502_v48, 5  ;;  %v4508_v1 = vrot.slane %v4506_v24, 4  ;;  %v4281_v28 = vld [vmem:[#allocation4 + $0x24] sm:$0xe]  ;;  %v4514_v41 = vrot.slane %v4512_v2, 5  ;;  %v4102_v29 = vrot.slane %v4100_v37, 4  ;;  %7924 = vmatpush3.bf16.msra.mxu1 %v8345_v6 }
 0x274   : > { %v4103_v51 = vshll.u32 %v4033_v45, 16  ;;  %v4109_v22 = vshll.u32 %v4034_v53, 16  ;;  %v4282_v5 = vld [vmem:[#allocation4 + $0x28] sm:$0xf]  ;;  %v4499_v47 = vor.u32 %v4498_v0, %v4495_v21  ;;  %v4113_v8 = vshrl.u32 %v4034_v53, 16  ;;  %v8359_v33 = vld [vmem:[%s9929_s3 + $0x220] sm:$0xff]   ;;  %7925 = vmatprep.subr.bf16.mxu1 %v8352_v12 }
 0x275   : > { %v4509_v19 = vor.u32 %v4508_v1, %v4504_v43  ;;  %v4119_v38 = vshll.u32 %v4035_v55, 16  ;;  %v4283_v42 = vld [vmem:[#allocation4 + $0x2c] sm:$0x1]  ;;  %v6923_v44 = vrot.slane %v4281_v28, 9  ;;  %v4339_v35 = vrot.slane %v4282_v5, 5 }
 0x276   : > { %v4105_v25 = vrot.slane %v4103_v51, 5  ;;  %v4111_v26 = vrot.slane %v4109_v22, 5  ;;  %v8339_v57 = vld [vmem:[#allocation3 + $0x18] ss:$36 sps:$4 sm:$0xff]   ;;  %v4500_v15 = vrot.slane %v4499_v47, 4  ;;  %v4115_v63 = vrot.slane %v4113_v8, 4 }
 0x277   : > { %v4510_v39 = vrot.slane %v4509_v19, 4  ;;  %v8341_v13 = vld [vmem:[#allocation3 + $0x1c] ss:$36 sps:$4 sm:$0xff]   ;;  %v4340_v46 = vsel %vm9332_vm13, %v6923_v44, %v4339_v35  ;;  %v4341_v27 = vrot.slane %v4339_v35, 4  ;;  %v4342_v52 = vrot.slane %v4283_v42, 5  ;;  %7926 = vmatpush3.bf16.msra.mxu1 %v8352_v12 }
 0x278   : > { %v4106_v49 = vor.u32 %v4105_v25, %v4102_v29  ;;  %v4505_v50 = vsel %vm9338_vm14, %v4500_v15, %v4504_v43  ;;  %4399 = vst [vmem:[#allocation3 + $0xa4] sm:$0xf] %v4340_v46  ;;  %v4416_v60 = vld [vmem:[#allocation4 + $0x30] sm:$0xf]  ;;  %v4417_v7 = vld [vmem:[#allocation4 + $0x34] sm:$0xf]  ;;  %6175 = vmatprep.mubr.bf16.mxu0 %v8341_v13  ;;  %v4116_v62 = vor.u32 %v4115_v63, %v4111_v26 }
 0x279   : > { %v4515_v56 = vsel %vm9338_vm14, %v4510_v39, %v4514_v41  ;;  %v8342_v30 = vld [vmem:[#allocation3 + $0x5c] ss:$36 sps:$4 sm:$0xff]   ;;  %4678 = vst [vmem:[#allocation3 + $0x64] sm:$0xf] %v4505_v50  ;;  %v4121_v23 = vrot.slane %v4119_v38, 5  ;;  %6176 = vmatmul.mubr.bf16.vlgmr.msra.gmra.mxu0 %v8339_v57  ;;  %v4343_v4 = vsel %vm9332_vm13, %v4341_v27, %v4342_v52  ;;  %7927 = vmatprep.subr.bf16.mxu1 %v8359_v33  ;;  %v8373_v41 = vld [vmem:[%s9929_s3 + $0x210] sm:$0xff]  }
 0x27a   : > { %4679 = vst [vmem:[#allocation3 + $0x88] sm:$0xf] %v4515_v56  ;;  %v4107_v9 = vrot.slane %v4106_v49, 4  ;;  %4432 = vst [vmem:[#allocation3 + $0xa8] sm:$0xf] %v4416_v60  ;;  %6086 = vmatprep.mubr.bf16.mxu1 %v8342_v30  ;;  %v4117_v10 = vrot.slane %v4116_v62, 4 }
 0x27b   : > { %4433 = vst [vmem:[#allocation3 + $0xcc] sm:$0xf] %v4417_v7  ;;  %v8344_v61 = vld [vmem:[#allocation3 + $0x58] ss:$36 sps:$4 sm:$0xff]   ;;  %v4450_v6 = vld [vmem:[#allocation4 + $0x30] sm:$0xf]  ;;  %7928 = vmatpush3.bf16.msra.mxu1 %v8359_v33 }
 0x27c   : > { %v4451_v58 = vld [vmem:[#allocation4 + $0x34] sm:$0xf]  ;;  %v4112_v31 = vsel %vm9338_vm14, %v4107_v9, %v4111_v26  ;;  %4400 = vst [vmem:[#allocation3 + $0xc8] sm:$0xf] %v4343_v4  ;;  %v4452_v11 = vld [vmem:[#allocation4 + $0x38] sm:$0x1]  ;;  %6087 = vmatmul.mubr.bf16.gmra.mxu1 %v8344_v61  ;;  %v4122_v20 = vsel %vm9338_vm14, %v4117_v10, %v4121_v23 }
 0x27d   : > { %v4517_v32 = vshrl.u32 %v4450_v6, 16  ;;  %v4520_v34 = vshll.u32 %v4450_v6, 16  ;;  %v8366_v36 = vld [vmem:[%s9929_s3 + $0x218] sm:$0xff]   ;;  %4263 = vst [vmem:[#allocation3 + $0xa0] sm:$0xf] %v4112_v31  ;;  %v4526_v16 = vshll.u32 %v4451_v58, 16 }
 0x27e   : > { %v4530_v18 = vshrl.u32 %v4451_v58, 16  ;;  %v4536_v14 = vshll.u32 %v4452_v11, 16  ;;  %v4036_v17 = vld [vmem:[#allocation4 + $0x30] sm:$0xf]  ;;  %v4037_v45 = vld [vmem:[#allocation4 + $0x34] sm:$0xf]  ;;  %7929 = vmatprep.subr.bf16.mxu1 %v8366_v36 }
 0x27f   : > { %v4519_v48 = vrot.slane %v4517_v32, 4  ;;  %v4522_v24 = vrot.slane %v4520_v34, 5  ;;  %v4038_v59 = vld [vmem:[#allocation4 + $0x38] sm:$0x1]  ;;  %4264 = vst [vmem:[#allocation3 + $0xc4] sm:$0xf] %v4122_v20  ;;  %7930 = vmatpush3.bf16.msra.mxu1 %v8366_v36 }
 0x280   : > { %v4528_v3 = vrot.slane %v4526_v16, 5  ;;  %v4532_v2 = vrot.slane %v4530_v18, 4  ;;  %v4538_v53 = vrot.slane %v4536_v14, 5  ;;  %v4124_v55 = vshrl.u32 %v4036_v17, 16  ;;  %v4284_v37 = vld [vmem:[#allocation4 + $0x30] sm:$0xe]  ;;  %7931 = vmatprep.subr.bf16.mxu1 %v8373_v41 }
 0x281   : > { %v4523_v21 = vor.u32 %v4522_v24, %v4519_v48  ;;  %v4127_v0 = vshll.u32 %v4036_v17, 16  ;;  %v4133_v43 = vshll.u32 %v4037_v45, 16  ;;  %v4137_v1 = vshrl.u32 %v4037_v45, 16  ;;  %v4285_v28 = vld [vmem:[#allocation4 + $0x34] sm:$0xf]  ;;  %v8380_v57 = vld [vmem:[%s9929_s3 + $0x208] sm:$0xff]  }
 0x282   : > { %v8346_v29 = vld [vmem:[#allocation3 + $0x64] ss:$36 sps:$4 sm:$0xff]   ;;  %v4533_v51 = vor.u32 %v4532_v2, %v4528_v3  ;;  %v4126_v22 = vrot.slane %v4124_v55, 4  ;;  %v4143_v5 = vshll.u32 %v4038_v59, 16  ;;  %v6924_v44 = vrot.slane %v4284_v37, 9 }
 0x283   : > { %v8348_v47 = vld [vmem:[#allocation3 + $0x60] ss:$36 sps:$4 sm:$0xff]   ;;  %v4524_v19 = vrot.slane %v4523_v21, 4  ;;  %v4129_v8 = vrot.slane %v4127_v0, 5  ;;  %v4135_v38 = vrot.slane %v4133_v43, 5  ;;  %v4139_v42 = vrot.slane %v4137_v1, 4  ;;  %6183 = vmatprep.mubr.bf16.mxu0 %v8346_v29  ;;  %7932 = vmatpush3.bf16.msra.mxu1 %v8373_v41 }
 0x284   : > { %v4534_v25 = vrot.slane %v4533_v51, 4  ;;  %v4286_v26 = vld [vmem:[#allocation4 + $0x38] sm:$0x1]  ;;  %v4346_v35 = vrot.slane %v4285_v28, 5  ;;  %6184 = vmatmul.mubr.bf16.gmra.mxu0 %v8348_v47  ;;  %v4145_v46 = vrot.slane %v4143_v5, 5  ;;  %7933 = vmatprep.subr.bf16.mxu1 %v8380_v57  ;;  %v8387_v31 = vld [vmem:[%s9929_s3 + $0x200] sm:$0xff]  }
 0x285   : > { %v4529_v15 = vsel %vm9338_vm14, %v4524_v19, %v4528_v3  ;;  %v4130_v39 = vor.u32 %v4129_v8, %v4126_v22  ;;  %v4140_v13 = vor.u32 %v4139_v42, %v4135_v38  ;;  %v4349_v49 = vrot.slane %v4286_v26, 5  ;;  %v4418_v50 = vld [vmem:[#allocation4 + $0x3c] sm:$0xf]  ;;  %v4419_v56 = vld [vmem:[#allocation4 + $0x40] sm:$0xf] }
 0x286   : > { %v4539_v63 = vsel %vm9338_vm14, %v4534_v25, %v4538_v53  ;;  %4680 = vst [vmem:[#allocation3 + $0xac] sm:$0xf] %v4529_v15  ;;  %v4347_v12 = vsel %vm9332_vm13, %v6924_v44, %v4346_v35  ;;  %v4348_v33 = vrot.slane %v4346_v35, 4  ;;  %v8349_v27 = vld [vmem:[#allocation3 + $0xa4] ss:$36 sps:$4 sm:$0xff]  }
 0x287   : > { %v8351_v52 = vld [vmem:[#allocation3 + $0xa0] ss:$36 sps:$4 sm:$0xff]   ;;  %4681 = vst [vmem:[#allocation3 + $0xd0] sm:$0xf] %v4539_v63  ;;  %v4131_v60 = vrot.slane %v4130_v39, 4  ;;  %v4141_v7 = vrot.slane %v4140_v13, 4  ;;  %6094 = vmatprep.mubr.bf16.mxu1 %v8349_v27  ;;  %7934 = vmatpush3.bf16.msra.mxu1 %v8380_v57 }
 0x288   : > { %4401 = vst [vmem:[#allocation3 + $0xec] sm:$0xf] %v4347_v12  ;;  %4434 = vst [vmem:[#allocation3 + $0xf0] sm:$0xf] %v4418_v50  ;;  %v4350_v30 = vsel %vm9332_vm13, %v4348_v33, %v4349_v49  ;;  %v4453_v9 = vld [vmem:[#allocation4 + $0x3c] sm:$0xf]  ;;  %6095 = vmatmul.mubr.bf16.gmra.mxu1 %v8351_v52  ;;  %7935 = vmatprep.subr.bf16.mxu1 %v8387_v31 }
 0x289   : > { %4435 = vst [vmem:[#allocation3 + $0x114] sm:$0xf] %v4419_v56  ;;  %v4454_v62 = vld [vmem:[#allocation4 + $0x40] sm:$0xf]  ;;  %v4136_v23 = vsel %vm9338_vm14, %v4131_v60, %v4135_v38  ;;  %4402 = vst [vmem:[#allocation3 + $0x110] sm:$0xf] %v4350_v30  ;;  %v4146_v10 = vsel %vm9338_vm14, %v4141_v7, %v4145_v46 }
 0x28a   : > { %v4455_v61 = vld [vmem:[#allocation4 + $0x44] sm:$0x1]  ;;  %v4541_v4 = vshrl.u32 %v4453_v9, 16  ;;  %v4544_v6 = vshll.u32 %v4453_v9, 16  ;;  %v4550_v58 = vshll.u32 %v4454_v62, 16  ;;  %v4554_v11 = vshrl.u32 %v4454_v62, 16 }
 0x28b   : > { %4265 = vst [vmem:[#allocation3 + $0xe8] sm:$0xf] %v4136_v23  ;;  %v4560_v32 = vshll.u32 %v4455_v61, 16  ;;  %v4039_v34 = vld [vmem:[#allocation4 + $0x3c] sm:$0xf]  ;;  %7936 = vmatpush3.bf16.msra.mxu1 %v8387_v31 }
 0x28c   : > { %v4040_v36 = vld [vmem:[#allocation4 + $0x40] sm:$0xf]  ;;  %4266 = vst [vmem:[#allocation3 + $0x10c] sm:$0xf] %v4146_v10  ;;  %v4543_v16 = vrot.slane %v4541_v4, 4  ;;  %v4546_v18 = vrot.slane %v4544_v6, 5 }
 0x28d   : > { %v4552_v14 = vrot.slane %v4550_v58, 5  ;;  %v4041_v17 = vld [vmem:[#allocation4 + $0x44] sm:$0x1]  ;;  %v4148_v20 = vshrl.u32 %v4039_v34, 16  ;;  %v4556_v48 = vrot.slane %v4554_v11, 4  ;;  %v4562_v24 = vrot.slane %v4560_v32, 5 }
 0x28e   : > { %v4151_v45 = vshll.u32 %v4039_v34, 16  ;;  %v4157_v59 = vshll.u32 %v4040_v36, 16  ;;  %v4287_v3 = vld [vmem:[#allocation4 + $0x3c] sm:$0xe]  ;;  %v4547_v2 = vor.u32 %v4546_v18, %v4543_v16  ;;  %v4161_v55 = vshrl.u32 %v4040_v36, 16 }
 0x28f   : > { %v4150_v53 = vrot.slane %v4148_v20, 4  ;;  %v4167_v37 = vshll.u32 %v4041_v17, 16  ;;  %v4288_v21 = vld [vmem:[#allocation4 + $0x40] sm:$0xf]  ;;  %v8355_v43 = vld [vmem:[#allocation3 + $0xa8] ss:$36 sps:$4 sm:$0xff]   ;;  %v4557_v1 = vor.u32 %v4556_v48, %v4552_v14 }
 0x290   : > { %v8353_v0 = vld [vmem:[#allocation3 + $0xac] ss:$36 sps:$4 sm:$0xff]   ;;  %v4153_v28 = vrot.slane %v4151_v45, 5  ;;  %v4548_v41 = vrot.slane %v4547_v2, 4  ;;  %v4159_v29 = vrot.slane %v4157_v59, 5  ;;  %v4163_v51 = vrot.slane %v4161_v55, 4 }
 0x291   : > { %v4169_v22 = vrot.slane %v4167_v37, 5  ;;  %v4289_v5 = vld [vmem:[#allocation4 + $0x44] sm:$0x1]  ;;  %6191 = vmatprep.mubr.bf16.mxu0 %v8353_v0  ;;  %v4558_v47 = vrot.slane %v4557_v1, 4  ;;  %v6925_v8 = vrot.slane %v4287_v3, 9  ;;  %v4353_v38 = vrot.slane %v4288_v21, 5 }
 0x292   : > { %v4154_v19 = vor.u32 %v4153_v28, %v4150_v53  ;;  %6192 = vmatmul.mubr.bf16.gmra.mxu0 %v8355_v43  ;;  %v4553_v42 = vsel %vm9338_vm14, %v4548_v41, %v4552_v14  ;;  %v4164_v25 = vor.u32 %v4163_v51, %v4159_v29  ;;  %v4356_v26 = vrot.slane %v4289_v5, 5  ;;  %v4420_v44 = vld [vmem:[#allocation4 + $0x48] sm:$0xf]  ;;  %v8356_v35 = vld [vmem:[#allocation3 + $0xec] ss:$36 sps:$4 sm:$0xff]  }
 0x293   : > { %v8358_v57 = vld [vmem:[#allocation3 + $0xe8] ss:$36 sps:$4 sm:$0xff]   ;;  %v4563_v15 = vsel %vm9338_vm14, %v4558_v47, %v4562_v24  ;;  %4682 = vst [vmem:[#allocation3 + $0xf4] sm:$0xf] %v4553_v42  ;;  %v4354_v13 = vsel %vm9332_vm13, %v6925_v8, %v4353_v38  ;;  %4436 = vst [vmem:[#allocation3 + $0x138] sm:$0xf] %v4420_v44  ;;  %6102 = vmatprep.mubr.bf16.mxu1 %v8356_v35 }
 0x294   : > { %v4155_v39 = vrot.slane %v4154_v19, 4  ;;  %4683 = vst [vmem:[#allocation3 + $0x118] sm:$0xf] %v4563_v15  ;;  %v4165_v49 = vrot.slane %v4164_v25, 4  ;;  %v4355_v63 = vrot.slane %v4353_v38, 4  ;;  %6103 = vmatmul.mubr.bf16.gmra.mxu1 %v8358_v57 }
 0x295   : > { %4403 = vst [vmem:[#allocation3 + $0x134] sm:$0xf] %v4354_v13  ;;  %v4421_v46 = vld [vmem:[#allocation4 + $0x4c] sm:$0xf]  ;;  %v4456_v12 = vld [vmem:[#allocation4 + $0x48] sm:$0xf] }
 0x296   : > { %v4160_v33 = vsel %vm9338_vm14, %v4155_v39, %v4159_v29  ;;  %4437 = vst [vmem:[#allocation3 + $0x15c] sm:$0xf] %v4421_v46  ;;  %v4457_v50 = vld [vmem:[#allocation4 + $0x4c] sm:$0xf]  ;;  %v4458_v56 = vld [vmem:[#allocation4 + $0x50] sm:$0x1]  ;;  %v4170_v60 = vsel %vm9338_vm14, %v4165_v49, %v4169_v22  ;;  %v4357_v7 = vsel %vm9332_vm13, %v4355_v63, %v4356_v26 }
 0x297   : > { %v4565_v27 = vshrl.u32 %v4456_v12, 16  ;;  %v4568_v52 = vshll.u32 %v4456_v12, 16  ;;  %4267 = vst [vmem:[#allocation3 + $0x130] sm:$0xf] %v4160_v33  ;;  %v4574_v30 = vshll.u32 %v4457_v50, 16  ;;  %v4578_v9 = vshrl.u32 %v4457_v50, 16 }
 0x298   : > { %v4042_v62 = vld [vmem:[#allocation4 + $0x48] sm:$0xf]  ;;  %v4043_v23 = vld [vmem:[#allocation4 + $0x4c] sm:$0xf]  ;;  %4268 = vst [vmem:[#allocation3 + $0x154] sm:$0xf] %v4170_v60 }
 0x299   : > { %4404 = vst [vmem:[#allocation3 + $0x158] sm:$0xf] %v4357_v7  ;;  %v4567_v61 = vrot.slane %v4565_v27, 4  ;;  %v4570_v4 = vrot.slane %v4568_v52, 5  ;;  %v4584_v6 = vshll.u32 %v4458_v56, 16  ;;  %v4172_v31 = vshrl.u32 %v4042_v62, 16 }
 0x29a   : > { %v4044_v58 = vld [vmem:[#allocation4 + $0x50] sm:$0x1]  ;;  %v4576_v10 = vrot.slane %v4574_v30, 5  ;;  %v4580_v11 = vrot.slane %v4578_v9, 4  ;;  %v4175_v32 = vshll.u32 %v4042_v62, 16  ;;  %v4181_v34 = vshll.u32 %v4043_v23, 16 }
 0x29b   : > { %v4290_v36 = vld [vmem:[#allocation4 + $0x48] sm:$0xe]  ;;  %v4571_v16 = vor.u32 %v4570_v4, %v4567_v61  ;;  %v4586_v18 = vrot.slane %v4584_v6, 5  ;;  %v4174_v14 = vrot.slane %v4172_v31, 4  ;;  %v4185_v17 = vshrl.u32 %v4043_v23, 16 }
 0x29c   : > { %v4291_v20 = vld [vmem:[#allocation4 + $0x4c] sm:$0xf]  ;;  %v4581_v48 = vor.u32 %v4580_v11, %v4576_v10  ;;  %v4177_v24 = vrot.slane %v4175_v32, 5  ;;  %v4183_v45 = vrot.slane %v4181_v34, 5  ;;  %v4191_v59 = vshll.u32 %v4044_v58, 16 }
 0x29d   : > { %v4292_v3 = vld [vmem:[#allocation4 + $0x50] sm:$0x1]  ;;  %v8360_v2 = vld [vmem:[#allocation3 + $0xf4] ss:$36 sps:$4 sm:$0xff]   ;;  %v4572_v55 = vrot.slane %v4571_v16, 4  ;;  %v4187_v0 = vrot.slane %v4185_v17, 4 }
 0x29e   : > { %v8362_v53 = vld [vmem:[#allocation3 + $0xf0] ss:$36 sps:$4 sm:$0xff]   ;;  %v4582_v37 = vrot.slane %v4581_v48, 4  ;;  %v4178_v21 = vor.u32 %v4177_v24, %v4174_v14  ;;  %v4193_v43 = vrot.slane %v4191_v59, 5  ;;  %6199 = vmatprep.mubr.bf16.mxu0 %v8360_v2  ;;  %v6926_v28 = vrot.slane %v4290_v36, 9 }
 0x29f   : > { %v4577_v1 = vsel %vm9338_vm14, %v4572_v55, %v4576_v10  ;;  %v4360_v41 = vrot.slane %v4291_v20, 5  ;;  %v4363_v29 = vrot.slane %v4292_v3, 5  ;;  %6200 = vmatmul.mubr.bf16.gmra.mxu0 %v8362_v53  ;;  %v8365_v22 = vld [vmem:[#allocation3 + $0x130] ss:$36 sps:$4 sm:$0xff]   ;;  %v4188_v19 = vor.u32 %v4187_v0, %v4183_v45  ;;  %v4422_v42 = vld [vmem:[#allocation4 + $0x54] sm:$0xf] }
 0x2a0   : > { %v8363_v51 = vld [vmem:[#allocation3 + $0x134] ss:$36 sps:$4 sm:$0xff]   ;;  %v4587_v5 = vsel %vm9338_vm14, %v4582_v37, %v4586_v18  ;;  %4684 = vst [vmem:[#allocation3 + $0x13c] sm:$0xf] %v4577_v1  ;;  %v4179_v47 = vrot.slane %v4178_v21, 4 }
 0x2a1   : > { %4685 = vst [vmem:[#allocation3 + $0x160] sm:$0xf] %v4587_v5  ;;  %v4361_v8 = vsel %vm9332_vm13, %v6926_v28, %v4360_v41  ;;  %v4362_v38 = vrot.slane %v4360_v41, 4  ;;  %v4423_v25 = vld [vmem:[#allocation4 + $0x58] sm:$0xf]  ;;  %6110 = vmatprep.mubr.bf16.mxu1 %v8363_v51  ;;  %v4189_v44 = vrot.slane %v4188_v19, 4 }
 0x2a2   : > { %v4184_v26 = vsel %vm9338_vm14, %v4179_v47, %v4183_v45  ;;  %4405 = vst [vmem:[#allocation3 + $0x17c] sm:$0xf] %v4361_v8  ;;  %4438 = vst [vmem:[#allocation3 + $0x180] sm:$0xf] %v4422_v42  ;;  %v4459_v35 = vld [vmem:[#allocation4 + $0x54] sm:$0xf]  ;;  %6111 = vmatmul.mubr.bf16.gmra.mxu1 %v8365_v22 }
 0x2a3   : > { %4439 = vst [vmem:[#allocation3 + $0x1a4] sm:$0xf] %v4423_v25  ;;  %v4460_v57 = vld [vmem:[#allocation4 + $0x58] sm:$0xf]  ;;  %4269 = vst [vmem:[#allocation3 + $0x178] sm:$0xf] %v4184_v26  ;;  %v4364_v15 = vsel %vm9332_vm13, %v4362_v38, %v4363_v29  ;;  %v4194_v46 = vsel %vm9338_vm14, %v4189_v44, %v4193_v43 }
 0x2a4   : > { %v4461_v39 = vld [vmem:[#allocation4 + $0x5c] sm:$0x1]  ;;  %v4589_v13 = vshrl.u32 %v4459_v35, 16  ;;  %v4592_v49 = vshll.u32 %v4459_v35, 16  ;;  %v4598_v63 = vshll.u32 %v4460_v57, 16  ;;  %v4602_v12 = vshrl.u32 %v4460_v57, 16 }
 0x2a5   : > { %4406 = vst [vmem:[#allocation3 + $0x1a0] sm:$0xf] %v4364_v15  ;;  %v4608_v33 = vshll.u32 %v4461_v39, 16  ;;  %v4045_v50 = vld [vmem:[#allocation4 + $0x54] sm:$0xf] }
 0x2a6   : > { %v4046_v56 = vld [vmem:[#allocation4 + $0x58] sm:$0xf]  ;;  %4270 = vst [vmem:[#allocation3 + $0x19c] sm:$0xf] %v4194_v46  ;;  %v4591_v27 = vrot.slane %v4589_v13, 4  ;;  %v4594_v52 = vrot.slane %v4592_v49, 5 }
 0x2a7   : > { %v4600_v60 = vrot.slane %v4598_v63, 5  ;;  %v4047_v7 = vld [vmem:[#allocation4 + $0x5c] sm:$0x1]  ;;  %v4196_v30 = vshrl.u32 %v4045_v50, 16  ;;  %v4604_v9 = vrot.slane %v4602_v12, 4  ;;  %v4610_v62 = vrot.slane %v4608_v33, 5 }
 0x2a8   : > { %v4199_v23 = vshll.u32 %v4045_v50, 16  ;;  %v4205_v61 = vshll.u32 %v4046_v56, 16  ;;  %v4293_v4 = vld [vmem:[#allocation4 + $0x54] sm:$0xe]  ;;  %v4595_v6 = vor.u32 %v4594_v52, %v4591_v27  ;;  %v4209_v31 = vshrl.u32 %v4046_v56, 16 }
 0x2a9   : > { %v4198_v58 = vrot.slane %v4196_v30, 4  ;;  %v4215_v10 = vshll.u32 %v4047_v7, 16  ;;  %v4294_v11 = vld [vmem:[#allocation4 + $0x58] sm:$0xf]  ;;  %v8367_v32 = vld [vmem:[#allocation3 + $0x13c] ss:$36 sps:$4 sm:$0xff]   ;;  %v4605_v36 = vor.u32 %v4604_v9, %v4600_v60 }
 0x2aa   : > { %v8369_v34 = vld [vmem:[#allocation3 + $0x138] ss:$36 sps:$4 sm:$0xff]   ;;  %v4201_v16 = vrot.slane %v4199_v23, 5  ;;  %v4596_v18 = vrot.slane %v4595_v6, 4  ;;  %v4207_v14 = vrot.slane %v4205_v61, 5  ;;  %v4211_v17 = vrot.slane %v4209_v31, 4  ;;  %6207 = vmatprep.mubr.bf16.mxu0 %v8367_v32 }
 0x2ab   : > { %v4295_v20 = vld [vmem:[#allocation4 + $0x5c] sm:$0x1]  ;;  %v4606_v48 = vrot.slane %v4605_v36, 4  ;;  %v6927_v45 = vrot.slane %v4293_v4, 9  ;;  %v4367_v59 = vrot.slane %v4294_v11, 5  ;;  %6208 = vmatmul.mubr.bf16.gmra.mxu0 %v8369_v34  ;;  %v4217_v53 = vrot.slane %v4215_v10, 5 }
 0x2ac   : > { %v4202_v24 = vor.u32 %v4201_v16, %v4198_v58  ;;  %v4601_v3 = vsel %vm9338_vm14, %v4596_v18, %v4600_v60  ;;  %v4212_v2 = vor.u32 %v4211_v17, %v4207_v14  ;;  %v4370_v55 = vrot.slane %v4295_v20, 5  ;;  %v4424_v37 = vld [vmem:[#allocation4 + $0x60] sm:$0xf]  ;;  %v8370_v21 = vld [vmem:[#allocation3 + $0x17c] ss:$36 sps:$4 sm:$0xff]  }
 0x2ad   : > { %v8372_v0 = vld [vmem:[#allocation3 + $0x178] ss:$36 sps:$4 sm:$0xff]   ;;  %v4611_v43 = vsel %vm9338_vm14, %v4606_v48, %v4610_v62  ;;  %4686 = vst [vmem:[#allocation3 + $0x184] sm:$0xf] %v4601_v3  ;;  %v4368_v28 = vsel %vm9332_vm13, %v6927_v45, %v4367_v59  ;;  %4440 = vst [vmem:[#allocation3 + $0x1c8] sm:$0xf] %v4424_v37  ;;  %6118 = vmatprep.mubr.bf16.mxu1 %v8370_v21 }
 0x2ae   : > { %v4203_v1 = vrot.slane %v4202_v24, 4  ;;  %4687 = vst [vmem:[#allocation3 + $0x1a8] sm:$0xf] %v4611_v43  ;;  %v4213_v41 = vrot.slane %v4212_v2, 4  ;;  %v4369_v29 = vrot.slane %v4367_v59, 4  ;;  %6119 = vmatmul.mubr.bf16.gmra.mxu1 %v8372_v0 }
 0x2af   : > { %4407 = vst [vmem:[#allocation3 + $0x1c4] sm:$0xf] %v4368_v28  ;;  %v4425_v51 = vld [vmem:[#allocation4 + $0x64] sm:$0xf]  ;;  %v4462_v22 = vld [vmem:[#allocation4 + $0x60] sm:$0xf] }
 0x2b0   : > { %v4208_v5 = vsel %vm9338_vm14, %v4203_v1, %v4207_v14  ;;  %4441 = vst [vmem:[#allocation3 + $0x1ec] sm:$0xf] %v4425_v51  ;;  %v4463_v47 = vld [vmem:[#allocation4 + $0x64] sm:$0xf]  ;;  %v4464_v19 = vld [vmem:[#allocation4 + $0x68] sm:$0x1]  ;;  %v4218_v42 = vsel %vm9338_vm14, %v4213_v41, %v4217_v53  ;;  %v4371_v25 = vsel %vm9332_vm13, %v4369_v29, %v4370_v55 }
 0x2b1   : > { %v4613_v8 = vshrl.u32 %v4462_v22, 16  ;;  %v4616_v38 = vshll.u32 %v4462_v22, 16  ;;  %4271 = vst [vmem:[#allocation3 + $0x1c0] sm:$0xf] %v4208_v5  ;;  %v4622_v26 = vshll.u32 %v4463_v47, 16  ;;  %v4626_v44 = vshrl.u32 %v4463_v47, 16 }
 0x2b2   : > { %v4048_v35 = vld [vmem:[#allocation4 + $0x60] sm:$0xf]  ;;  %v4049_v57 = vld [vmem:[#allocation4 + $0x64] sm:$0xf]  ;;  %4272 = vst [vmem:[#allocation3 + $0x1e4] sm:$0xf] %v4218_v42 }
 0x2b3   : > { %4408 = vst [vmem:[#allocation3 + $0x1e8] sm:$0xf] %v4371_v25  ;;  %v4615_v15 = vrot.slane %v4613_v8, 4  ;;  %v4618_v39 = vrot.slane %v4616_v38, 5  ;;  %v4632_v13 = vshll.u32 %v4464_v19, 16  ;;  %v4220_v63 = vshrl.u32 %v4048_v35, 16 }
 0x2b4   : > { %v4050_v49 = vld [vmem:[#allocation4 + $0x68] sm:$0x1]  ;;  %v4624_v46 = vrot.slane %v4622_v26, 5  ;;  %v4628_v12 = vrot.slane %v4626_v44, 4  ;;  %v4223_v33 = vshll.u32 %v4048_v35, 16  ;;  %v4229_v50 = vshll.u32 %v4049_v57, 16 }
 0x2b5   : > { %v4296_v56 = vld [vmem:[#allocation4 + $0x60] sm:$0xe]  ;;  %v4619_v27 = vor.u32 %v4618_v39, %v4615_v15  ;;  %v4634_v52 = vrot.slane %v4632_v13, 5  ;;  %v4222_v60 = vrot.slane %v4220_v63, 4  ;;  %v4233_v7 = vshrl.u32 %v4049_v57, 16 }
 0x2b6   : > { %v4297_v30 = vld [vmem:[#allocation4 + $0x64] sm:$0xf]  ;;  %v4629_v9 = vor.u32 %v4628_v12, %v4624_v46  ;;  %v4225_v62 = vrot.slane %v4223_v33, 5  ;;  %v4231_v23 = vrot.slane %v4229_v50, 5  ;;  %v4239_v61 = vshll.u32 %v4050_v49, 16 }
 0x2b7   : > { %v4298_v4 = vld [vmem:[#allocation4 + $0x68] sm:$0x1]  ;;  %v8374_v6 = vld [vmem:[#allocation3 + $0x184] ss:$36 sps:$4 sm:$0xff]   ;;  %v4620_v31 = vrot.slane %v4619_v27, 4  ;;  %v4235_v32 = vrot.slane %v4233_v7, 4 }
 0x2b8   : > { %v8376_v58 = vld [vmem:[#allocation3 + $0x180] ss:$36 sps:$4 sm:$0xff]   ;;  %v4630_v10 = vrot.slane %v4629_v9, 4  ;;  %v4226_v11 = vor.u32 %v4225_v62, %v4222_v60  ;;  %v4241_v34 = vrot.slane %v4239_v61, 5  ;;  %6215 = vmatprep.mubr.bf16.mxu0 %v8374_v6  ;;  %v6928_v16 = vrot.slane %v4296_v56, 9 }
 0x2b9   : > { %v4625_v36 = vsel %vm9338_vm14, %v4620_v31, %v4624_v46  ;;  %v4374_v18 = vrot.slane %v4297_v30, 5  ;;  %v4377_v14 = vrot.slane %v4298_v4, 5  ;;  %6216 = vmatmul.mubr.bf16.gmra.mxu0 %v8376_v58  ;;  %v8379_v20 = vld [vmem:[#allocation3 + $0x1c0] ss:$36 sps:$4 sm:$0xff]   ;;  %v4236_v45 = vor.u32 %v4235_v32, %v4231_v23  ;;  %v4426_v2 = vld [vmem:[#allocation4 + $0x6c] sm:$0xf] }
 0x2ba   : > { %v8377_v17 = vld [vmem:[#allocation3 + $0x1c4] ss:$36 sps:$4 sm:$0xff]   ;;  %v4635_v48 = vsel %vm9338_vm14, %v4630_v10, %v4634_v52  ;;  %4688 = vst [vmem:[#allocation3 + $0x1cc] sm:$0xf] %v4625_v36  ;;  %v4227_v24 = vrot.slane %v4226_v11, 4 }
 0x2bb   : > { %4689 = vst [vmem:[#allocation3 + $0x1f0] sm:$0xf] %v4635_v48  ;;  %v4375_v59 = vsel %vm9332_vm13, %v6928_v16, %v4374_v18  ;;  %v4376_v3 = vrot.slane %v4374_v18, 4  ;;  %v4427_v53 = vld [vmem:[#allocation4 + $0x70] sm:$0xf]  ;;  %6126 = vmatprep.mubr.bf16.mxu1 %v8377_v17  ;;  %v4237_v37 = vrot.slane %v4236_v45, 4 }
 0x2bc   : > { %v4232_v55 = vsel %vm9338_vm14, %v4227_v24, %v4231_v23  ;;  %4409 = vst [vmem:[#allocation3 + $0x20c] sm:$0xf] %v4375_v59  ;;  %4442 = vst [vmem:[#allocation3 + $0x210] sm:$0xf] %v4426_v2  ;;  %v4465_v21 = vld [vmem:[#allocation4 + $0x6c] sm:$0xf]  ;;  %6127 = vmatmul.mubr.bf16.gmra.mxu1 %v8379_v20 }
 0x2bd   : > { %4443 = vst [vmem:[#allocation3 + $0x234] sm:$0xf] %v4427_v53  ;;  %v4466_v0 = vld [vmem:[#allocation4 + $0x70] sm:$0xf]  ;;  %4273 = vst [vmem:[#allocation3 + $0x208] sm:$0xf] %v4232_v55  ;;  %v4378_v43 = vsel %vm9332_vm13, %v4376_v3, %v4377_v14  ;;  %v4242_v51 = vsel %vm9338_vm14, %v4237_v37, %v4241_v34 }
 0x2be   : > { %v4467_v1 = vld [vmem:[#allocation4 + $0x74] sm:$0x1]  ;;  %v4637_v28 = vshrl.u32 %v4465_v21, 16  ;;  %v4640_v41 = vshll.u32 %v4465_v21, 16  ;;  %v4646_v29 = vshll.u32 %v4466_v0, 16  ;;  %v4650_v22 = vshrl.u32 %v4466_v0, 16 }
 0x2bf   : > { %4410 = vst [vmem:[#allocation3 + $0x230] sm:$0xf] %v4378_v43  ;;  %v4656_v5 = vshll.u32 %v4467_v1, 16  ;;  %v4692_v47 = vld [vmem:[#allocation4 + $0x18] sm:$0xe] }
 0x2c0   : > { %v4693_v19 = vld [vmem:[#allocation4 + $0x1c] sm:$0xf]  ;;  %4274 = vst [vmem:[#allocation3 + $0x22c] sm:$0xf] %v4242_v51  ;;  %v4639_v8 = vrot.slane %v4637_v28, 4  ;;  %v4642_v38 = vrot.slane %v4640_v41, 5 }
 0x2c1   : > { %v4648_v42 = vrot.slane %v4646_v29, 5  ;;  %v4694_v25 = vld [vmem:[#allocation4 + $0x20] sm:$0x1]  ;;  %v6929_v26 = vrot.slane %v4692_v47, 9  ;;  %v4652_v44 = vrot.slane %v4650_v22, 4  ;;  %v4658_v35 = vrot.slane %v4656_v5, 5 }
 0x2c2   : > { %v4742_v57 = vrot.slane %v4693_v19, 5  ;;  %v4745_v15 = vrot.slane %v4694_v25, 5  ;;  %v4695_v39 = vld [vmem:[#allocation4 + $0x24] sm:$0xe]  ;;  %v4643_v13 = vor.u32 %v4642_v38, %v4639_v8  ;;  %v4696_v49 = vld [vmem:[#allocation4 + $0x28] sm:$0xf] }
 0x2c3   : > { %v4697_v63 = vld [vmem:[#allocation4 + $0x2c] sm:$0x1]  ;;  %v6930_v46 = vrot.slane %v4695_v39, 9  ;;  %v8381_v12 = vld [vmem:[#allocation3 + $0x1cc] ss:$36 sps:$4 sm:$0xff]   ;;  %v4653_v50 = vor.u32 %v4652_v44, %v4648_v42  ;;  %v4749_v60 = vrot.slane %v4696_v49, 5 }
 0x2c4   : > { %v8383_v33 = vld [vmem:[#allocation3 + $0x1c8] ss:$36 sps:$4 sm:$0xff]   ;;  %v4743_v56 = vsel %vm9332_vm13, %v6929_v26, %v4742_v57  ;;  %v4744_v27 = vrot.slane %v4742_v57, 4  ;;  %v4644_v52 = vrot.slane %v4643_v13, 4  ;;  %v4752_v7 = vrot.slane %v4697_v63, 5  ;;  %6223 = vmatprep.mubr.bf16.mxu0 %v8381_v12 }
 0x2c5   : > { %4812 = vst [vmem:[#allocation3 + $0x20] sm:$0xf] %v4743_v56  ;;  %v4698_v30 = vld [vmem:[#allocation4 + $0x30] sm:$0xe]  ;;  %v4654_v9 = vrot.slane %v4653_v50, 4  ;;  %6224 = vmatmul.mubr.bf16.gmra.mxu0 %v8383_v33  ;;  %v4750_v6 = vsel %vm9332_vm13, %v6930_v46, %v4749_v60  ;;  %v4751_v58 = vrot.slane %v4749_v60, 4 }
 0x2c6   : > { %v4746_v62 = vsel %vm9332_vm13, %v4744_v27, %v4745_v15  ;;  %v4699_v23 = vld [vmem:[#allocation4 + $0x34] sm:$0xf]  ;;  %v4700_v61 = vld [vmem:[#allocation4 + $0x38] sm:$0x1]  ;;  %v4649_v4 = vsel %vm9338_vm14, %v4644_v52, %v4648_v42  ;;  %v6931_v31 = vrot.slane %v4698_v30, 9 }
 0x2c7   : > { %4813 = vst [vmem:[#allocation3 + $0x44] sm:$0xf] %v4746_v62  ;;  %v4701_v10 = vld [vmem:[#allocation4 + $0x3c] sm:$0xe]  ;;  %v4702_v11 = vld [vmem:[#allocation4 + $0x40] sm:$0xf]  ;;  %v4659_v36 = vsel %vm9338_vm14, %v4654_v9, %v4658_v35  ;;  %v4753_v18 = vsel %vm9332_vm13, %v4751_v58, %v4752_v7 }
 0x2c8   : > { %v8384_v32 = vld [vmem:[#allocation3 + $0x20c] ss:$36 sps:$4 sm:$0xff]   ;;  %4690 = vst [vmem:[#allocation3 + $0x214] sm:$0xf] %v4649_v4  ;;  %4814 = vst [vmem:[#allocation3 + $0x68] sm:$0xf] %v4750_v6 }
 0x2c9   : > { %v8386_v34 = vld [vmem:[#allocation3 + $0x208] ss:$36 sps:$4 sm:$0xff]   ;;  %v4756_v16 = vrot.slane %v4699_v23, 5  ;;  %4691 = vst [vmem:[#allocation3 + $0x238] sm:$0xf] %v4659_v36  ;;  %v4759_v14 = vrot.slane %v4700_v61, 5  ;;  %6134 = vmatprep.mubr.bf16.mxu1 %v8384_v32 }
 0x2ca   : > { %v4703_v17 = vld [vmem:[#allocation4 + $0x44] sm:$0x1]  ;;  %v6932_v20 = vrot.slane %v4701_v10, 9  ;;  %v4763_v48 = vrot.slane %v4702_v11, 5  ;;  %4815 = vst [vmem:[#allocation3 + $0x8c] sm:$0xf] %v4753_v18  ;;  %6135 = vmatmul.mubr.bf16.gmra.mxu1 %v8386_v34 }
 0x2cb   : > { %v4757_v24 = vsel %vm9332_vm13, %v6931_v31, %v4756_v16  ;;  %v4758_v45 = vrot.slane %v4756_v16, 4  ;;  %v4766_v59 = vrot.slane %v4703_v17, 5  ;;  %v4704_v54 = vld [vmem:[#allocation4 + $0x48] sm:$0xe]  ;;  %v4705_v3 = vld [vmem:[#allocation4 + $0x4c] sm:$0xf] }
 0x2cc   : > { %4816 = vst [vmem:[#allocation3 + $0xb0] sm:$0xf] %v4757_v24  ;;  %v4764_v2 = vsel %vm9332_vm13, %v6932_v20, %v4763_v48  ;;  %v4765_v53 = vrot.slane %v4763_v48, 4  ;;  %v4706_v55 = vld [vmem:[#allocation4 + $0x50] sm:$0x1]  ;;  %v6933_v37 = vrot.slane %v4704_v54, 9 }
 0x2cd   : > { %v4770_v21 = vrot.slane %v4705_v3, 5  ;;  %v4760_v0 = vsel %vm9332_vm13, %v4758_v45, %v4759_v14  ;;  %4818 = vst [vmem:[#allocation3 + $0xf8] sm:$0xf] %v4764_v2  ;;  %v4773_v43 = vrot.slane %v4706_v55, 5  ;;  %v4707_v1 = vld [vmem:[#allocation4 + $0x54] sm:$0xe] }
 0x2ce   : > { %4817 = vst [vmem:[#allocation3 + $0xd4] sm:$0xf] %v4760_v0  ;;  %v4767_v28 = vsel %vm9332_vm13, %v4765_v53, %v4766_v59  ;;  %v4708_v51 = vld [vmem:[#allocation4 + $0x58] sm:$0xf]  ;;  %v4709_v22 = vld [vmem:[#allocation4 + $0x5c] sm:$0x1] }
 0x2cf   : > { %v4771_v41 = vsel %vm9332_vm13, %v6933_v37, %v4770_v21  ;;  %v4772_v29 = vrot.slane %v4770_v21, 4  ;;  %v6934_v5 = vrot.slane %v4707_v1, 9  ;;  %v8391_v47 = vld [vmem:[#allocation3 + $0x20] ss:$36 sps:$4 sm:$0xff]   ;;  %4819 = vst [vmem:[#allocation3 + $0x11c] sm:$0xf] %v4767_v28 }
 0x2d0   : > { %4820 = vst [vmem:[#allocation3 + $0x140] sm:$0xf] %v4771_v41  ;;  %v4777_v19 = vrot.slane %v4708_v51, 5  ;;  %v4780_v8 = vrot.slane %v4709_v22, 5  ;;  %v4710_v42 = vld [vmem:[#allocation4 + $0x60] sm:$0xe]  ;;  %7937 = vmatprep.mubr.bf16.mxu1 %v8391_v47 }
 0x2d1   : > { %v4774_v38 = vsel %vm9332_vm13, %v4772_v29, %v4773_v43  ;;  %v8388_v25 = vld [vmem:[#allocation3 + $0x214] ss:$36 sps:$4 sm:$0xff]   ;;  %v8392_v57 = vld [vmem:[#allocation3 + $0x68] ss:$36 sps:$4 sm:$0xff]   ;;  %v6935_v49 = vrot.slane %v4710_v42, 9 }
 0x2d2   : > { %v8390_v26 = vld [vmem:[#allocation3 + $0x210] ss:$36 sps:$4 sm:$0xff]   ;;  %4821 = vst [vmem:[#allocation3 + $0x164] sm:$0xf] %v4774_v38  ;;  %v4778_v44 = vsel %vm9332_vm13, %v6934_v5, %v4777_v19  ;;  %v4779_v35 = vrot.slane %v4777_v19, 4  ;;  %6231 = vmatprep.mubr.bf16.mxu0 %v8388_v25  ;;  %7938 = vmatmul.mubr.bf16.vlgmr.msra.gmra.mxu1 %v8392_v57 }
 0x2d3   : > { %4822 = vst [vmem:[#allocation3 + $0x188] sm:$0xf] %v4778_v44  ;;  %v4711_v15 = vld [vmem:[#allocation4 + $0x64] sm:$0xf]  ;;  %v4712_v13 = vld [vmem:[#allocation4 + $0x68] sm:$0x1]  ;;  %6232 = vmatmul.mubr.bf16.gmra.mxu0 %v8390_v26 }
 0x2d4   : > { %v4781_v39 = vsel %vm9332_vm13, %v4779_v35, %v4780_v8  ;;  %v4784_v63 = vrot.slane %v4711_v15, 5  ;;  %v4787_v46 = vrot.slane %v4712_v13, 5  ;;  %v4713_v12 = vld [vmem:[#allocation4 + $0x6c] sm:$0xe]  ;;  %v4714_v60 = vld [vmem:[#allocation4 + $0x70] sm:$0xf] }
 0x2d5   : > { %4823 = vst [vmem:[#allocation3 + $0x1ac] sm:$0xf] %v4781_v39  ;;  %v8393_v33 = vld [vmem:[#allocation3 + $0xb0] ss:$36 sps:$4 sm:$0xff]   ;;  %v6936_v27 = vrot.slane %v4713_v12, 9  ;;  %v4791_v9 = vrot.slane %v4714_v60, 5 }
 0x2d6   : > { %v4785_v50 = vsel %vm9332_vm13, %v6935_v49, %v4784_v63  ;;  %v4786_v56 = vrot.slane %v4784_v63, 4  ;;  %7941 = vmatprep.mubr.bf16.mxu1 %v8393_v33  ;;  %v4715_v7 = vld [vmem:[#allocation4 + $0x74] sm:$0x1]  ;;  %v8394_v30 = vld [vmem:[#allocation3 + $0xf8] ss:$36 sps:$4 sm:$0xff]  }
 0x2d7   : > { %4824 = vst [vmem:[#allocation3 + $0x1d0] sm:$0xf] %v4785_v50  ;;  %v4794_v62 = vrot.slane %v4715_v7, 5  ;;  %v4792_v61 = vsel %vm9332_vm13, %v6936_v27, %v4791_v9  ;;  %v4793_v4 = vrot.slane %v4791_v9, 4 }
 0x2d8   : > { %v4788_v52 = vsel %vm9332_vm13, %v4786_v56, %v4787_v46  ;;  %4826 = vst [vmem:[#allocation3 + $0x218] sm:$0xf] %v4792_v61 }
 0x2d9   : > { %4825 = vst [vmem:[#allocation3 + $0x1f4] sm:$0xf] %v4788_v52  ;;  %v8395_v23 = vld [vmem:[#allocation3 + $0x140] ss:$36 sps:$4 sm:$0xff]   ;;  %v4795_v6 = vsel %vm9332_vm13, %v4793_v4, %v4794_v62 }
 0x2da   : > { %7942 = vmatmul.mubr.bf16.gmra.mxu1 %v8394_v30  ;;  %4827 = vst [vmem:[#allocation3 + $0x23c] sm:$0xf] %v4795_v6 }
 0x2db   : > { %7945 = vmatprep.mubr.bf16.mxu1 %v8395_v23 }
 0x2dc   : > { %v8396_v58 = vld [vmem:[#allocation3 + $0x188] ss:$36 sps:$4 sm:$0xff]  }
 0x2de   : > { %v7629_v11 = vpop.f32.mrf.mxu1 }
 0x2df   : > { %v7693_v10 = vpop.f32.mrf.mxu0 }
 0x2e0   : > { %v8397_v31 = vld [vmem:[#allocation3 + $0x1d0] ss:$36 sps:$4 sm:$0xff]   ;;  %v7630_v36 = vpop.f32.mrf.mxu1 }
 0x2e1   : > { %v7694_v32 = vpop.f32.mrf.mxu0  ;;  %v7631_v18 = vadd.f32 %v7630_v36, %v7629_v11  ;;  %v8398_v14 = vld [vmem:[#allocation3 + $0x218] ss:$36 sps:$4 sm:$0xff]  }
 0x2e2   : > { %7946 = vmatmul.mubr.bf16.gmra.mxu1 %v8396_v58  ;;  %v7695_v34 = vadd.f32 %v7694_v32, %v7693_v10  ;;  %v7632_v17 = vpop.f32.mrf.mxu1 }
 0x2e3   : > { %7949 = vmatprep.mubr.bf16.mxu1 %v8397_v31  ;;  %v7696_v16 = vpop.f32.mrf.mxu0 }
 0x2e4   : > { %v9655_v48 = vadd.f32 %v7695_v34, %v7631_v18  ;;  %v7633_v24 = vpop.f32.mrf.mxu1 }
 0x2e5   : > { %v7697_v20 = vpop.f32.mrf.mxu0  ;;  %v7634_v59 = vadd.f32 %v7633_v24, %v7632_v17 }
 0x2e6   : > { %v7698_v40 = vadd.f32 %v7697_v20, %v7696_v16 }
 0x2e7   : > { %v7699_v45 = vpop.f32.mrf.mxu0 }
 0x2e8   : > { %v7635_v54 = vpop.f32.mrf.mxu1  ;;  %v9657_v2 = vadd.f32 %v7698_v40, %v7634_v59 }
 0x2e9   : > { %v7700_v3 = vpop.f32.mrf.mxu0 }
 0x2ea   : > { %7950 = vmatmul.mubr.bf16.gmra.mxu1 %v8398_v14  ;;  %v7701_v53 = vadd.f32 %v7700_v3, %v7699_v45  ;;  %v7636_v55 = vpop.f32.mrf.mxu1 }
 0x2eb   : > { %v7702_v37 = vpop.f32.mrf.mxu0  ;;  %v7637_v21 = vadd.f32 %v7636_v55, %v7635_v54 }
 0x2ec   : > { %v7638_v0 = vpop.f32.mrf.mxu1 }
 0x2ed   : > { %v7703_v43 = vpop.f32.mrf.mxu0  ;;  %v9659_v1 = vadd.f32 %v7701_v53, %v7637_v21 }
 0x2ee   : > { %v7704_v28 = vadd.f32 %v7703_v43, %v7702_v37  ;;  %v7639_v41 = vpop.f32.mrf.mxu1 }
 0x2ef   : > { %v7640_v29 = vadd.f32 %v7639_v41, %v7638_v0  ;;  %v7705_v51 = vpop.f32.mrf.mxu0 }
 0x2f0   : > { %v7641_v5 = vpop.f32.mrf.mxu1 }
 0x2f1   : > { %v9661_v22 = vadd.f32 %v7704_v28, %v7640_v29  ;;  %v7706_v47 = vpop.f32.mrf.mxu0 }
 0x2f2   : > { %v7642_v19 = vpop.f32.mrf.mxu1  ;;  %v7707_v8 = vadd.f32 %v7706_v47, %v7705_v51 }
 0x2f3   : > { %v7643_v38 = vadd.f32 %v7642_v19, %v7641_v5  ;;  %v7708_v42 = vpop.f32.mrf.mxu0 }
 0x2f4   : > { %v7644_v25 = vpop.f32.mrf.mxu1 }
 0x2f5   : > { %v9663_v26 = vadd.f32 %v7707_v8, %v7643_v38  ;;  %v7709_v44 = vpop.f32.mrf.mxu0 }
 0x2f6   : > { %v7645_v35 = vpop.f32.mrf.mxu1  ;;  %v7710_v57 = vadd.f32 %v7709_v44, %v7708_v42 }
 0x2f7   : > { %v7646_v15 = vadd.f32 %v7645_v35, %v7644_v25 }
 0x2f9   : > { %v9665_v39 = vadd.f32 %v7710_v57, %v7646_v15  ;;  %v7647_v13 = vpop.f32.mrf.mxu1  ;;  %v7711_v49 = vpop.f32.mrf.mxu0 }
 0x2fb   : > { %v7648_v63 = vpop.f32.mrf.mxu1  ;;  %v7712_v12 = vpop.f32.mrf.mxu0 }
 0x2fc   : > { %v7649_v46 = vadd.f32 %v7648_v63, %v7647_v13  ;;  %v7713_v33 = vadd.f32 %v7712_v12, %v7711_v49 }
 0x2fd   : > { %v7650_v50 = vpop.f32.mrf.mxu1  ;;  %v7714_v56 = vpop.f32.mrf.mxu0 }
 0x2fe   : > { %v9667_v27 = vadd.f32 %v7713_v33, %v7649_v46 }
 0x2ff   : > { %v7651_v52 = vpop.f32.mrf.mxu1  ;;  %v7715_v7 = vpop.f32.mrf.mxu0 }
 0x300   : > { %v7652_v60 = vadd.f32 %v7651_v52, %v7650_v50  ;;  %v7716_v30 = vadd.f32 %v7715_v7, %v7714_v56 }
 0x301   : > { %v7717_v9 = vpop.f32.mrf.mxu0 }
 0x302   : > { %v9669_v62 = vadd.f32 %v7716_v30, %v7652_v60 }
 0x303   : > { %v7718_v61 = vpop.f32.mrf.mxu0 }
 0x304   : > { %v7719_v6 = vadd.f32 %v7718_v61, %v7717_v9 }
 0x305   : > { %v7653_v23 = vpop.f32.mrf.mxu1  ;;  %v7720_v31 = vpop.f32.mrf.mxu0 }
 0x307   : > { %v7654_v4 = vpop.f32.mrf.mxu1  ;;  %v7721_v32 = vpop.f32.mrf.mxu0 }
 0x308   : > { %v7655_v58 = vadd.f32 %v7654_v4, %v7653_v23  ;;  %v7722_v36 = vadd.f32 %v7721_v32, %v7720_v31 }
 0x309   : > { %v7656_v10 = vpop.f32.mrf.mxu1 }
 0x30a   : > { %v9671_v11 = vadd.f32 %v7719_v6, %v7655_v58 }
 0x30b   : > { %v7657_v34 = vpop.f32.mrf.mxu1  ;;  %v7723_v14 = vpop.f32.mrf.mxu0 }
 0x30c   : > { %9992 = vst [vmem:[#allocation21_spill] sm:$0xff] %v9671_v11  ;;  %v7658_v16 = vadd.f32 %v7657_v34, %v7656_v10 }
 0x30d   : > { %v7724_v20 = vpop.f32.mrf.mxu0 }
 0x30e   : > { %v9673_v18 = vadd.f32 %v7722_v36, %v7658_v16  ;;  %v7725_v40 = vadd.f32 %v7724_v20, %v7723_v14 }
 0x30f   : > { %v7659_v17 = vpop.f32.mrf.mxu1  ;;  %v7726_v45 = vpop.f32.mrf.mxu0 }
 0x310   : > { %9993 = vst [vmem:[#allocation12_spill] sm:$0xff] %v9673_v18 }
 0x311   : > { %v7660_v24 = vpop.f32.mrf.mxu1  ;;  %v7727_v3 = vpop.f32.mrf.mxu0 }
 0x312   : > { %v7661_v59 = vadd.f32 %v7660_v24, %v7659_v17  ;;  %v7728_v55 = vadd.f32 %v7727_v3, %v7726_v45 }
 0x313   : > { %v7662_v54 = vpop.f32.mrf.mxu1 }
 0x314   : > { %v9675_v53 = vadd.f32 %v7725_v40, %v7661_v59 }
 0x315   : > { %v7663_v37 = vpop.f32.mrf.mxu1 }
 0x316   : > { %9994 = vst [vmem:[#allocation22_spill] sm:$0xff] %v9675_v53  ;;  %v7664_v21 = vadd.f32 %v7663_v37, %v7662_v54 }
 0x317   : > { %v7729_v43 = vpop.f32.mrf.mxu0 }
 0x318   : > { %v9677_v0 = vadd.f32 %v7728_v55, %v7664_v21 }
 0x319   : > { %v7730_v41 = vpop.f32.mrf.mxu0 }
 0x31a   : > { %9995 = vst [vmem:[#allocation23_spill] sm:$0xff] %v9677_v0  ;;  %v7665_v28 = vpop.f32.mrf.mxu1  ;;  %v7731_v51 = vadd.f32 %v7730_v41, %v7729_v43 }
 0x31b   : > { %v7732_v47 = vpop.f32.mrf.mxu0 }
 0x31c   : > { %v7666_v29 = vpop.f32.mrf.mxu1 }
 0x31d   : > { %v7667_v5 = vadd.f32 %v7666_v29, %v7665_v28  ;;  %v7733_v38 = vpop.f32.mrf.mxu0 }
 0x31e   : > { %v7668_v19 = vpop.f32.mrf.mxu1  ;;  %v7734_v25 = vadd.f32 %v7733_v38, %v7732_v47 }
 0x31f   : > { %v9679_v8 = vadd.f32 %v7731_v51, %v7667_v5 }
 0x320   : > { %v7669_v42 = vpop.f32.mrf.mxu1 }
 0x321   : > { %9996 = vst [vmem:[#allocation24_spill] sm:$0xff] %v9679_v8  ;;  %v7670_v44 = vadd.f32 %v7669_v42, %v7668_v19 }
 0x323   : > { %v9681_v35 = vadd.f32 %v7734_v25, %v7670_v44  ;;  %v9687_v12 = vpop.f32.mrf.mxu0 }
 0x325   : > { %9997 = vst [vmem:[#allocation13_spill] sm:$0xff] %v9681_v35  ;;  %v9689_v33 = vpop.f32.mrf.mxu0 }
 0x326   : > { %v7671_v57 = vpop.f32.mrf.mxu1 }
 0x327   : > { %v9691_v52 = vpop.f32.mrf.mxu0 }
 0x328   : > { %v7672_v15 = vpop.f32.mrf.mxu1 }
 0x329   : > { %v9683_v13 = vadd.f32 %v7672_v15, %v7671_v57  ;;  %v9693_v7 = vpop.f32.mrf.mxu0 }
 0x32a   : > { %v7674_v49 = vpop.f32.mrf.mxu1 }
 0x32c   : > { %v7675_v63 = vpop.f32.mrf.mxu1 }
 0x32d   : > { %v9685_v46 = vadd.f32 %v7675_v63, %v7674_v49 }
 0x32e   : > { %v7757_v50 = vpop.f32.mrf.mxu1 }
 0x330   : > { %v7758_v56 = vpop.f32.mrf.mxu1 }
 0x332   : > { %v7760_v60 = vpop.f32.mrf.mxu1 }
 0x334   : > { %v7761_v30 = vpop.f32.mrf.mxu1 }
 0x339   : > { %v7821_v9 = vpop.f32.mrf.mxu0 }
 0x33b   : > { %v7822_v23 = vpop.f32.mrf.mxu0 }
 0x33c   : > { %v7763_v61 = vpop.f32.mrf.mxu1 }
 0x33d   : > { %v9695_v4 = vpop.f32.mrf.mxu0 }
 0x33e   : > { %v7764_v6 = vpop.f32.mrf.mxu1 }
 0x33f   : > { %v9697_v58 = vpop.f32.mrf.mxu0 }
 0x340   : > { %v7766_v31 = vpop.f32.mrf.mxu1 }
 0x342   : > { %v7767_v32 = vpop.f32.mrf.mxu1 }
 0x344   : > { %v7827_v10 = vpop.f32.mrf.mxu0 }
 0x346   : > { %v7828_v34 = vpop.f32.mrf.mxu0 }
 0x348   : > { %v7830_v36 = vpop.f32.mrf.mxu0  ;;  %v7769_v16 = vpop.f32.mrf.mxu1 }
 0x34a   : > { %v7770_v14 = vpop.f32.mrf.mxu1  ;;  %v7831_v17 = vpop.f32.mrf.mxu0 }
 0x34c   : > { %v7772_v20 = vpop.f32.mrf.mxu1 }
 0x34e   : > { %v7773_v24 = vpop.f32.mrf.mxu1 }
 0x352   : > { %v9699_v40 = vpop.f32.mrf.mxu0 }
 0x354   : > { %v9701_v45 = vpop.f32.mrf.mxu0  ;;  %v7775_v54 = vpop.f32.mrf.mxu1 }
 0x356   : > { %v9703_v59 = vpop.f32.mrf.mxu0  ;;  %v7776_v3 = vpop.f32.mrf.mxu1 }
 0x358   : > { %v9705_v55 = vpop.f32.mrf.mxu0  ;;  %v7778_v37 = vpop.f32.mrf.mxu1 }
 0x35a   : > { %v7779_v21 = vpop.f32.mrf.mxu1 }
 0x35f   : > { %v7839_v43 = vpop.f32.mrf.mxu0 }
 0x361   : > { %v7840_v28 = vpop.f32.mrf.mxu0 }
 0x362   : > { %v9707_v41 = vpop.f32.mrf.mxu1 }
 0x363   : > { %v9709_v29 = vpop.f32.mrf.mxu0 }
 0x364   : > { %v9711_v51 = vpop.f32.mrf.mxu1 }
 0x365   : > { %v9713_v5 = vpop.f32.mrf.mxu0 }
 0x366   : > { %v9715_v47 = vpop.f32.mrf.mxu1 }
 0x367   : > { %9998 = vst [vmem:[#allocation25_spill] sm:$0xff] %v9715_v47 }
 0x368   : > { %v9719_v38 = vpop.f32.mrf.mxu1 }
 0x369   : > { %10000 = vst [vmem:[#allocation14_spill] sm:$0xff] %v9719_v38 }
 0x36b   : > { %v9717_v19 = vpop.f32.mrf.mxu0 }
 0x36c   : > { %9999 = vst [vmem:[#allocation26_spill] sm:$0xff] %v9717_v19 }
 0x36d   : > { %v9721_v42 = vpop.f32.mrf.mxu0 }
 0x36e   : > { %10001 = vst [vmem:[#allocation27_spill] sm:$0xff] %v9721_v42  ;;  %v9725_v44 = vpop.f32.mrf.mxu1 }
 0x36f   : > { %v9723_v25 = vpop.f32.mrf.mxu0 }
 0x370   : > { %10002 = vst [vmem:[#allocation28_spill] sm:$0xff] %v9723_v25  ;;  %v7788_v57 = vpop.f32.mrf.mxu1 }
 0x371   : > { %v9727_v15 = vpop.f32.mrf.mxu0 }
 0x372   : > { %10003 = vst [vmem:[#allocation15_spill] sm:$0xff] %v9727_v15  ;;  %v9729_v49 = vpop.f32.mrf.mxu1  ;;  %v7765_v15 = vadd.f32 %v7764_v6, %v7763_v61  ;;  %v7777_v61 = vadd.f32 %v7776_v3, %v7775_v54 }
 0x374   : > { %v9731_v63 = vpop.f32.mrf.mxu1 }
 0x375   : > { %10004 = vst [vmem:[#allocation29_spill] sm:$0xff] %v9731_v63 }
 0x379   : > { %v9733_v35 = vpop.f32.mrf.mxu0 }
 0x37a   : > { %10005 = vst [vmem:[#allocation30_spill] sm:$0xff] %v9733_v35  ;;  %v7759_v35 = vadd.f32 %v7758_v56, %v7757_v50  ;;  %v7737_v50 = vadd.f32 %v9689_v33, %v9687_v12 }
 0x37b   : > { %v9735_v8 = vpop.f32.mrf.mxu0 }
 0x37c   : > { %10006 = vst [vmem:[#allocation16_spill] sm:$0xff] %v9735_v8  ;;  %v9737_v18 = vpop.f32.mrf.mxu1  ;;  %v7829_v8 = vadd.f32 %v7828_v34, %v7827_v10 }
 0x37d   : > { %10007 = vst [vmem:[#allocation31_spill] sm:$0xff] %v9737_v18  ;;  %v9741_v38 = vpop.f32.mrf.mxu0  ;;  %v6089_v18 = vadd.f32 %v7765_v15, %v9659_v1 }
 0x37e   : > { %v9739_v0 = vpop.f32.mrf.mxu1  ;;  %10009 = vst [vmem:[#allocation17_spill] sm:$0xff] %v9741_v38  ;;  %v7762_v38 = vadd.f32 %v7761_v30, %v7760_v60  ;;  %v7826_v60 = vadd.f32 %v9697_v58, %v9695_v4  ;;  %v7771_v30 = vadd.f32 %v7770_v14, %v7769_v16  ;;  %v6360_v14 = vld [vmem:[#allocation2 + $0x31] sm:$0xff] }
 0x37f   : > { %10008 = vst [vmem:[#allocation32_spill] sm:$0xff] %v9739_v0  ;;  %v9745_v47 = vpop.f32.mrf.mxu0  ;;  %v7768_v0 = vadd.f32 %v7767_v32, %v7766_v31  ;;  %v6186_v31 = vadd.f32 %v7829_v8, %v6089_v18  ;;  %v6362_v18 = vld [vmem:[#allocation2 + $0x49] sm:$0xff] }
 0x380   : > { %v9743_v25 = vpop.f32.mrf.mxu1  ;;  %10011 = vst [vmem:[#allocation18_spill] sm:$0xff] %v9745_v47  ;;  %v6081_v47 = vadd.f32 %v7759_v35, %v9655_v48  ;;  %v6084_v10 = vadd.f32 %v7762_v38, %v9657_v2  ;;  %v9774_v35 = vld [vmem:[%s9930_s4] ss:$0 sm:$0xff]  ;;  %v9778_v2 = vadd.f32 %v7737_v50, %v9683_v13  ;;  %v6097_v16 = vadd.f32 %v7771_v30, %v9663_v26 }
 0x381   : > { %10010 = vst [vmem:[#allocation19_spill] sm:$0xff] %v9743_v25  ;;  %v6092_v56 = vadd.f32 %v7768_v0, %v9661_v22  ;;  %v6105_v22 = vadd.f32 %v7777_v61, %v9667_v27  ;;  %v7841_v0 = vadd.f32 %v7840_v28, %v7839_v43  ;;  %v7835_v27 = vadd.f32 %v9701_v45, %v9699_v40  ;;  %v10015_v61 = vld [vmem:[#allocation22_spill] sm:$0xff] }
 0x382   : > { %v9747_v42 = vpop.f32.mrf.mxu1  ;;  %v7789_v26 = vadd.f32 %v7788_v57, %v9725_v44  ;;  %v7844_v45 = vadd.f32 %v9713_v5, %v9709_v29  ;;  %v6361_v57 = vld [vmem:[#allocation2 + $0x39] sm:$0xff] }
 0x383   : > { %10012 = vst [vmem:[#allocation20_spill] sm:$0xff] %v9747_v42  ;;  %v7823_v42 = vadd.f32 %v7822_v23, %v7821_v9  ;;  %v7774_v9 = vadd.f32 %v7773_v24, %v7772_v20  ;;  %v7780_v23 = vadd.f32 %v7779_v21, %v7778_v37  ;;  %v6181_v20 = vadd.f32 %v7826_v60, %v6084_v10 }
 0x384   : > { %v7838_v37 = vadd.f32 %v9705_v55, %v9703_v59  ;;  %v6202_v40 = vadd.f32 %v7841_v0, %v6105_v22  ;;  %v6194_v38 = vadd.f32 %v7835_v27, %v6097_v16  ;;  %v6121_v50 = vadd.f32 %v7789_v26, %v10015_v61  ;;  %v10019_v0 = vld [vmem:[#allocation26_spill] sm:$0xff]  ;;  %v10023_v27 = vld [vmem:[#allocation23_spill] sm:$0xff] }
 0x385   : > { %v9749_v19 = vpop.f32.mrf.mxu0  ;;  %v6178_v33 = vadd.f32 %v7823_v42, %v6081_v47  ;;  %v6100_v13 = vadd.f32 %v7774_v9, %v9665_v39  ;;  %v6108_v21 = vadd.f32 %v7780_v23, %v9669_v62  ;;  %v7783_v62 = vadd.f32 %v9711_v51, %v9707_v41  ;;  %v10014_v42 = vld [vmem:[#allocation29_spill] sm:$0xff]  ;;  %v10020_v23 = vld [vmem:[#allocation27_spill] sm:$0xff] }
 0x386   : > { %10013 = vst [vmem:[#allocation11_spill] sm:$0xff] %v9749_v19  ;;  %v7832_v19 = vadd.f32 %v7831_v17, %v7830_v36  ;;  %v7740_v36 = vadd.f32 %v9693_v7, %v9691_v52  ;;  %v6363_v52 = vld [vmem:[#allocation2 + $0x51] sm:$0xff]  ;;  %v7792_v44 = vadd.f32 %v10014_v42, %v9729_v49  ;;  %v6366_v41 = vld [vmem:[#allocation2 + $0x79] sm:$0xff]  ;;  %v6367_v26 = vld [vmem:[#allocation2 + $0x81] sm:$0xff] }
 0x387   : > { %v9756_v63 = vpop.f32.mrf.mxu0  ;;  %v6197_v60 = vadd.f32 %v7838_v37, %v6100_v13 }
 0x388   : > { %v6189_v34 = vadd.f32 %v7832_v19, %v6092_v56  ;;  %v9798_v19 = vadd.f32 %v7740_v36, %v9685_v46  ;;  %v10016_v56 = vld [vmem:[#allocation30_spill] sm:$0xff]  ;;  %v10017_v46 = vld [vmem:[#allocation16_spill] sm:$0xff] }
 0x389   : > { %v9766_v1 = vpop.f32.mrf.mxu0  ;;  %v6364_v36 = vld [vmem:[#allocation2 + $0x61] sm:$0xff] }
 0x38a   : > { %v9751_v11 = vpop.f32.mrf.mxu1 }
 0x38b   : > { %v9780_v4 = vpop.f32.mrf.mxu0 }
 0x38c   : > { %v9753_v53 = vpop.f32.mrf.mxu1 }
 0x38d   : > { %v7801_v37 = vadd.f32 %v9753_v53, %v9751_v11  ;;  %v6365_v11 = vld [vmem:[#allocation2 + $0x69] sm:$0xff] }
 0x38e   : > { %v9758_v25 = vpop.f32.mrf.mxu1 }
 0x390   : > { %v9761_v6 = vpop.f32.mrf.mxu1 }
 0x392   : > { %v7939_v48 = vpop.f32.mrf.mxu1 }
 0x393   : > { %v6283_v12 = vadd.f32 %v7939_v48, %v6186_v31  ;;  %v7863_v43 = vpop.f32.mrf.mxu0  ;;  %v7853_v31 = vadd.f32 %v10017_v46, %v10016_v56  ;;  %v6137_v46 = vadd.f32 %v7801_v37, %v9778_v2 }
 0x394   : > { %v6274_v8 = vpop.f32.mrf.mxu1 }
 0x395   : > { %v6346_v58 = vadd.f32 %v9774_v35, %v6283_v12  ;;  %v6275_v32 = vadd.f32 %v6274_v8, %v6178_v33  ;;  %v7864_v30 = vpop.f32.mrf.mxu0  ;;  %v6205_v12 = vadd.f32 %v7844_v45, %v6108_v21  ;;  %v10018_v33 = vld [vmem:[#allocation21_spill] sm:$0xff] }
 0x396   : > { %v7940_v17 = vpop.f32.mrf.mxu1  ;;  %v6113_v22 = vadd.f32 %v7783_v62, %v10018_v33  ;;  %v10021_v8 = vld [vmem:[#allocation25_spill] sm:$0xff]  ;;  %v10026_v62 = vld [vmem:[#allocation12_spill] sm:$0xff] }
 0x397   : > { %v6378_v24 = vadd.f32 %v6362_v18, %v6346_v58  ;;  %v6344_v54 = vadd.f32 %v9774_v35, %v6275_v32  ;;  %v6286_v3 = vadd.f32 %v7940_v17, %v6189_v34  ;;  %v7847_v18 = vadd.f32 %v10020_v23, %v10019_v0  ;;  %v10022_v58 = vld [vmem:[#allocation14_spill] sm:$0xff]  ;;  %v10032_v23 = vld [vmem:[#allocation11_spill] sm:$0xff] }
 0x398   : > { %v6277_v7 = vpop.f32.mrf.mxu1  ;;  %v7786_v32 = vadd.f32 %v10022_v58, %v10021_v8  ;;  %v7859_v2 = vadd.f32 %v9756_v63, %v10032_v23 }
 0x399   : > { %v6394_v39 = vmax.f32 %v6378_v24, 0.0  ;;  %v6376_v28 = vadd.f32 %v6360_v14, %v6344_v54  ;;  %v6347_v47 = vadd.f32 %v9774_v35, %v6286_v3  ;;  %v6278_v59 = vadd.f32 %v6277_v7, %v6181_v20  ;;  %v10024_v24 = vld [vmem:[#allocation17_spill] sm:$0xff]  ;;  %v10025_v54 = vld [vmem:[#allocation18_spill] sm:$0xff] }
 0x39a   : > { %v7943_v55 = vpop.f32.mrf.mxu1  ;;  %v6124_v14 = vadd.f32 %v7792_v44, %v10023_v27  ;;  %v7856_v3 = vadd.f32 %v10025_v54, %v10024_v24  ;;  %v6218_v7 = vadd.f32 %v7853_v31, %v6121_v50  ;;  %v10029_v44 = vld [vmem:[#allocation31_spill] sm:$0xff]  ;;  %v7865_v31 = vadd.f32 %v7864_v30, %v7863_v43  ;;  %v10034_v30 = vld [vmem:[#allocation20_spill] sm:$0xff] }
 0x39b   : > { %6410 = vst [vmem:[%s8650_s30 + $0x10] sm:$0xff] %v6394_v39  ;;  %v6392_v29 = vmax.f32 %v6376_v28, 0.0  ;;  %v6379_v5 = vadd.f32 %v6363_v52, %v6347_v47  ;;  %v6299_v15 = vadd.f32 %v7943_v55, %v6202_v40  ;;  %v6345_v10 = vadd.f32 %v9774_v35, %v6278_v59  ;;  %v7866_v40 = vpop.f32.mrf.mxu0  ;;  %v10027_v55 = vld [vmem:[#allocation28_spill] sm:$0xff]  ;;  %v10033_v43 = vld [vmem:[#allocation19_spill] sm:$0xff] }
 0x39c   : > { %v6290_v51 = vpop.f32.mrf.mxu1  ;;  %v6116_v59 = vadd.f32 %v7786_v32, %v10026_v62 }
 0x39d   : > { %6408 = vst [vmem:[%s8650_s30] sm:$0xff] %v6392_v29  ;;  %v6395_v48 = vmax.f32 %v6379_v5, 0.0  ;;  %v6350_v49 = vadd.f32 %v9774_v35, %v6299_v15  ;;  %v6291_v9 = vadd.f32 %v6290_v51, %v6194_v38  ;;  %v6377_v34 = vadd.f32 %v6361_v57, %v6345_v10  ;;  %v10028_v38 = vld [vmem:[#allocation15_spill] sm:$0xff]  ;;  %v10030_v29 = vld [vmem:[#allocation32_spill] sm:$0xff] }
 0x39e   : > { %v7944_v16 = vpop.f32.mrf.mxu1  ;;  %v7850_v42 = vadd.f32 %v10028_v38, %v10027_v55  ;;  %v7795_v5 = vadd.f32 %v10030_v29, %v10029_v44  ;;  %v6210_v57 = vadd.f32 %v7847_v18, %v6113_v22  ;;  %v7804_v10 = vadd.f32 %v9761_v6, %v9758_v25  ;;  %v10031_v22 = vld [vmem:[#allocation24_spill] sm:$0xff]  ;;  %v6372_v38 = vld [vmem:[#allocation2 + $0xc1] sm:$0xff] }
 0x39f   : > { %6411 = vst [vmem:[%s8650_s30 + $0x18] sm:$0xff] %v6395_v48  ;;  %v6382_v17 = vadd.f32 %v6366_v41, %v6350_v49  ;;  %v6348_v20 = vadd.f32 %v9774_v35, %v6291_v9  ;;  %v6302_v13 = vadd.f32 %v7944_v16, %v6205_v12  ;;  %v6393_v21 = vmax.f32 %v6377_v34, 0.0  ;;  %v6370_v41 = vld [vmem:[#allocation2 + $0xa9] sm:$0xff]  ;;  %v7867_v48 = vpop.f32.mrf.mxu0  ;;  %v6368_v6 = vld [vmem:[#allocation2 + $0x91] sm:$0xff] }
 0x3a0   : > { %v6293_v52 = vpop.f32.mrf.mxu1  ;;  %v6129_v0 = vadd.f32 %v7795_v5, %v10031_v22  ;;  %v7798_v25 = vadd.f32 %v10034_v30, %v10033_v43  ;;  %v6213_v8 = vadd.f32 %v7850_v42, %v6116_v59  ;;  %v6140_v16 = vadd.f32 %v7804_v10, %v9798_v19 }
 0x3a1   : > { %v6398_v45 = vmax.f32 %v6382_v17, 0.0  ;;  %v6380_v39 = vadd.f32 %v6364_v36, %v6348_v20  ;;  %v6351_v28 = vadd.f32 %v9774_v35, %v6302_v13  ;;  %v6294_v47 = vadd.f32 %v6293_v52, %v6197_v60  ;;  %6409 = vst [vmem:[%s8650_s30 + $0x8] sm:$0xff] %v6393_v21 }
 0x3a2   : > { %v7947_v53 = vpop.f32.mrf.mxu1  ;;  %v6221_v60 = vadd.f32 %v7856_v3, %v6124_v14  ;;  %v7868_v27 = vadd.f32 %v7867_v48, %v7866_v40  ;;  %v6371_v14 = vld [vmem:[#allocation2 + $0xb1] sm:$0xff]  ;;  %v6234_v20 = vadd.f32 %v7865_v31, %v6137_v46  ;;  %v7862_v21 = vadd.f32 %v9780_v4, %v9766_v1  ;;  %v6373_v31 = vld [vmem:[#allocation2 + $0xc9] sm:$0xff] }
 0x3a3   : > { %6414 = vst [vmem:[%s8650_s30 + $0x30] sm:$0xff] %v6398_v45  ;;  %v6396_v15 = vmax.f32 %v6380_v39, 0.0  ;;  %v6383_v61 = vadd.f32 %v6367_v26, %v6351_v28  ;;  %v6349_v50 = vadd.f32 %v9774_v35, %v6294_v47  ;;  %v6315_v56 = vadd.f32 %v7947_v53, %v6218_v7  ;;  %v10035_v3 = vld [vmem:[#allocation13_spill] sm:$0xff] }
 0x3a4   : > { %v6306_v51 = vpop.f32.mrf.mxu1  ;;  %v6132_v37 = vadd.f32 %v7798_v25, %v10035_v3  ;;  %v6369_v26 = vld [vmem:[#allocation2 + $0x99] sm:$0xff]  ;;  %v6226_v7 = vadd.f32 %v7859_v2, %v6129_v0  ;;  %v6237_v62 = vadd.f32 %v7868_v27, %v6140_v16 }
 0x3a5   : > { %6412 = vst [vmem:[%s8650_s30 + $0x20] sm:$0xff] %v6396_v15  ;;  %v6399_v49 = vmax.f32 %v6383_v61, 0.0  ;;  %v6381_v9 = vadd.f32 %v6365_v11, %v6349_v50  ;;  %v6354_v12 = vadd.f32 %v9774_v35, %v6315_v56  ;;  %v6307_v33 = vadd.f32 %v6306_v51, %v6210_v57  ;;  %v6374_v28 = vld [vmem:[#allocation2 + $0xd9] sm:$0xff]  ;;  %v6375_v57 = vld [vmem:[#allocation2 + $0xe1] sm:$0xff] }
 0x3a6   : > { %v7948_v18 = vpop.f32.mrf.mxu1  ;;  %v6229_v44 = vadd.f32 %v7862_v21, %v6132_v37 }
 0x3a7   : > { %6415 = vst [vmem:[%s8650_s30 + $0x38] sm:$0xff] %v6399_v49  ;;  %v6397_v58 = vmax.f32 %v6381_v9, 0.0  ;;  %v6386_v32 = vadd.f32 %v6370_v41, %v6354_v12  ;;  %v6352_v34 = vadd.f32 %v9774_v35, %v6307_v33  ;;  %v6318_v36 = vadd.f32 %v7948_v18, %v6221_v60 }
 0x3a8   : > { %v6309_v17 = vpop.f32.mrf.mxu1 }
 0x3a9   : > { %6413 = vst [vmem:[%s8650_s30 + $0x28] sm:$0xff] %v6397_v58  ;;  %v6402_v63 = vmax.f32 %v6386_v32, 0.0  ;;  %v6384_v13 = vadd.f32 %v6368_v6, %v6352_v34  ;;  %v6355_v24 = vadd.f32 %v9774_v35, %v6318_v36  ;;  %v6310_v54 = vadd.f32 %v6309_v17, %v6213_v8 }
 0x3aa   : > { %v7951_v52 = vpop.f32.mrf.mxu1 }
 0x3ab   : > { %6418 = vst [vmem:[%s8650_s30 + $0x50] sm:$0xff] %v6402_v63  ;;  %v6400_v19 = vmax.f32 %v6384_v13, 0.0  ;;  %v6387_v40 = vadd.f32 %v6371_v14, %v6355_v24  ;;  %v6353_v45 = vadd.f32 %v9774_v35, %v6310_v54  ;;  %v6331_v39 = vadd.f32 %v7951_v52, %v6234_v20 }
 0x3ac   : > { %v6322_v47 = vpop.f32.mrf.mxu1 }
 0x3ad   : > { %6416 = vst [vmem:[%s8650_s30 + $0x40] sm:$0xff] %v6400_v19  ;;  %v6403_v59 = vmax.f32 %v6387_v40, 0.0  ;;  %v6385_v55 = vadd.f32 %v6369_v26, %v6353_v45  ;;  %v6358_v1 = vadd.f32 %v9774_v35, %v6331_v39  ;;  %v6323_v4 = vadd.f32 %v6322_v47, %v6226_v7 }
 0x3ae   : > { %v7952_v42 = vpop.f32.mrf.mxu1 }
 0x3af   : > { %6419 = vst [vmem:[%s8650_s30 + $0x58] sm:$0xff] %v6403_v59  ;;  %v6401_v29 = vmax.f32 %v6385_v55, 0.0  ;;  %v6390_v5 = vadd.f32 %v6374_v28, %v6358_v1  ;;  %v6356_v11 = vadd.f32 %v9774_v35, %v6323_v4  ;;  %v6334_v53 = vadd.f32 %v7952_v42, %v6237_v62 }
 0x3b0   : > { %v6325_v15 = vpop.f32.mrf.mxu1 }
 0x3b1   : > { %6417 = vst [vmem:[%s8650_s30 + $0x48] sm:$0xff] %v6401_v29  ;;  %v6406_v61 = vmax.f32 %v6390_v5, 0.0  ;;  %v6388_v50 = vadd.f32 %v6372_v38, %v6356_v11  ;;  %v6359_v56 = vadd.f32 %v9774_v35, %v6334_v53  ;;  %v6326_v46 = vadd.f32 %v6325_v15, %v6229_v44 }
 0x3b3   : > { %6422 = vst [vmem:[%s8650_s30 + $0x70] sm:$0xff] %v6406_v61  ;;  %v6404_v10 = vmax.f32 %v6388_v50, 0.0  ;;  %v6391_v41 = vadd.f32 %v6375_v57, %v6359_v56  ;;  %v6357_v51 = vadd.f32 %v9774_v35, %v6326_v46 }
 0x3b5   : > { %6420 = vst [vmem:[%s8650_s30 + $0x60] sm:$0xff] %v6404_v10  ;;  %v6407_v60 = vmax.f32 %v6391_v41, 0.0  ;;  %v6389_v48 = vadd.f32 %v6373_v31, %v6357_v51 }
 0x3b7   : > { %6423 = vst [vmem:[%s8650_s30 + $0x78] sm:$0xff] %v6407_v60  ;;  %v6405_v49 = vmax.f32 %v6389_v48, 0.0 }
 0x3b9   : > { %6421 = vst [vmem:[%s8650_s30 + $0x68] sm:$0xff] %v6405_v49 }
 0x3ba   : > { %8412 = shalt.err (!%p8409_p7)
}
 0x3bb   : > { %s8413_s12 = scalar_lea.hbm %s9870_s14, 2048  ;;  %s8417_s21 = scalar_lea.hbm %s9931_s5, 8192 }
 0x3bc   : > { %p8414_p9 = scmp.ne.s32.totalorder %s9870_s14, %s8413_s12  ;;  %p8418_p12 = scmp.lt.s32.totalorder %s9870_s14, %s9931_s5 }
 0x3bd   : > { %p8419_p13 = scmp.lt.s32.totalorder %s8417_s21, %s8413_s12 }
 0x3be   : > { %p8415_p10 = pnand %p8414_p9, %p8581_p3 }
 0x3bf   : > { %p8420_p0 = por %p8419_p13, %p8418_p12 }
 0x3c0   : > { %p8416_p11 = pneg %p8415_p10 }
 0x3c2   : > { %p8421_p1 = pnand %p8420_p0, %p8416_p11 }
 0x3c4   : > { %8424 = shalt.err (!%p8421_p1)
}
 0x3c5   : > { %s8498_s17 = smov 128   ;;  %s8499_s27 = smov 8  }
 0x3c6   : > { %7953 = dma.vmem_to_hbm [thread:$0]  (%p8581_p3), %s9864_s22, 2048, %s9870_s14, %s9875_s26, %s8498_s17, %s8498_s17, %s8499_s27  }
 0x3c7 PF: > { %p7959_p2 = scmp.ge.s32.totalorder %s8493_s25, 2  ;;  %s6456_s8 = sand.u32 1, %s8465_s18  }
 0x3c8   : > { %s6457_s9 = scalar_lea.sflag [#allocation7], %s6456_s8 }
 0x3c9   : > { %p7956_p4 = pnand %p7959_p2, %p8590_p8 }
 0x3cb   : > { %p7957_p5 = pneg %p7956_p4 }
 0x3cd   : > { %8460 = dma.done.wait (%p7957_p5), %s6457_s9, 2048  }
 0x3ce   : > { %8462 = vsyncadd (%p7957_p5), %s6457_s9, 4294965248  ;;  %s18_s25 = sadd.s32 1, %s8493_s25   ;;  %s10036_s18 = smov %s8469_s19 }
 0x3cf   : > { %p15_p6 = scmp.ge.s32.totalorder %s18_s25, 6   ;;  %s10037_s19 = smov %s8473_s20 }
 0x3d0   : > { %s10038_s20 = smov %s8599_s11  ;;  %s10039_s21 = smov %s8485_s23 }
 0x3d1   : > { %s10040_s22 = smov %s8489_s24  ;;  %s10041_s23 = smov %s10044_s28 }
 0x3d2   : > { %s10042_s24 = smov %s10048_s29  ;;  %17 = sbr.rel (!%p15_p6) target bundleno = 5 (0x5), region = 133 }
 0x3d7   :  { %6462 = vsyncpa [#allocation7], 1 }
 0x3d8   :  { %6464 = vsyncpa [#allocation7 + $0x1], 1 }
 0x3d9   :  { %6465 = vsyncmov [#allocation5] }
 0x3dc   :  { %s6466_s6 = vpop.sfrf %6465 }
 0x3dd   :  { %p7089_p3 = scmp.ne.s32.totalorder %s6466_s6, 0 }
 0x3df   :  { %6470 = shalt.err (%p7089_p3)  }

</bundles_post_ra>
